<compile_context>
chip_gen: v7x
topology: tpu7x:2x2x1
jax: 0.10.0
libtpu: 0.0.40
codegen_flags: <defaults>
</compile_context>

<pallas_src>
import functools
import math

import jax
import jax.numpy as jnp
from jax.experimental import pallas as pl
from jax.experimental.pallas import tpu as pltpu

# ----------------------------- scaled-down config ----------------------------
B, S = 2, 8           # batch, sequence length
D = 32                # decoder_embed_dim        (real: 2048)
H = 4                 # decoder_attention_heads  (real: 32)
DH = D // H           # head dim
FFN = 64              # decoder_ffn_embed_dim    (real: 8192)
LAYERS = 2            # decoder_layers           (real: 24)
SEG = 4               # decoder_segment_size     (real: 2)
DIL = 2               # decoder_dilation_rate    (real: 4)
VOCAB_IN = 256        # embedding vocab          (real: 320002)
VOCAB_OUT = 128       # output projection vocab  (real: 32002)
MAX_POS = 64          # positional table size; must be >= S + PAD_IDX + 1
PAD_IDX = 1
EPS = 1e-5
DTYPE = jnp.bfloat16  # activations / weights (bf16 MXU path); accumulation f32

SEL = tuple(range(0, SEG, DIL))   # dilated offsets within a segment
T_SEL = len(SEL)
# dilated tokens are every CHUNK-th row of a segment (holds for the demo config
# SEG=4/DIL=2 and for the real config SEG=2/DIL=4 where only offset 0 survives)
assert SEG % DIL == 0 or T_SEL == 1
CHUNK = SEG // T_SEL


def _round_up(x, m):
    return (x + m - 1) // m * m


# --------------------------- generation-aware tiling --------------------------
def _tpu_generation():
    try:
        kind = jax.devices()[0].device_kind.lower()
    except Exception:
        kind = ""
    if "v5 lite" in kind or "v5e" in kind or "v5lite" in kind:
        return "v5e"
    if "v6" in kind or "trillium" in kind:
        return "v6e"
    if "v7" in kind:
        return "v7x"
    return "other"


_GEN = _tpu_generation()
if _GEN == "v6e":
    # 128 MiB VMEM, ridge ~700 FLOP/B -> large output tiles (AI ~683)
    TM_CAP, TN_CAP, TK_CAP = 1024, 2048, 1024
    VMEM_LIMIT = 96 * 1024 * 1024
    WEIGHT_BUFFERS = 2
elif _GEN == "v5e":
    # slowest HBM; modest tiles (ridge ~240 FLOP/B) + deeper weight stream
    TM_CAP, TN_CAP, TK_CAP = 512, 512, 512
    VMEM_LIMIT = 64 * 1024 * 1024
    WEIGHT_BUFFERS = 3
else:
    # v7x (64 MiB VMEM/TC) and unknown chips: AI ~341 > ~311 FLOP/B ridge,
    # total tile VMEM ~12 MiB, limit kept well under the 64 MiB physical.
    TM_CAP, TN_CAP, TK_CAP = 512, 1024, 512
    VMEM_LIMIT = 48 * 1024 * 1024
    WEIGHT_BUFFERS = 2

DP = _round_up(D, 128)        # lane-padded model dim
QKVP = _round_up(3 * D, 128)  # lane-padded packed q|k|v width


def _tile_for(dim, cap, granule):
    """Return (tile, padded_dim); tile is granule-aligned, padded_dim a tile multiple."""
    t = min(cap, _round_up(dim, granule))
    return t, _round_up(dim, t)


def _pad2d(a, rows, cols):
    r, c = a.shape
    if r == rows and c == cols:
        return a
    return jnp.pad(a, ((0, rows - r), (0, cols - c)))


def _largest_divisor(n, cap):
    best = 1
    for d in range(1, min(n, cap) + 1):
        if n % d == 0:
            best = d
    return best


def _weight_spec(block_shape):
    """Weight-operand BlockSpec; deeper buffering on v5e to hide HBM latency."""
    index_map = lambda i, j, k: (k, j)
    if WEIGHT_BUFFERS != 2 and hasattr(pl, "Buffered"):
        try:
            return pl.BlockSpec(block_shape, index_map,
                                pipeline_mode=pl.Buffered(WEIGHT_BUFFERS))
        except TypeError:
            pass
    return pl.BlockSpec(block_shape, index_map)


# ------------------------------- Pallas kernels ------------------------------
def _ln_stats_kernel(x_ref, mu_ref, rs_ref, *, k_real, k_padded):
    """Per-row LayerNorm stats (mean, rstd) over the first k_real columns."""
    xf = x_ref[...].astype(jnp.float32)                       # (tm, Kp)
    inv_k = 1.0 / k_real
    mu = jnp.sum(xf, axis=-1, keepdims=True) * inv_k
    xc = xf - mu
    if k_real != k_padded:                                    # mask the zero padding
        col = jax.lax.broadcasted_iota(jnp.int32, xf.shape, 1)
        xc = jnp.where(col < k_real, xc, 0.0)
    var = jnp.sum(xc * xc, axis=-1, keepdims=True) * inv_k
    mu_ref[...] = mu
    rs_ref[...] = jax.lax.rsqrt(var + EPS)


def _matmul_kernel(x_ref, w_ref, *rest, has_ln, has_bias, gelu, has_residual):
    """Tiled matmul with fused pre-LayerNorm (from precomputed stats), bias,
    GELU and residual add in the writeback.

    ref order: x, w, [mu, rstd, gamma, beta], [bias], [residual], out, acc.
    Grid is (M-tiles, N-tiles, K-tiles); K is the reduction ("arbitrary") axis
    and stays fully pipelined even for LN'd inputs.
    """
    idx = 0
    if has_ln:
        mu_ref, rs_ref, g_ref, beta_ref = rest[idx:idx + 4]
        idx += 4
    if has_bias:
        bias_ref = rest[idx]
        idx += 1
    if has_residual:
        res_ref = rest[idx]
        idx += 1
    o_ref, acc_ref = rest[idx], rest[idx + 1]

    k = pl.program_id(2)

    @pl.when(k == 0)
    def _():
        acc_ref[...] = jnp.zeros_like(acc_ref)

    if has_ln:
        x = x_ref[...].astype(jnp.float32)
        x = (x - mu_ref[...]) * rs_ref[...]
        x = x * g_ref[...].astype(jnp.float32) + beta_ref[...].astype(jnp.float32)
        x = x.astype(jnp.bfloat16)
    else:
        x = x_ref[...].astype(jnp.bfloat16)

    acc_ref[...] += jnp.dot(x, w_ref[...].astype(jnp.bfloat16),
                            preferred_element_type=jnp.float32)

    @pl.when(k == pl.num_programs(2) - 1)
    def _():
        y = acc_ref[...]
        if has_bias:
            y = y + bias_ref[...].astype(jnp.float32)
        if gelu:
            # TODO(synk): torch F.gelu defaults to the exact erf form; tanh
            # approximation used for guaranteed Mosaic lowering (~1e-3 close).
            y = jax.nn.gelu(y, approximate=True)
        if has_residual:
            y = y + res_ref[...].astype(jnp.float32)
        o_ref[...] = y.astype(o_ref.dtype)


def _dilated_attn_kernel(qkv_ref, o_ref):
    """Per-segment dilated causal attention on a block of gb (batch,segment) groups.

    qkv_ref: (gb, T_SEL, QKVP) -- ONLY the dilated tokens; the gather already
             happened in the BlockSpec DMA (lane-block 0 of the regrouped slab).
    o_ref  : (gb, T_SEL, DP)   -- compact attended values (pad lanes zeroed).
    """
    qkv = qkv_ref[...]                                        # bf16
    q = qkv[:, :, 0:D]
    k = qkv[:, :, D:2 * D]
    v = qkv[:, :, 2 * D:3 * D]

    scale = 1.0 / math.sqrt(DH)
    row = jax.lax.broadcasted_iota(jnp.int32, (T_SEL, T_SEL), 0)
    col = jax.lax.broadcasted_iota(jnp.int32, (T_SEL, T_SEL), 1)
    causal = (col <= row)[None, :, :]                         # (1, T, T)

    # TODO(synk): for the real H=32 config, batch the heads (extra grid axis or
    # a single batched contraction) instead of this static per-head loop.
    outs = []
    for h in range(H):
        lo = h * DH
        qh = q[:, :, lo:lo + DH]
        kh = k[:, :, lo:lo + DH]
        vh = v[:, :, lo:lo + DH]
        s = jnp.einsum("gtd,gsd->gts", qh, kh,
                       preferred_element_type=jnp.float32) * scale
        s = jnp.where(causal, s, -1e30)                       # causal within segment
        s = s - jnp.max(s, axis=-1, keepdims=True)
        p = jnp.exp(s)
        p = p * pl.reciprocal(jnp.sum(p, axis=-1, keepdims=True), approx=True)
        outs.append(jnp.einsum("gts,gsd->gtd", p.astype(vh.dtype), vh,
                               preferred_element_type=jnp.float32))
    o = jnp.concatenate(outs, axis=-1)                        # (gb, T, D) f32
    if DP > D:
        o = jnp.concatenate(
            [o, jnp.zeros((o.shape[0], T_SEL, DP - D), jnp.float32)], axis=-1)
    o_ref[...] = o.astype(o_ref.dtype)


# ------------------------------- Pallas wrappers ------------------------------
def _stats_tile(mp):
    for cand in (256, 128, 64, 32, 16, 8):
        if mp % cand == 0:
            return cand
    return mp


def layernorm_stats(x_pad, k_real):
    """Per-row (mean, rstd) over the first k_real columns of the padded slab."""
    Mp, Kp = x_pad.shape
    tm = _stats_tile(Mp)
    kern = functools.partial(_ln_stats_kernel, k_real=k_real, k_padded=Kp)
    return pl.pallas_call(
        kern,
        grid=(Mp // tm,),
        in_specs=[pl.BlockSpec((tm, Kp), lambda i: (i, 0))],
        out_specs=[pl.BlockSpec((tm, 1), lambda i: (i, 0)),
                   pl.BlockSpec((tm, 1), lambda i: (i, 0))],
        out_shape=[jax.ShapeDtypeStruct((Mp, 1), jnp.float32),
                   jax.ShapeDtypeStruct((Mp, 1), jnp.float32)],
        compiler_params=pltpu.CompilerParams(
            dimension_semantics=("parallel",),
            vmem_limit_bytes=VMEM_LIMIT),
    )(x_pad)


def fused_linear(x, w_pad, n_out, b_pad=None, ln=None, gelu=False,
                 residual=None, out_dtype=None):
    """y = [residual +] [gelu]( LN?(x) @ W [+ b] ), sliced back to (M, n_out).

    x:     (M, K) activation (K may already equal the padded Kp of w_pad).
    w_pad: (Kp, Np) weight pre-padded (zeros) to tile multiples at init.
    b_pad: (1, Np) bias or None.   ln: (gamma(1,Kp), beta(1,Kp)) or None.
    When ln is given, per-row (mean, rstd) come from a small stats kernel and
    the normalization is applied per (tm, tk) tile inside the K loop, so K
    stays pipelined (no full-K f32 intermediate, no per-N-tile recompute of stats).
    """
    M, K = x.shape
    Kp, Np = w_pad.shape
    assert K <= Kp and n_out <= Np
    tm, Mp = _tile_for(M, TM_CAP, 8)
    tk = min(TK_CAP, Kp)
    tn = min(TN_CAP, Np)
    assert Kp % tk == 0 and Np % tn == 0
    out_dtype = out_dtype or x.dtype

    x_pad = _pad2d(x, Mp, Kp)
    args = [x_pad, w_pad]
    in_specs = [pl.BlockSpec((tm, tk), lambda i, j, k: (i, k)),
                _weight_spec((tk, tn))]
    if ln is not None:
        mu, rs = layernorm_stats(x_pad, K)
        g_pad, beta_pad = ln
        args += [mu, rs, g_pad, beta_pad]
        in_specs += [pl.BlockSpec((tm, 1), lambda i, j, k: (i, 0)),
                     pl.BlockSpec((tm, 1), lambda i, j, k: (i, 0)),
                     pl.BlockSpec((1, tk), lambda i, j, k: (0, k)),
                     pl.BlockSpec((1, tk), lambda i, j, k: (0, k))]
    if b_pad is not None:
        args.append(b_pad)
        in_specs.append(pl.BlockSpec((1, tn), lambda i, j, k: (0, j)))
    if residual is not None:
        args.append(_pad2d(residual, Mp, Np))
        in_specs.append(pl.BlockSpec((tm, tn), lambda i, j, k: (i, j)))

    kern = functools.partial(_matmul_kernel, has_ln=ln is not None,
                             has_bias=b_pad is not None, gelu=gelu,
                             has_residual=residual is not None)
    out = pl.pallas_call(
        kern,
        grid=(Mp // tm, Np // tn, Kp // tk),
        in_specs=in_specs,
        out_specs=pl.BlockSpec((tm, tn), lambda i, j, k: (i, j)),
        out_shape=jax.ShapeDtypeStruct((Mp, Np), out_dtype),
        scratch_shapes=[pltpu.VMEM((tm, tn), jnp.float32)],
        compiler_params=pltpu.CompilerParams(
            dimension_semantics=("parallel", "parallel", "arbitrary"),
            vmem_limit_bytes=VMEM_LIMIT),
    )(*args)
    return out[:M, :n_out]


def dilated_attention(qkv_p):
    """qkv_p: (M, QKVP) lane-padded packed q|k|v -> compact (G, T_SEL, DP) output.

    The dilated gather (every CHUNK-th token of each segment) is performed by
    the BlockSpec DMA: regrouping the slab to (G, T_SEL, CHUNK*QKVP) puts the
    selected token's features in lane-block 0 of each (g, t) row, so the block
    covering lane-block 0 reads exactly the dilated tokens (no in-kernel
    shuffle and no zero-scatter; output is compact so Wo skips the zero rows).
    """
    M, _ = qkv_p.shape
    assert M % SEG == 0
    G = M // SEG
    qkv4 = qkv_p.reshape(G, T_SEL, CHUNK * QKVP)      # free row-major regroup
    gb = _largest_divisor(G, 512)                     # big group blocks per step
    return pl.pallas_call(
        _dilated_attn_kernel,
        grid=(G // gb,),
        in_specs=[pl.BlockSpec((gb, T_SEL, QKVP), lambda i: (i, 0, 0))],
        out_specs=pl.BlockSpec((gb, T_SEL, DP), lambda i: (i, 0, 0)),
        out_shape=jax.ShapeDtypeStruct((G, T_SEL, DP), DTYPE),
        compiler_params=pltpu.CompilerParams(
            dimension_semantics=("parallel",),
            vmem_limit_bytes=VMEM_LIMIT),
    )(qkv4)


# --------------------------------- model glue ---------------------------------
def decoder_layer(x2d, p):
    """One pre-norm decoder layer on a (B*S, D) activation slab."""
    M = x2d.shape[0]
    G = M // SEG

    # ---- self-attention sub-block: LN1 fused into the QKV projection ----
    qkv = fused_linear(x2d, p["wqkv"], 3 * D, p["bqkv"], ln=(p["ln1_g"], p["ln1_b"]))
    qkv_p = _pad2d(qkv, M, QKVP)                       # no-op when 3D % 128 == 0
    attn_c = dilated_attention(qkv_p)                  # compact: dilated tokens only
    # Wo on compact tokens only (skips the (1-1/DIL) zero rows of the old scheme)
    wo_c = fused_linear(attn_c.reshape(G * T_SEL, DP), p["wo"], D)
    # scatter-add back into the residual stream; Wo(0)+bias = bias everywhere
    x4 = x2d.reshape(G, T_SEL, CHUNK, D)
    x4 = x4.at[:, :, 0, :].add(wo_c.reshape(G, T_SEL, D).astype(x2d.dtype))
    x2d = x4.reshape(M, D) + p["bo"][None, :]

    # ---- feed-forward sub-block (torchscale subln) ----
    h = fused_linear(x2d, p["fc1_w"], FFN, p["fc1_b"],
                     ln=(p["ln2_g"], p["ln2_b"]), gelu=True)
    x2d = fused_linear(h, p["fc2_w"], D, p["fc2_b"],
                       ln=(p["ffn_ln_g"], p["ffn_ln_b"]), residual=x2d)
    return x2d


def longnet_forward(tokens, params):
    b, s = tokens.shape
    # forward_embedding: embed_scale = 1.0 (torchscale no_scale_embedding default)
    # TODO(synk): embedding gathers (jnp.take) stay in XLA; a Pallas DMA-gather
    # kernel is not worthwhile at these vocab sizes.
    tok_emb = jnp.take(params["embed_tokens"], tokens, axis=0)        # (B, S, D)
    mask = (tokens != PAD_IDX).astype(jnp.int32)
    positions = jnp.cumsum(mask, axis=1) * mask + PAD_IDX             # fairseq make_positions
    pos_emb = jnp.take(params["embed_positions"], positions, axis=0)
    x2d = (tok_emb + pos_emb).astype(DTYPE).reshape(b * s, D)

    # decoder(model_input, passed_x=model_input): layers -> final LN -> out proj
    for lp in params["layers"]:
        x2d = decoder_layer(x2d, lp)

    # final LayerNorm fused into the (bias-free) output projection; f32 logits
    logits = fused_linear(x2d, params["out_proj_w"], VOCAB_OUT,
                          ln=(params["final_ln_g"], params["final_ln_b"]),
                          out_dtype=jnp.float32)
    return logits.reshape(b, s, VOCAB_OUT)


# ------------------------------ deterministic init -----------------------------
def init_params(key):
    """Parameters are created already padded (zeros) to tile multiples so the
    forward never re-pads weights/biases/LN params (only tiny activation pads)."""
    ks = jax.random.split(key, 3 + LAYERS)

    def nrm(k, shape, std=0.02):
        return (std * jax.random.normal(k, shape)).astype(DTYPE)

    def pad_w(w):
        K, N = w.shape
        return _pad2d(w, _tile_for(K, TK_CAP, 128)[1], _tile_for(N, TN_CAP, 128)[1])

    def pad_b(n):
        return jnp.zeros((1, _tile_for(n, TN_CAP, 128)[1]), DTYPE)

    def pad_g(v1d):
        n = v1d.shape[0]
        return _pad2d(v1d.reshape(1, n).astype(DTYPE), 1, _tile_for(n, TK_CAP, 128)[1])

    embed_tokens = nrm(ks[0], (VOCAB_IN, D)).at[PAD_IDX].set(0.0)     # padding_idx=1
    # fairseq LearnedPositionalEmbedding zeroes the padding row as well
    embed_positions = nrm(ks[1], (MAX_POS, D)).at[PAD_IDX].set(0.0)
    out_proj_w = pad_w(nrm(ks[2], (D, VOCAB_OUT)))

    layers = []
    for i in range(LAYERS):
        kk = jax.random.split(ks[3 + i], 4)
        layers.append(dict(
            ln1_g=pad_g(jnp.ones((D,))), ln1_b=pad_g(jnp.zeros((D,))),
            wqkv=pad_w(nrm(kk[0], (D, 3 * D))), bqkv=pad_b(3 * D),
            wo=pad_w(nrm(kk[1], (D, D))), bo=jnp.zeros((D,), DTYPE),
            ln2_g=pad_g(jnp.ones((D,))), ln2_b=pad_g(jnp.zeros((D,))),
            fc1_w=pad_w(nrm(kk[2], (D, FFN))), fc1_b=pad_b(FFN),
            ffn_ln_g=pad_g(jnp.ones((FFN,))), ffn_ln_b=pad_g(jnp.zeros((FFN,))),
            fc2_w=pad_w(nrm(kk[3], (FFN, D))), fc2_b=pad_b(D),
        ))

    return dict(
        embed_tokens=embed_tokens,
        embed_positions=embed_positions,
        out_proj_w=out_proj_w,
        final_ln_g=pad_g(jnp.ones((D,))),
        final_ln_b=pad_g(jnp.zeros((D,))),
        layers=layers,
    )


# ------------------------------------ main ------------------------------------
if __name__ == "__main__":
    key = jax.random.PRNGKey(0)
    k_tok, k_par = jax.random.split(key)
    text_tokens = jax.random.randint(k_tok, (B, S), 0, VOCAB_IN, dtype=jnp.int32)
    params = init_params(k_par)

    fwd = jax.jit(longnet_forward)
    logits = fwd(text_tokens, params)
    jax.block_until_ready(logits)

    assert logits.shape == (B, S, VOCAB_OUT), logits.shape
    assert logits.dtype == jnp.float32
    assert bool(jnp.all(jnp.isfinite(logits)))
    print("KERNEL_OK")
</pallas_src>

<mosaic_0001>
module attributes {stable_mosaic.version = 11 : i64} {
  func.func @_ln_stats_kernel(%arg0: i32, %arg1: memref<16x128xbf16, #tpu.memory_space<vmem>>, %arg2: memref<16x1xf32, #tpu.memory_space<vmem>>, %arg3: memref<16x1xf32, #tpu.memory_space<vmem>>) attributes {dimension_semantics = [#tpu.dimension_semantics<parallel>], iteration_bounds = array<i64: 1>, scalar_prefetch = 0 : i64, scratch_operands = 0 : i64, tpu.core_type = #tpu.core_type<tc>, window_params = [{transform_indices = @transform_0, window_bounds = array<i64: 16, 128>}, {transform_indices = @transform_1, window_bounds = array<i64: 16, 1>}, {transform_indices = @transform_2, window_bounds = array<i64: 16, 1>}]} {
    %c0 = arith.constant 0 : index
    %c0_0 = arith.constant 0 : index
    %0 = vector.load %arg1[%c0, %c0_0] : memref<16x128xbf16, #tpu.memory_space<vmem>>, vector<16x128xbf16>
    %1 = arith.extf %0 : vector<16x128xbf16> to vector<16x128xf32>
    %cst = arith.constant dense<0.000000e+00> : vector<16xf32>
    %2 = vector.multi_reduction <add>, %1, %cst [1] : vector<16x128xf32> to vector<16xf32>
    %3 = vector.shape_cast %2 : vector<16xf32> to vector<16x1xf32>
    %cst_1 = arith.constant 3.125000e-02 : f32
    %4 = vector.broadcast %cst_1 : f32 to vector<16x1xf32>
    %5 = arith.mulf %3, %4 : vector<16x1xf32>
    %6 = vector.broadcast %5 : vector<16x1xf32> to vector<16x128xf32>
    %7 = arith.subf %1, %6 : vector<16x128xf32>
    %8 = tpu.iota {dimensions = array<i32: 1>} : vector<16x128xi32>
    %c32_i32 = arith.constant 32 : i32
    %9 = vector.broadcast %c32_i32 : i32 to vector<16x128xi32>
    %10 = arith.cmpi slt, %8, %9 : vector<16x128xi32>
    %cst_2 = arith.constant 0.000000e+00 : f32
    %11 = vector.broadcast %cst_2 : f32 to vector<16x128xf32>
    %12 = arith.select %10, %7, %11 : vector<16x128xi1>, vector<16x128xf32>
    %13 = arith.mulf %12, %12 : vector<16x128xf32>
    %cst_3 = arith.constant dense<0.000000e+00> : vector<16xf32>
    %14 = vector.multi_reduction <add>, %13, %cst_3 [1] : vector<16x128xf32> to vector<16xf32>
    %15 = vector.shape_cast %14 : vector<16xf32> to vector<16x1xf32>
    %cst_4 = arith.constant 3.125000e-02 : f32
    %16 = vector.broadcast %cst_4 : f32 to vector<16x1xf32>
    %17 = arith.mulf %15, %16 : vector<16x1xf32>
    %c0_5 = arith.constant 0 : index
    %c0_6 = arith.constant 0 : index
    %18 = vector.load %arg2[%c0_5, %c0_6] : memref<16x1xf32, #tpu.memory_space<vmem>>, vector<16x1xf32>
    tpu.vector_store %arg2[%c0_5, %c0_6], %5 {strides = array<i32>} : memref<16x1xf32, #tpu.memory_space<vmem>>, vector<16x1xf32>,
    %cst_7 = arith.constant 9.99999974E-6 : f32
    %19 = vector.broadcast %cst_7 : f32 to vector<16x1xf32>
    %20 = arith.addf %17, %19 : vector<16x1xf32>
    %21 = math.rsqrt %20 : vector<16x1xf32>
    %c0_8 = arith.constant 0 : index
    %c0_9 = arith.constant 0 : index
    %22 = vector.load %arg3[%c0_8, %c0_9] : memref<16x1xf32, #tpu.memory_space<vmem>>, vector<16x1xf32>
    tpu.vector_store %arg3[%c0_8, %c0_9], %21 {strides = array<i32>} : memref<16x1xf32, #tpu.memory_space<vmem>>, vector<16x1xf32>,
    return
  }
  func.func @transform_0(%arg0: i32) -> (i32, i32) {
    %c0_i32 = arith.constant 0 : i32
    %c0_i32_0 = arith.constant 0 : i32
    return %arg0, %c0_i32 : i32, i32
  }
  func.func @transform_1(%arg0: i32) -> (i32, i32) {
    %c0_i32 = arith.constant 0 : i32
    %c0_i32_0 = arith.constant 0 : i32
    return %arg0, %c0_i32 : i32, i32
  }
  func.func @transform_2(%arg0: i32) -> (i32, i32) {
    %c0_i32 = arith.constant 0 : i32
    %c0_i32_0 = arith.constant 0 : i32
    return %arg0, %c0_i32 : i32, i32
  }
}

module attributes {stable_mosaic.version = 11 : i64} {
  func.func @_matmul_kernel(%arg0: i32, %arg1: i32, %arg2: i32, %arg3: memref<16x128xbf16, #tpu.memory_space<vmem>>, %arg4: memref<128x128xbf16, #tpu.memory_space<vmem>>, %arg5: memref<16x1xf32, #tpu.memory_space<vmem>>, %arg6: memref<16x1xf32, #tpu.memory_space<vmem>>, %arg7: memref<1x128xbf16, #tpu.memory_space<vmem>>, %arg8: memref<1x128xbf16, #tpu.memory_space<vmem>>, %arg9: memref<1x128xbf16, #tpu.memory_space<vmem>>, %arg10: memref<16x128xbf16, #tpu.memory_space<vmem>>, %arg11: memref<16x128xf32, #tpu.memory_space<vmem>>) attributes {dimension_semantics = [#tpu.dimension_semantics<parallel>, #tpu.dimension_semantics<parallel>, #tpu.dimension_semantics<arbitrary>], iteration_bounds = array<i64: 1, 1, 1>, scalar_prefetch = 0 : i64, scratch_operands = 1 : i64, tpu.core_type = #tpu.core_type<tc>, window_params = [{transform_indices = @transform_0, window_bounds = array<i64: 16, 128>}, {transform_indices = @transform_1, window_bounds = array<i64: 128, 128>}, {transform_indices = @transform_2, window_bounds = array<i64: 16, 1>}, {transform_indices = @transform_3, window_bounds = array<i64: 16, 1>}, {transform_indices = @transform_4, window_bounds = array<i64: 1, 128>}, {transform_indices = @transform_5, window_bounds = array<i64: 1, 128>}, {transform_indices = @transform_6, window_bounds = array<i64: 1, 128>}, {transform_indices = @transform_7, window_bounds = array<i64: 16, 128>}]} {
    %c0_i32 = arith.constant 0 : i32
    %0 = arith.cmpi eq, %arg2, %c0_i32 : i32
    %1 = arith.extui %0 : i1 to i32
    %c0_i32_0 = arith.constant 0 : i32
    %2 = arith.cmpi ne, %1, %c0_i32_0 : i32
    scf.if %2 {
      %cst_18 = arith.constant 0.000000e+00 : f32
      %28 = vector.broadcast %cst_18 : f32 to vector<16x128xf32>
      %c0_19 = arith.constant 0 : index
      %c0_20 = arith.constant 0 : index
      %29 = vector.load %arg11[%c0_19, %c0_20] : memref<16x128xf32, #tpu.memory_space<vmem>>, vector<16x128xf32>
      tpu.vector_store %arg11[%c0_19, %c0_20], %28 {strides = array<i32>} : memref<16x128xf32, #tpu.memory_space<vmem>>, vector<16x128xf32>,
    } else {
    }
    %c0 = arith.constant 0 : index
    %c0_1 = arith.constant 0 : index
    %3 = vector.load %arg3[%c0, %c0_1] : memref<16x128xbf16, #tpu.memory_space<vmem>>, vector<16x128xbf16>
    %4 = arith.extf %3 : vector<16x128xbf16> to vector<16x128xf32>
    %c0_2 = arith.constant 0 : index
    %c0_3 = arith.constant 0 : index
    %5 = vector.load %arg5[%c0_2, %c0_3] : memref<16x1xf32, #tpu.memory_space<vmem>>, vector<16x1xf32>
    %6 = vector.broadcast %5 : vector<16x1xf32> to vector<16x128xf32>
    %7 = arith.subf %4, %6 : vector<16x128xf32>
    %c0_4 = arith.constant 0 : index
    %c0_5 = arith.constant 0 : index
    %8 = vector.load %arg6[%c0_4, %c0_5] : memref<16x1xf32, #tpu.memory_space<vmem>>, vector<16x1xf32>
    %9 = vector.broadcast %8 : vector<16x1xf32> to vector<16x128xf32>
    %10 = arith.mulf %7, %9 : vector<16x128xf32>
    %c0_6 = arith.constant 0 : index
    %c0_7 = arith.constant 0 : index
    %11 = vector.load %arg7[%c0_6, %c0_7] : memref<1x128xbf16, #tpu.memory_space<vmem>>, vector<1x128xbf16>
    %12 = arith.extf %11 : vector<1x128xbf16> to vector<1x128xf32>
    %13 = vector.broadcast %12 : vector<1x128xf32> to vector<16x128xf32>
    %14 = arith.mulf %10, %13 : vector<16x128xf32>
    %c0_8 = arith.constant 0 : index
    %c0_9 = arith.constant 0 : index
    %15 = vector.load %arg8[%c0_8, %c0_9] : memref<1x128xbf16, #tpu.memory_space<vmem>>, vector<1x128xbf16>
    %16 = arith.extf %15 : vector<1x128xbf16> to vector<1x128xf32>
    %17 = vector.broadcast %16 : vector<1x128xf32> to vector<16x128xf32>
    %18 = arith.addf %14, %17 : vector<16x128xf32>
    %19 = arith.truncf %18 : vector<16x128xf32> to vector<16x128xbf16>
    %c0_10 = arith.constant 0 : index
    %c0_11 = arith.constant 0 : index
    %20 = vector.load %arg11[%c0_10, %c0_11] : memref<16x128xf32, #tpu.memory_space<vmem>>, vector<16x128xf32>
    %c0_12 = arith.constant 0 : index
    %c0_13 = arith.constant 0 : index
    %21 = vector.load %arg4[%c0_12, %c0_13] : memref<128x128xbf16, #tpu.memory_space<vmem>>, vector<128x128xbf16>
    %cst = arith.constant dense<0.000000e+00> : vector<16x128xf32>
    %22 = tpu.matmul %19, %21, %cst {dimension_numbers = #tpu.dot_dimension_numbers<[1], [0], [0], [1], [0, 0, 1, 1], [], []>} : vector<16x128xbf16>, vector<128x128xbf16>, vector<16x128xf32> -> vector<16x128xf32>
    %23 = arith.addf %20, %22 : vector<16x128xf32>
    %c0_14 = arith.constant 0 : index
    %c0_15 = arith.constant 0 : index
    %24 = vector.load %arg11[%c0_14, %c0_15] : memref<16x128xf32, #tpu.memory_space<vmem>>, vector<16x128xf32>
    tpu.vector_store %arg11[%c0_14, %c0_15], %23 {strides = array<i32>} : memref<16x128xf32, #tpu.memory_space<vmem>>, vector<16x128xf32>,
    %c0_i32_16 = arith.constant 0 : i32
    %25 = arith.cmpi eq, %arg2, %c0_i32_16 : i32
    %26 = arith.extui %25 : i1 to i32
    %c0_i32_17 = arith.constant 0 : i32
    %27 = arith.cmpi ne, %26, %c0_i32_17 : i32
    scf.if %27 {
      %c0_18 = arith.constant 0 : index
      %c0_19 = arith.constant 0 : index
      %28 = vector.load %arg11[%c0_18, %c0_19] : memref<16x128xf32, #tpu.memory_space<vmem>>, vector<16x128xf32>
      %c0_20 = arith.constant 0 : index
      %c0_21 = arith.constant 0 : index
      %29 = vector.load %arg9[%c0_20, %c0_21] : memref<1x128xbf16, #tpu.memory_space<vmem>>, vector<1x128xbf16>
      %30 = arith.extf %29 : vector<1x128xbf16> to vector<1x128xf32>
      %31 = vector.broadcast %30 : vector<1x128xf32> to vector<16x128xf32>
      %32 = arith.addf %28, %31 : vector<16x128xf32>
      %33 = arith.truncf %32 : vector<16x128xf32> to vector<16x128xbf16>
      %c0_22 = arith.constant 0 : index
      %c0_23 = arith.constant 0 : index
      %34 = vector.load %arg10[%c0_22, %c0_23] : memref<16x128xbf16, #tpu.memory_space<vmem>>, vector<16x128xbf16>
      tpu.vector_store %arg10[%c0_22, %c0_23], %33 {strides = array<i32>} : memref<16x128xbf16, #tpu.memory_space<vmem>>, vector<16x128xbf16>,
    } else {
    }
    return
  }
  func.func @transform_0(%arg0: i32, %arg1: i32, %arg2: i32) -> (i32, i32) {
    %c0_i32 = arith.constant 0 : i32
    return %arg0, %arg2 : i32, i32
  }
  func.func @transform_1(%arg0: i32, %arg1: i32, %arg2: i32) -> (i32, i32) {
    %c0_i32 = arith.constant 0 : i32
    return %arg2, %arg1 : i32, i32
  }
  func.func @transform_2(%arg0: i32, %arg1: i32, %arg2: i32) -> (i32, i32) {
    %c0_i32 = arith.constant 0 : i32
    %c0_i32_0 = arith.constant 0 : i32
    return %arg0, %c0_i32 : i32, i32
  }
  func.func @transform_3(%arg0: i32, %arg1: i32, %arg2: i32) -> (i32, i32) {
    %c0_i32 = arith.constant 0 : i32
    %c0_i32_0 = arith.constant 0 : i32
    return %arg0, %c0_i32 : i32, i32
  }
  func.func @transform_4(%arg0: i32, %arg1: i32, %arg2: i32) -> (i32, i32) {
    %c0_i32 = arith.constant 0 : i32
    %c0_i32_0 = arith.constant 0 : i32
    return %c0_i32, %arg2 : i32, i32
  }
  func.func @transform_5(%arg0: i32, %arg1: i32, %arg2: i32) -> (i32, i32) {
    %c0_i32 = arith.constant 0 : i32
    %c0_i32_0 = arith.constant 0 : i32
    return %c0_i32, %arg2 : i32, i32
  }
  func.func @transform_6(%arg0: i32, %arg1: i32, %arg2: i32) -> (i32, i32) {
    %c0_i32 = arith.constant 0 : i32
    %c0_i32_0 = arith.constant 0 : i32
    return %c0_i32, %arg1 : i32, i32
  }
  func.func @transform_7(%arg0: i32, %arg1: i32, %arg2: i32) -> (i32, i32) {
    %c0_i32 = arith.constant 0 : i32
    return %arg0, %arg1 : i32, i32
  }
}

module attributes {stable_mosaic.version = 11 : i64} {
  func.func @_matmul_kernel(%arg0: i32, %arg1: i32, %arg2: i32, %arg3: memref<8x128xbf16, #tpu.memory_space<vmem>>, %arg4: memref<128x128xbf16, #tpu.memory_space<vmem>>, %arg5: memref<8x128xbf16, #tpu.memory_space<vmem>>, %arg6: memref<8x128xf32, #tpu.memory_space<vmem>>) attributes {dimension_semantics = [#tpu.dimension_semantics<parallel>, #tpu.dimension_semantics<parallel>, #tpu.dimension_semantics<arbitrary>], iteration_bounds = array<i64: 1, 1, 1>, scalar_prefetch = 0 : i64, scratch_operands = 1 : i64, tpu.core_type = #tpu.core_type<tc>, window_params = [{transform_indices = @transform_0, window_bounds = array<i64: 8, 128>}, {transform_indices = @transform_1, window_bounds = array<i64: 128, 128>}, {transform_indices = @transform_2, window_bounds = array<i64: 8, 128>}]} {
    %c0_i32 = arith.constant 0 : i32
    %0 = arith.cmpi eq, %arg2, %c0_i32 : i32
    %1 = arith.extui %0 : i1 to i32
    %c0_i32_0 = arith.constant 0 : i32
    %2 = arith.cmpi ne, %1, %c0_i32_0 : i32
    scf.if %2 {
      %cst_10 = arith.constant 0.000000e+00 : f32
      %12 = vector.broadcast %cst_10 : f32 to vector<8x128xf32>
      %c0_11 = arith.constant 0 : index
      %c0_12 = arith.constant 0 : index
      %13 = vector.load %arg6[%c0_11, %c0_12] : memref<8x128xf32, #tpu.memory_space<vmem>>, vector<8x128xf32>
      tpu.vector_store %arg6[%c0_11, %c0_12], %12 {strides = array<i32>} : memref<8x128xf32, #tpu.memory_space<vmem>>, vector<8x128xf32>,
    } else {
    }
    %c0 = arith.constant 0 : index
    %c0_1 = arith.constant 0 : index
    %3 = vector.load %arg3[%c0, %c0_1] : memref<8x128xbf16, #tpu.memory_space<vmem>>, vector<8x128xbf16>
    %c0_2 = arith.constant 0 : index
    %c0_3 = arith.constant 0 : index
    %4 = vector.load %arg6[%c0_2, %c0_3] : memref<8x128xf32, #tpu.memory_space<vmem>>, vector<8x128xf32>
    %c0_4 = arith.constant 0 : index
    %c0_5 = arith.constant 0 : index
    %5 = vector.load %arg4[%c0_4, %c0_5] : memref<128x128xbf16, #tpu.memory_space<vmem>>, vector<128x128xbf16>
    %cst = arith.constant dense<0.000000e+00> : vector<8x128xf32>
    %6 = tpu.matmul %3, %5, %cst {dimension_numbers = #tpu.dot_dimension_numbers<[1], [0], [0], [1], [0, 0, 1, 1], [], []>} : vector<8x128xbf16>, vector<128x128xbf16>, vector<8x128xf32> -> vector<8x128xf32>
    %7 = arith.addf %4, %6 : vector<8x128xf32>
    %c0_6 = arith.constant 0 : index
    %c0_7 = arith.constant 0 : index
    %8 = vector.load %arg6[%c0_6, %c0_7] : memref<8x128xf32, #tpu.memory_space<vmem>>, vector<8x128xf32>
    tpu.vector_store %arg6[%c0_6, %c0_7], %7 {strides = array<i32>} : memref<8x128xf32, #tpu.memory_space<vmem>>, vector<8x128xf32>,
    %c0_i32_8 = arith.constant 0 : i32
    %9 = arith.cmpi eq, %arg2, %c0_i32_8 : i32
    %10 = arith.extui %9 : i1 to i32
    %c0_i32_9 = arith.constant 0 : i32
    %11 = arith.cmpi ne, %10, %c0_i32_9 : i32
    scf.if %11 {
      %c0_10 = arith.constant 0 : index
      %c0_11 = arith.constant 0 : index
      %12 = vector.load %arg6[%c0_10, %c0_11] : memref<8x128xf32, #tpu.memory_space<vmem>>, vector<8x128xf32>
      %13 = arith.truncf %12 : vector<8x128xf32> to vector<8x128xbf16>
      %c0_12 = arith.constant 0 : index
      %c0_13 = arith.constant 0 : index
      %14 = vector.load %arg5[%c0_12, %c0_13] : memref<8x128xbf16, #tpu.memory_space<vmem>>, vector<8x128xbf16>
      tpu.vector_store %arg5[%c0_12, %c0_13], %13 {strides = array<i32>} : memref<8x128xbf16, #tpu.memory_space<vmem>>, vector<8x128xbf16>,
    } else {
    }
    return
  }
  func.func @transform_0(%arg0: i32, %arg1: i32, %arg2: i32) -> (i32, i32) {
    %c0_i32 = arith.constant 0 : i32
    return %arg0, %arg2 : i32, i32
  }
  func.func @transform_1(%arg0: i32, %arg1: i32, %arg2: i32) -> (i32, i32) {
    %c0_i32 = arith.constant 0 : i32
    return %arg2, %arg1 : i32, i32
  }
  func.func @transform_2(%arg0: i32, %arg1: i32, %arg2: i32) -> (i32, i32) {
    %c0_i32 = arith.constant 0 : i32
    return %arg0, %arg1 : i32, i32
  }
}

module attributes {stable_mosaic.version = 11 : i64} {
  func.func @_dilated_attn_kernel(%arg0: i32, %arg1: memref<4x2x128xbf16, #tpu.memory_space<vmem>>, %arg2: memref<4x2x128xbf16, #tpu.memory_space<vmem>>) attributes {dimension_semantics = [#tpu.dimension_semantics<parallel>], iteration_bounds = array<i64: 1>, scalar_prefetch = 0 : i64, scratch_operands = 0 : i64, tpu.core_type = #tpu.core_type<tc>, window_params = [{transform_indices = @transform_0, window_bounds = array<i64: 4, 2, 128>}, {transform_indices = @transform_1, window_bounds = array<i64: 4, 2, 128>}]} {
    %c0 = arith.constant 0 : index
    %c0_0 = arith.constant 0 : index
    %c0_1 = arith.constant 0 : index
    %0 = vector.load %arg1[%c0, %c0_0, %c0_1] : memref<4x2x128xbf16, #tpu.memory_space<vmem>>, vector<4x2x128xbf16>
    %1 = vector.extract_strided_slice %0 {offsets = [0, 0, 0], sizes = [4, 2, 32], strides = [1, 1, 1]} : vector<4x2x128xbf16> to vector<4x2x32xbf16>
    %2 = vector.extract_strided_slice %0 {offsets = [0, 0, 32], sizes = [4, 2, 32], strides = [1, 1, 1]} : vector<4x2x128xbf16> to vector<4x2x32xbf16>
    %3 = vector.extract_strided_slice %0 {offsets = [0, 0, 64], sizes = [4, 2, 32], strides = [1, 1, 1]} : vector<4x2x128xbf16> to vector<4x2x32xbf16>
    %4 = tpu.iota {dimensions = array<i32: 0>} : vector<2x2xi32>
    %5 = tpu.iota {dimensions = array<i32: 1>} : vector<2x2xi32>
    %6 = arith.cmpi sle, %5, %4 : vector<2x2xi32>
    %7 = vector.shape_cast %6 : vector<2x2xi1> to vector<1x2x2xi1>
    %8 = vector.extract_strided_slice %1 {offsets = [0, 0, 0], sizes = [4, 2, 8], strides = [1, 1, 1]} : vector<4x2x32xbf16> to vector<4x2x8xbf16>
    %9 = vector.extract_strided_slice %2 {offsets = [0, 0, 0], sizes = [4, 2, 8], strides = [1, 1, 1]} : vector<4x2x32xbf16> to vector<4x2x8xbf16>
    %10 = vector.extract_strided_slice %3 {offsets = [0, 0, 0], sizes = [4, 2, 8], strides = [1, 1, 1]} : vector<4x2x32xbf16> to vector<4x2x8xbf16>
    "tpu.trace_start"() <{level = 10 : i32, message = "gtd,gsd->gts"}> : () -> ()
    %cst = arith.constant dense<0.000000e+00> : vector<4x2x2xf32>
    %11 = tpu.matmul %8, %9, %cst {dimension_numbers = #tpu.dot_dimension_numbers<[2], [2], [1], [1], [0, 0, 0, 1, 1, 1], [0], [0]>} : vector<4x2x8xbf16>, vector<4x2x8xbf16>, vector<4x2x2xf32> -> vector<4x2x2xf32>
    "tpu.trace_stop"() : () -> ()
    %cst_2 = arith.constant 0.353553385 : f32
    %12 = vector.broadcast %cst_2 : f32 to vector<4x2x2xf32>
    %13 = arith.mulf %11, %12 : vector<4x2x2xf32>
    %cst_3 = arith.constant -1.000000e+30 : f32
    %14 = vector.shape_cast %7 : vector<1x2x2xi1> to vector<1x2x2xi1>
    %15 = vector.broadcast %14 : vector<1x2x2xi1> to vector<4x2x2xi1>
    %16 = vector.broadcast %cst_3 : f32 to vector<4x2x2xf32>
    %17 = arith.select %15, %13, %16 : vector<4x2x2xi1>, vector<4x2x2xf32>
    %cst_4 = arith.constant dense<0xFF800000> : vector<4x2xf32>
    %18 = vector.multi_reduction <maximumf>, %17, %cst_4 [2] : vector<4x2x2xf32> to vector<4x2xf32>
    %19 = vector.shape_cast %18 : vector<4x2xf32> to vector<4x2x1xf32>
    %20 = vector.broadcast %19 : vector<4x2x1xf32> to vector<4x2x2xf32>
    %21 = arith.subf %17, %20 : vector<4x2x2xf32>
    %22 = math.exp %21 : vector<4x2x2xf32>
    %cst_5 = arith.constant dense<0.000000e+00> : vector<4x2xf32>
    %23 = vector.multi_reduction <add>, %22, %cst_5 [2] : vector<4x2x2xf32> to vector<4x2xf32>
    %24 = vector.shape_cast %23 : vector<4x2xf32> to vector<4x2x1xf32>
    %25 = tpu.reciprocal %24 {approx = true} : vector<4x2x1xf32> -> vector<4x2x1xf32>
    %26 = vector.broadcast %25 : vector<4x2x1xf32> to vector<4x2x2xf32>
    %27 = arith.mulf %22, %26 : vector<4x2x2xf32>
    %28 = arith.truncf %27 : vector<4x2x2xf32> to vector<4x2x2xbf16>
    "tpu.trace_start"() <{level = 10 : i32, message = "gts,gsd->gtd"}> : () -> ()
    %cst_6 = arith.constant dense<0.000000e+00> : vector<4x2x8xf32>
    %29 = tpu.matmul %28, %10, %cst_6 {dimension_numbers = #tpu.dot_dimension_numbers<[2], [1], [1], [2], [0, 0, 0, 1, 1, 2], [0], [0]>} : vector<4x2x2xbf16>, vector<4x2x8xbf16>, vector<4x2x8xf32> -> vector<4x2x8xf32>
    "tpu.trace_stop"() : () -> ()
    %30 = vector.extract_strided_slice %1 {offsets = [0, 0, 8], sizes = [4, 2, 8], strides = [1, 1, 1]} : vector<4x2x32xbf16> to vector<4x2x8xbf16>
    %31 = vector.extract_strided_slice %2 {offsets = [0, 0, 8], sizes = [4, 2, 8], strides = [1, 1, 1]} : vector<4x2x32xbf16> to vector<4x2x8xbf16>
    %32 = vector.extract_strided_slice %3 {offsets = [0, 0, 8], sizes = [4, 2, 8], strides = [1, 1, 1]} : vector<4x2x32xbf16> to vector<4x2x8xbf16>
    "tpu.trace_start"() <{level = 10 : i32, message = "gtd,gsd->gts"}> : () -> ()
    %cst_7 = arith.constant dense<0.000000e+00> : vector<4x2x2xf32>
    %33 = tpu.matmul %30, %31, %cst_7 {dimension_numbers = #tpu.dot_dimension_numbers<[2], [2], [1], [1], [0, 0, 0, 1, 1, 1], [0], [0]>} : vector<4x2x8xbf16>, vector<4x2x8xbf16>, vector<4x2x2xf32> -> vector<4x2x2xf32>
    "tpu.trace_stop"() : () -> ()
    %cst_8 = arith.constant 0.353553385 : f32
    %34 = vector.broadcast %cst_8 : f32 to vector<4x2x2xf32>
    %35 = arith.mulf %33, %34 : vector<4x2x2xf32>
    %cst_9 = arith.constant -1.000000e+30 : f32
    %36 = vector.shape_cast %7 : vector<1x2x2xi1> to vector<1x2x2xi1>
    %37 = vector.broadcast %36 : vector<1x2x2xi1> to vector<4x2x2xi1>
    %38 = vector.broadcast %cst_9 : f32 to vector<4x2x2xf32>
    %39 = arith.select %37, %35, %38 : vector<4x2x2xi1>, vector<4x2x2xf32>
    %cst_10 = arith.constant dense<0xFF800000> : vector<4x2xf32>
    %40 = vector.multi_reduction <maximumf>, %39, %cst_10 [2] : vector<4x2x2xf32> to vector<4x2xf32>
    %41 = vector.shape_cast %40 : vector<4x2xf32> to vector<4x2x1xf32>
    %42 = vector.broadcast %41 : vector<4x2x1xf32> to vector<4x2x2xf32>
    %43 = arith.subf %39, %42 : vector<4x2x2xf32>
    %44 = math.exp %43 : vector<4x2x2xf32>
    %cst_11 = arith.constant dense<0.000000e+00> : vector<4x2xf32>
    %45 = vector.multi_reduction <add>, %44, %cst_11 [2] : vector<4x2x2xf32> to vector<4x2xf32>
    %46 = vector.shape_cast %45 : vector<4x2xf32> to vector<4x2x1xf32>
    %47 = tpu.reciprocal %46 {approx = true} : vector<4x2x1xf32> -> vector<4x2x1xf32>
    %48 = vector.broadcast %47 : vector<4x2x1xf32> to vector<4x2x2xf32>
    %49 = arith.mulf %44, %48 : vector<4x2x2xf32>
    %50 = arith.truncf %49 : vector<4x2x2xf32> to vector<4x2x2xbf16>
    "tpu.trace_start"() <{level = 10 : i32, message = "gts,gsd->gtd"}> : () -> ()
    %cst_12 = arith.constant dense<0.000000e+00> : vector<4x2x8xf32>
    %51 = tpu.matmul %50, %32, %cst_12 {dimension_numbers = #tpu.dot_dimension_numbers<[2], [1], [1], [2], [0, 0, 0, 1, 1, 2], [0], [0]>} : vector<4x2x2xbf16>, vector<4x2x8xbf16>, vector<4x2x8xf32> -> vector<4x2x8xf32>
    "tpu.trace_stop"() : () -> ()
    %52 = vector.extract_strided_slice %1 {offsets = [0, 0, 16], sizes = [4, 2, 8], strides = [1, 1, 1]} : vector<4x2x32xbf16> to vector<4x2x8xbf16>
    %53 = vector.extract_strided_slice %2 {offsets = [0, 0, 16], sizes = [4, 2, 8], strides = [1, 1, 1]} : vector<4x2x32xbf16> to vector<4x2x8xbf16>
    %54 = vector.extract_strided_slice %3 {offsets = [0, 0, 16], sizes = [4, 2, 8], strides = [1, 1, 1]} : vector<4x2x32xbf16> to vector<4x2x8xbf16>
    "tpu.trace_start"() <{level = 10 : i32, message = "gtd,gsd->gts"}> : () -> ()
    %cst_13 = arith.constant dense<0.000000e+00> : vector<4x2x2xf32>
    %55 = tpu.matmul %52, %53, %cst_13 {dimension_numbers = #tpu.dot_dimension_numbers<[2], [2], [1], [1], [0, 0, 0, 1, 1, 1], [0], [0]>} : vector<4x2x8xbf16>, vector<4x2x8xbf16>, vector<4x2x2xf32> -> vector<4x2x2xf32>
    "tpu.trace_stop"() : () -> ()
    %cst_14 = arith.constant 0.353553385 : f32
    %56 = vector.broadcast %cst_14 : f32 to vector<4x2x2xf32>
    %57 = arith.mulf %55, %56 : vector<4x2x2xf32>
    %cst_15 = arith.constant -1.000000e+30 : f32
    %58 = vector.shape_cast %7 : vector<1x2x2xi1> to vector<1x2x2xi1>
    %59 = vector.broadcast %58 : vector<1x2x2xi1> to vector<4x2x2xi1>
    %60 = vector.broadcast %cst_15 : f32 to vector<4x2x2xf32>
    %61 = arith.select %59, %57, %60 : vector<4x2x2xi1>, vector<4x2x2xf32>
    %cst_16 = arith.constant dense<0xFF800000> : vector<4x2xf32>
    %62 = vector.multi_reduction <maximumf>, %61, %cst_16 [2] : vector<4x2x2xf32> to vector<4x2xf32>
    %63 = vector.shape_cast %62 : vector<4x2xf32> to vector<4x2x1xf32>
    %64 = vector.broadcast %63 : vector<4x2x1xf32> to vector<4x2x2xf32>
    %65 = arith.subf %61, %64 : vector<4x2x2xf32>
    %66 = math.exp %65 : vector<4x2x2xf32>
    %cst_17 = arith.constant dense<0.000000e+00> : vector<4x2xf32>
    %67 = vector.multi_reduction <add>, %66, %cst_17 [2] : vector<4x2x2xf32> to vector<4x2xf32>
    %68 = vector.shape_cast %67 : vector<4x2xf32> to vector<4x2x1xf32>
    %69 = tpu.reciprocal %68 {approx = true} : vector<4x2x1xf32> -> vector<4x2x1xf32>
    %70 = vector.broadcast %69 : vector<4x2x1xf32> to vector<4x2x2xf32>
    %71 = arith.mulf %66, %70 : vector<4x2x2xf32>
    %72 = arith.truncf %71 : vector<4x2x2xf32> to vector<4x2x2xbf16>
    "tpu.trace_start"() <{level = 10 : i32, message = "gts,gsd->gtd"}> : () -> ()
    %cst_18 = arith.constant dense<0.000000e+00> : vector<4x2x8xf32>
    %73 = tpu.matmul %72, %54, %cst_18 {dimension_numbers = #tpu.dot_dimension_numbers<[2], [1], [1], [2], [0, 0, 0, 1, 1, 2], [0], [0]>} : vector<4x2x2xbf16>, vector<4x2x8xbf16>, vector<4x2x8xf32> -> vector<4x2x8xf32>
    "tpu.trace_stop"() : () -> ()
    %74 = vector.extract_strided_slice %1 {offsets = [0, 0, 24], sizes = [4, 2, 8], strides = [1, 1, 1]} : vector<4x2x32xbf16> to vector<4x2x8xbf16>
    %75 = vector.extract_strided_slice %2 {offsets = [0, 0, 24], sizes = [4, 2, 8], strides = [1, 1, 1]} : vector<4x2x32xbf16> to vector<4x2x8xbf16>
    %76 = vector.extract_strided_slice %3 {offsets = [0, 0, 24], sizes = [4, 2, 8], strides = [1, 1, 1]} : vector<4x2x32xbf16> to vector<4x2x8xbf16>
    "tpu.trace_start"() <{level = 10 : i32, message = "gtd,gsd->gts"}> : () -> ()
    %cst_19 = arith.constant dense<0.000000e+00> : vector<4x2x2xf32>
    %77 = tpu.matmul %74, %75, %cst_19 {dimension_numbers = #tpu.dot_dimension_numbers<[2], [2], [1], [1], [0, 0, 0, 1, 1, 1], [0], [0]>} : vector<4x2x8xbf16>, vector<4x2x8xbf16>, vector<4x2x2xf32> -> vector<4x2x2xf32>
    "tpu.trace_stop"() : () -> ()
    %cst_20 = arith.constant 0.353553385 : f32
    %78 = vector.broadcast %cst_20 : f32 to vector<4x2x2xf32>
    %79 = arith.mulf %77, %78 : vector<4x2x2xf32>
    %cst_21 = arith.constant -1.000000e+30 : f32
    %80 = vector.shape_cast %7 : vector<1x2x2xi1> to vector<1x2x2xi1>
    %81 = vector.broadcast %80 : vector<1x2x2xi1> to vector<4x2x2xi1>
    %82 = vector.broadcast %cst_21 : f32 to vector<4x2x2xf32>
    %83 = arith.select %81, %79, %82 : vector<4x2x2xi1>, vector<4x2x2xf32>
    %cst_22 = arith.constant dense<0xFF800000> : vector<4x2xf32>
    %84 = vector.multi_reduction <maximumf>, %83, %cst_22 [2] : vector<4x2x2xf32> to vector<4x2xf32>
    %85 = vector.shape_cast %84 : vector<4x2xf32> to vector<4x2x1xf32>
    %86 = vector.broadcast %85 : vector<4x2x1xf32> to vector<4x2x2xf32>
    %87 = arith.subf %83, %86 : vector<4x2x2xf32>
    %88 = math.exp %87 : vector<4x2x2xf32>
    %cst_23 = arith.constant dense<0.000000e+00> : vector<4x2xf32>
    %89 = vector.multi_reduction <add>, %88, %cst_23 [2] : vector<4x2x2xf32> to vector<4x2xf32>
    %90 = vector.shape_cast %89 : vector<4x2xf32> to vector<4x2x1xf32>
    %91 = tpu.reciprocal %90 {approx = true} : vector<4x2x1xf32> -> vector<4x2x1xf32>
    %92 = vector.broadcast %91 : vector<4x2x1xf32> to vector<4x2x2xf32>
    %93 = arith.mulf %88, %92 : vector<4x2x2xf32>
    %94 = arith.truncf %93 : vector<4x2x2xf32> to vector<4x2x2xbf16>
    "tpu.trace_start"() <{level = 10 : i32, message = "gts,gsd->gtd"}> : () -> ()
    %cst_24 = arith.constant dense<0.000000e+00> : vector<4x2x8xf32>
    %95 = tpu.matmul %94, %76, %cst_24 {dimension_numbers = #tpu.dot_dimension_numbers<[2], [1], [1], [2], [0, 0, 0, 1, 1, 2], [0], [0]>} : vector<4x2x2xbf16>, vector<4x2x8xbf16>, vector<4x2x8xf32> -> vector<4x2x8xf32>
    "tpu.trace_stop"() : () -> ()
    %96 = tpu.concatenate %29, %51, %73, %95 in 2 : vector<4x2x8xf32>, vector<4x2x8xf32>, vector<4x2x8xf32>, vector<4x2x8xf32> -> vector<4x2x32xf32>
    %cst_25 = arith.constant 0.000000e+00 : f32
    %97 = vector.broadcast %cst_25 : f32 to vector<4x2x96xf32>
    %98 = tpu.concatenate %96, %97 in 2 : vector<4x2x32xf32>, vector<4x2x96xf32> -> vector<4x2x128xf32>
    %99 = arith.truncf %98 : vector<4x2x128xf32> to vector<4x2x128xbf16>
    %c0_26 = arith.constant 0 : index
    %c0_27 = arith.constant 0 : index
    %c0_28 = arith.constant 0 : index
    %100 = vector.load %arg2[%c0_26, %c0_27, %c0_28] : memref<4x2x128xbf16, #tpu.memory_space<vmem>>, vector<4x2x128xbf16>
    tpu.vector_store %arg2[%c0_26, %c0_27, %c0_28], %99 {strides = array<i32>} : memref<4x2x128xbf16, #tpu.memory_space<vmem>>, vector<4x2x128xbf16>,
    return
  }
  func.func @transform_0(%arg0: i32) -> (i32, i32, i32) {
    %c0_i32 = arith.constant 0 : i32
    %c0_i32_0 = arith.constant 0 : i32
    %c0_i32_1 = arith.constant 0 : i32
    return %arg0, %c0_i32, %c0_i32_0 : i32, i32, i32
  }
  func.func @transform_1(%arg0: i32) -> (i32, i32, i32) {
    %c0_i32 = arith.constant 0 : i32
    %c0_i32_0 = arith.constant 0 : i32
    %c0_i32_1 = arith.constant 0 : i32
    return %arg0, %c0_i32, %c0_i32_0 : i32, i32, i32
  }
}

module attributes {stable_mosaic.version = 11 : i64} {
  func.func @_ln_stats_kernel(%arg0: i32, %arg1: memref<16x128xbf16, #tpu.memory_space<vmem>>, %arg2: memref<16x1xf32, #tpu.memory_space<vmem>>, %arg3: memref<16x1xf32, #tpu.memory_space<vmem>>) attributes {dimension_semantics = [#tpu.dimension_semantics<parallel>], iteration_bounds = array<i64: 1>, scalar_prefetch = 0 : i64, scratch_operands = 0 : i64, tpu.core_type = #tpu.core_type<tc>, window_params = [{transform_indices = @transform_0, window_bounds = array<i64: 16, 128>}, {transform_indices = @transform_1, window_bounds = array<i64: 16, 1>}, {transform_indices = @transform_2, window_bounds = array<i64: 16, 1>}]} {
    %c0 = arith.constant 0 : index
    %c0_0 = arith.constant 0 : index
    %0 = vector.load %arg1[%c0, %c0_0] : memref<16x128xbf16, #tpu.memory_space<vmem>>, vector<16x128xbf16>
    %1 = arith.extf %0 : vector<16x128xbf16> to vector<16x128xf32>
    %cst = arith.constant dense<0.000000e+00> : vector<16xf32>
    %2 = vector.multi_reduction <add>, %1, %cst [1] : vector<16x128xf32> to vector<16xf32>
    %3 = vector.shape_cast %2 : vector<16xf32> to vector<16x1xf32>
    %cst_1 = arith.constant 1.562500e-02 : f32
    %4 = vector.broadcast %cst_1 : f32 to vector<16x1xf32>
    %5 = arith.mulf %3, %4 : vector<16x1xf32>
    %6 = vector.broadcast %5 : vector<16x1xf32> to vector<16x128xf32>
    %7 = arith.subf %1, %6 : vector<16x128xf32>
    %8 = tpu.iota {dimensions = array<i32: 1>} : vector<16x128xi32>
    %c64_i32 = arith.constant 64 : i32
    %9 = vector.broadcast %c64_i32 : i32 to vector<16x128xi32>
    %10 = arith.cmpi slt, %8, %9 : vector<16x128xi32>
    %cst_2 = arith.constant 0.000000e+00 : f32
    %11 = vector.broadcast %cst_2 : f32 to vector<16x128xf32>
    %12 = arith.select %10, %7, %11 : vector<16x128xi1>, vector<16x128xf32>
    %13 = arith.mulf %12, %12 : vector<16x128xf32>
    %cst_3 = arith.constant dense<0.000000e+00> : vector<16xf32>
    %14 = vector.multi_reduction <add>, %13, %cst_3 [1] : vector<16x128xf32> to vector<16xf32>
    %15 = vector.shape_cast %14 : vector<16xf32> to vector<16x1xf32>
    %cst_4 = arith.constant 1.562500e-02 : f32
    %16 = vector.broadcast %cst_4 : f32 to vector<16x1xf32>
    %17 = arith.mulf %15, %16 : vector<16x1xf32>
    %c0_5 = arith.constant 0 : index
    %c0_6 = arith.constant 0 : index
    %18 = vector.load %arg2[%c0_5, %c0_6] : memref<16x1xf32, #tpu.memory_space<vmem>>, vector<16x1xf32>
    tpu.vector_store %arg2[%c0_5, %c0_6], %5 {strides = array<i32>} : memref<16x1xf32, #tpu.memory_space<vmem>>, vector<16x1xf32>,
    %cst_7 = arith.constant 9.99999974E-6 : f32
    %19 = vector.broadcast %cst_7 : f32 to vector<16x1xf32>
    %20 = arith.addf %17, %19 : vector<16x1xf32>
    %21 = math.rsqrt %20 : vector<16x1xf32>
    %c0_8 = arith.constant 0 : index
    %c0_9 = arith.constant 0 : index
    %22 = vector.load %arg3[%c0_8, %c0_9] : memref<16x1xf32, #tpu.memory_space<vmem>>, vector<16x1xf32>
    tpu.vector_store %arg3[%c0_8, %c0_9], %21 {strides = array<i32>} : memref<16x1xf32, #tpu.memory_space<vmem>>, vector<16x1xf32>,
    return
  }
  func.func @transform_0(%arg0: i32) -> (i32, i32) {
    %c0_i32 = arith.constant 0 : i32
    %c0_i32_0 = arith.constant 0 : i32
    return %arg0, %c0_i32 : i32, i32
  }
  func.func @transform_1(%arg0: i32) -> (i32, i32) {
    %c0_i32 = arith.constant 0 : i32
    %c0_i32_0 = arith.constant 0 : i32
    return %arg0, %c0_i32 : i32, i32
  }
  func.func @transform_2(%arg0: i32) -> (i32, i32) {
    %c0_i32 = arith.constant 0 : i32
    %c0_i32_0 = arith.constant 0 : i32
    return %arg0, %c0_i32 : i32, i32
  }
}

module attributes {stable_mosaic.version = 11 : i64} {
  func.func @_matmul_kernel(%arg0: i32, %arg1: i32, %arg2: i32, %arg3: memref<16x128xbf16, #tpu.memory_space<vmem>>, %arg4: memref<128x128xbf16, #tpu.memory_space<vmem>>, %arg5: memref<16x1xf32, #tpu.memory_space<vmem>>, %arg6: memref<16x1xf32, #tpu.memory_space<vmem>>, %arg7: memref<1x128xbf16, #tpu.memory_space<vmem>>, %arg8: memref<1x128xbf16, #tpu.memory_space<vmem>>, %arg9: memref<1x128xbf16, #tpu.memory_space<vmem>>, %arg10: memref<16x128xbf16, #tpu.memory_space<vmem>>, %arg11: memref<16x128xbf16, #tpu.memory_space<vmem>>, %arg12: memref<16x128xf32, #tpu.memory_space<vmem>>) attributes {dimension_semantics = [#tpu.dimension_semantics<parallel>, #tpu.dimension_semantics<parallel>, #tpu.dimension_semantics<arbitrary>], iteration_bounds = array<i64: 1, 1, 1>, scalar_prefetch = 0 : i64, scratch_operands = 1 : i64, tpu.core_type = #tpu.core_type<tc>, window_params = [{transform_indices = @transform_0, window_bounds = array<i64: 16, 128>}, {transform_indices = @transform_1, window_bounds = array<i64: 128, 128>}, {transform_indices = @transform_2, window_bounds = array<i64: 16, 1>}, {transform_indices = @transform_3, window_bounds = array<i64: 16, 1>}, {transform_indices = @transform_4, window_bounds = array<i64: 1, 128>}, {transform_indices = @transform_5, window_bounds = array<i64: 1, 128>}, {transform_indices = @transform_6, window_bounds = array<i64: 1, 128>}, {transform_indices = @transform_7, window_bounds = array<i64: 16, 128>}, {transform_indices = @transform_8, window_bounds = array<i64: 16, 128>}]} {
    %c0_i32 = arith.constant 0 : i32
    %0 = arith.cmpi eq, %arg2, %c0_i32 : i32
    %1 = arith.extui %0 : i1 to i32
    %c0_i32_0 = arith.constant 0 : i32
    %2 = arith.cmpi ne, %1, %c0_i32_0 : i32
    scf.if %2 {
      %cst_18 = arith.constant 0.000000e+00 : f32
      %28 = vector.broadcast %cst_18 : f32 to vector<16x128xf32>
      %c0_19 = arith.constant 0 : index
      %c0_20 = arith.constant 0 : index
      %29 = vector.load %arg12[%c0_19, %c0_20] : memref<16x128xf32, #tpu.memory_space<vmem>>, vector<16x128xf32>
      tpu.vector_store %arg12[%c0_19, %c0_20], %28 {strides = array<i32>} : memref<16x128xf32, #tpu.memory_space<vmem>>, vector<16x128xf32>,
    } else {
    }
    %c0 = arith.constant 0 : index
    %c0_1 = arith.constant 0 : index
    %3 = vector.load %arg3[%c0, %c0_1] : memref<16x128xbf16, #tpu.memory_space<vmem>>, vector<16x128xbf16>
    %4 = arith.extf %3 : vector<16x128xbf16> to vector<16x128xf32>
    %c0_2 = arith.constant 0 : index
    %c0_3 = arith.constant 0 : index
    %5 = vector.load %arg5[%c0_2, %c0_3] : memref<16x1xf32, #tpu.memory_space<vmem>>, vector<16x1xf32>
    %6 = vector.broadcast %5 : vector<16x1xf32> to vector<16x128xf32>
    %7 = arith.subf %4, %6 : vector<16x128xf32>
    %c0_4 = arith.constant 0 : index
    %c0_5 = arith.constant 0 : index
    %8 = vector.load %arg6[%c0_4, %c0_5] : memref<16x1xf32, #tpu.memory_space<vmem>>, vector<16x1xf32>
    %9 = vector.broadcast %8 : vector<16x1xf32> to vector<16x128xf32>
    %10 = arith.mulf %7, %9 : vector<16x128xf32>
    %c0_6 = arith.constant 0 : index
    %c0_7 = arith.constant 0 : index
    %11 = vector.load %arg7[%c0_6, %c0_7] : memref<1x128xbf16, #tpu.memory_space<vmem>>, vector<1x128xbf16>
    %12 = arith.extf %11 : vector<1x128xbf16> to vector<1x128xf32>
    %13 = vector.broadcast %12 : vector<1x128xf32> to vector<16x128xf32>
    %14 = arith.mulf %10, %13 : vector<16x128xf32>
    %c0_8 = arith.constant 0 : index
    %c0_9 = arith.constant 0 : index
    %15 = vector.load %arg8[%c0_8, %c0_9] : memref<1x128xbf16, #tpu.memory_space<vmem>>, vector<1x128xbf16>
    %16 = arith.extf %15 : vector<1x128xbf16> to vector<1x128xf32>
    %17 = vector.broadcast %16 : vector<1x128xf32> to vector<16x128xf32>
    %18 = arith.addf %14, %17 : vector<16x128xf32>
    %19 = arith.truncf %18 : vector<16x128xf32> to vector<16x128xbf16>
    %c0_10 = arith.constant 0 : index
    %c0_11 = arith.constant 0 : index
    %20 = vector.load %arg12[%c0_10, %c0_11] : memref<16x128xf32, #tpu.memory_space<vmem>>, vector<16x128xf32>
    %c0_12 = arith.constant 0 : index
    %c0_13 = arith.constant 0 : index
    %21 = vector.load %arg4[%c0_12, %c0_13] : memref<128x128xbf16, #tpu.memory_space<vmem>>, vector<128x128xbf16>
    %cst = arith.constant dense<0.000000e+00> : vector<16x128xf32>
    %22 = tpu.matmul %19, %21, %cst {dimension_numbers = #tpu.dot_dimension_numbers<[1], [0], [0], [1], [0, 0, 1, 1], [], []>} : vector<16x128xbf16>, vector<128x128xbf16>, vector<16x128xf32> -> vector<16x128xf32>
    %23 = arith.addf %20, %22 : vector<16x128xf32>
    %c0_14 = arith.constant 0 : index
    %c0_15 = arith.constant 0 : index
    %24 = vector.load %arg12[%c0_14, %c0_15] : memref<16x128xf32, #tpu.memory_space<vmem>>, vector<16x128xf32>
    tpu.vector_store %arg12[%c0_14, %c0_15], %23 {strides = array<i32>} : memref<16x128xf32, #tpu.memory_space<vmem>>, vector<16x128xf32>,
    %c0_i32_16 = arith.constant 0 : i32
    %25 = arith.cmpi eq, %arg2, %c0_i32_16 : i32
    %26 = arith.extui %25 : i1 to i32
    %c0_i32_17 = arith.constant 0 : i32
    %27 = arith.cmpi ne, %26, %c0_i32_17 : i32
    scf.if %27 {
      %c0_18 = arith.constant 0 : index
      %c0_19 = arith.constant 0 : index
      %28 = vector.load %arg12[%c0_18, %c0_19] : memref<16x128xf32, #tpu.memory_space<vmem>>, vector<16x128xf32>
      %c0_20 = arith.constant 0 : index
      %c0_21 = arith.constant 0 : index
      %29 = vector.load %arg9[%c0_20, %c0_21] : memref<1x128xbf16, #tpu.memory_space<vmem>>, vector<1x128xbf16>
      %30 = arith.extf %29 : vector<1x128xbf16> to vector<1x128xf32>
      %31 = vector.broadcast %30 : vector<1x128xf32> to vector<16x128xf32>
      %32 = arith.addf %28, %31 : vector<16x128xf32>
      %c0_22 = arith.constant 0 : index
      %c0_23 = arith.constant 0 : index
      %33 = vector.load %arg10[%c0_22, %c0_23] : memref<16x128xbf16, #tpu.memory_space<vmem>>, vector<16x128xbf16>
      %34 = arith.extf %33 : vector<16x128xbf16> to vector<16x128xf32>
      %35 = arith.addf %32, %34 : vector<16x128xf32>
      %36 = arith.truncf %35 : vector<16x128xf32> to vector<16x128xbf16>
      %c0_24 = arith.constant 0 : index
      %c0_25 = arith.constant 0 : index
      %37 = vector.load %arg11[%c0_24, %c0_25] : memref<16x128xbf16, #tpu.memory_space<vmem>>, vector<16x128xbf16>
      tpu.vector_store %arg11[%c0_24, %c0_25], %36 {strides = array<i32>} : memref<16x128xbf16, #tpu.memory_space<vmem>>, vector<16x128xbf16>,
    } else {
    }
    return
  }
  func.func @transform_0(%arg0: i32, %arg1: i32, %arg2: i32) -> (i32, i32) {
    %c0_i32 = arith.constant 0 : i32
    return %arg0, %arg2 : i32, i32
  }
  func.func @transform_1(%arg0: i32, %arg1: i32, %arg2: i32) -> (i32, i32) {
    %c0_i32 = arith.constant 0 : i32
    return %arg2, %arg1 : i32, i32
  }
  func.func @transform_2(%arg0: i32, %arg1: i32, %arg2: i32) -> (i32, i32) {
    %c0_i32 = arith.constant 0 : i32
    %c0_i32_0 = arith.constant 0 : i32
    return %arg0, %c0_i32 : i32, i32
  }
  func.func @transform_3(%arg0: i32, %arg1: i32, %arg2: i32) -> (i32, i32) {
    %c0_i32 = arith.constant 0 : i32
    %c0_i32_0 = arith.constant 0 : i32
    return %arg0, %c0_i32 : i32, i32
  }
  func.func @transform_4(%arg0: i32, %arg1: i32, %arg2: i32) -> (i32, i32) {
    %c0_i32 = arith.constant 0 : i32
    %c0_i32_0 = arith.constant 0 : i32
    return %c0_i32, %arg2 : i32, i32
  }
  func.func @transform_5(%arg0: i32, %arg1: i32, %arg2: i32) -> (i32, i32) {
    %c0_i32 = arith.constant 0 : i32
    %c0_i32_0 = arith.constant 0 : i32
    return %c0_i32, %arg2 : i32, i32
  }
  func.func @transform_6(%arg0: i32, %arg1: i32, %arg2: i32) -> (i32, i32) {
    %c0_i32 = arith.constant 0 : i32
    %c0_i32_0 = arith.constant 0 : i32
    return %c0_i32, %arg1 : i32, i32
  }
  func.func @transform_7(%arg0: i32, %arg1: i32, %arg2: i32) -> (i32, i32) {
    %c0_i32 = arith.constant 0 : i32
    return %arg0, %arg1 : i32, i32
  }
  func.func @transform_8(%arg0: i32, %arg1: i32, %arg2: i32) -> (i32, i32) {
    %c0_i32 = arith.constant 0 : i32
    return %arg0, %arg1 : i32, i32
  }
}

module attributes {stable_mosaic.version = 11 : i64} {
  func.func @_matmul_kernel(%arg0: i32, %arg1: i32, %arg2: i32, %arg3: memref<16x128xbf16, #tpu.memory_space<vmem>>, %arg4: memref<128x128xbf16, #tpu.memory_space<vmem>>, %arg5: memref<16x1xf32, #tpu.memory_space<vmem>>, %arg6: memref<16x1xf32, #tpu.memory_space<vmem>>, %arg7: memref<1x128xbf16, #tpu.memory_space<vmem>>, %arg8: memref<1x128xbf16, #tpu.memory_space<vmem>>, %arg9: memref<1x128xbf16, #tpu.memory_space<vmem>>, %arg10: memref<16x128xbf16, #tpu.memory_space<vmem>>, %arg11: memref<16x128xf32, #tpu.memory_space<vmem>>) attributes {dimension_semantics = [#tpu.dimension_semantics<parallel>, #tpu.dimension_semantics<parallel>, #tpu.dimension_semantics<arbitrary>], iteration_bounds = array<i64: 1, 1, 1>, scalar_prefetch = 0 : i64, scratch_operands = 1 : i64, tpu.core_type = #tpu.core_type<tc>, window_params = [{transform_indices = @transform_0, window_bounds = array<i64: 16, 128>}, {transform_indices = @transform_1, window_bounds = array<i64: 128, 128>}, {transform_indices = @transform_2, window_bounds = array<i64: 16, 1>}, {transform_indices = @transform_3, window_bounds = array<i64: 16, 1>}, {transform_indices = @transform_4, window_bounds = array<i64: 1, 128>}, {transform_indices = @transform_5, window_bounds = array<i64: 1, 128>}, {transform_indices = @transform_6, window_bounds = array<i64: 1, 128>}, {transform_indices = @transform_7, window_bounds = array<i64: 16, 128>}]} {
    %c0_i32 = arith.constant 0 : i32
    %0 = arith.cmpi eq, %arg2, %c0_i32 : i32
    %1 = arith.extui %0 : i1 to i32
    %c0_i32_0 = arith.constant 0 : i32
    %2 = arith.cmpi ne, %1, %c0_i32_0 : i32
    scf.if %2 {
      %cst_18 = arith.constant 0.000000e+00 : f32
      %28 = vector.broadcast %cst_18 : f32 to vector<16x128xf32>
      %c0_19 = arith.constant 0 : index
      %c0_20 = arith.constant 0 : index
      %29 = vector.load %arg11[%c0_19, %c0_20] : memref<16x128xf32, #tpu.memory_space<vmem>>, vector<16x128xf32>
      tpu.vector_store %arg11[%c0_19, %c0_20], %28 {strides = array<i32>} : memref<16x128xf32, #tpu.memory_space<vmem>>, vector<16x128xf32>,
    } else {
    }
    %c0 = arith.constant 0 : index
    %c0_1 = arith.constant 0 : index
    %3 = vector.load %arg3[%c0, %c0_1] : memref<16x128xbf16, #tpu.memory_space<vmem>>, vector<16x128xbf16>
    %4 = arith.extf %3 : vector<16x128xbf16> to vector<16x128xf32>
    %c0_2 = arith.constant 0 : index
    %c0_3 = arith.constant 0 : index
    %5 = vector.load %arg5[%c0_2, %c0_3] : memref<16x1xf32, #tpu.memory_space<vmem>>, vector<16x1xf32>
    %6 = vector.broadcast %5 : vector<16x1xf32> to vector<16x128xf32>
    %7 = arith.subf %4, %6 : vector<16x128xf32>
    %c0_4 = arith.constant 0 : index
    %c0_5 = arith.constant 0 : index
    %8 = vector.load %arg6[%c0_4, %c0_5] : memref<16x1xf32, #tpu.memory_space<vmem>>, vector<16x1xf32>
    %9 = vector.broadcast %8 : vector<16x1xf32> to vector<16x128xf32>
    %10 = arith.mulf %7, %9 : vector<16x128xf32>
    %c0_6 = arith.constant 0 : index
    %c0_7 = arith.constant 0 : index
    %11 = vector.load %arg7[%c0_6, %c0_7] : memref<1x128xbf16, #tpu.memory_space<vmem>>, vector<1x128xbf16>
    %12 = arith.extf %11 : vector<1x128xbf16> to vector<1x128xf32>
    %13 = vector.broadcast %12 : vector<1x128xf32> to vector<16x128xf32>
    %14 = arith.mulf %10, %13 : vector<16x128xf32>
    %c0_8 = arith.constant 0 : index
    %c0_9 = arith.constant 0 : index
    %15 = vector.load %arg8[%c0_8, %c0_9] : memref<1x128xbf16, #tpu.memory_space<vmem>>, vector<1x128xbf16>
    %16 = arith.extf %15 : vector<1x128xbf16> to vector<1x128xf32>
    %17 = vector.broadcast %16 : vector<1x128xf32> to vector<16x128xf32>
    %18 = arith.addf %14, %17 : vector<16x128xf32>
    %19 = arith.truncf %18 : vector<16x128xf32> to vector<16x128xbf16>
    %c0_10 = arith.constant 0 : index
    %c0_11 = arith.constant 0 : index
    %20 = vector.load %arg11[%c0_10, %c0_11] : memref<16x128xf32, #tpu.memory_space<vmem>>, vector<16x128xf32>
    %c0_12 = arith.constant 0 : index
    %c0_13 = arith.constant 0 : index
    %21 = vector.load %arg4[%c0_12, %c0_13] : memref<128x128xbf16, #tpu.memory_space<vmem>>, vector<128x128xbf16>
    %cst = arith.constant dense<0.000000e+00> : vector<16x128xf32>
    %22 = tpu.matmul %19, %21, %cst {dimension_numbers = #tpu.dot_dimension_numbers<[1], [0], [0], [1], [0, 0, 1, 1], [], []>} : vector<16x128xbf16>, vector<128x128xbf16>, vector<16x128xf32> -> vector<16x128xf32>
    %23 = arith.addf %20, %22 : vector<16x128xf32>
    %c0_14 = arith.constant 0 : index
    %c0_15 = arith.constant 0 : index
    %24 = vector.load %arg11[%c0_14, %c0_15] : memref<16x128xf32, #tpu.memory_space<vmem>>, vector<16x128xf32>
    tpu.vector_store %arg11[%c0_14, %c0_15], %23 {strides = array<i32>} : memref<16x128xf32, #tpu.memory_space<vmem>>, vector<16x128xf32>,
    %c0_i32_16 = arith.constant 0 : i32
    %25 = arith.cmpi eq, %arg2, %c0_i32_16 : i32
    %26 = arith.extui %25 : i1 to i32
    %c0_i32_17 = arith.constant 0 : i32
    %27 = arith.cmpi ne, %26, %c0_i32_17 : i32
    scf.if %27 {
      %c0_18 = arith.constant 0 : index
      %c0_19 = arith.constant 0 : index
      %28 = vector.load %arg11[%c0_18, %c0_19] : memref<16x128xf32, #tpu.memory_space<vmem>>, vector<16x128xf32>
      %c0_20 = arith.constant 0 : index
      %c0_21 = arith.constant 0 : index
      %29 = vector.load %arg9[%c0_20, %c0_21] : memref<1x128xbf16, #tpu.memory_space<vmem>>, vector<1x128xbf16>
      %30 = arith.extf %29 : vector<1x128xbf16> to vector<1x128xf32>
      %31 = vector.broadcast %30 : vector<1x128xf32> to vector<16x128xf32>
      %32 = arith.addf %28, %31 : vector<16x128xf32>
      %33 = arith.mulf %32, %32 : vector<16x128xf32>
      %34 = arith.mulf %32, %33 : vector<16x128xf32>
      %cst_22 = arith.constant 4.471500e-02 : f32
      %35 = vector.broadcast %cst_22 : f32 to vector<16x128xf32>
      %36 = arith.mulf %35, %34 : vector<16x128xf32>
      %37 = arith.addf %32, %36 : vector<16x128xf32>
      %cst_23 = arith.constant 0.797884583 : f32
      %38 = vector.broadcast %cst_23 : f32 to vector<16x128xf32>
      %39 = arith.mulf %38, %37 : vector<16x128xf32>
      %40 = math.tanh %39 : vector<16x128xf32>
      %cst_24 = arith.constant 1.000000e+00 : f32
      %41 = vector.broadcast %cst_24 : f32 to vector<16x128xf32>
      %42 = arith.addf %41, %40 : vector<16x128xf32>
      %cst_25 = arith.constant 5.000000e-01 : f32
      %43 = vector.broadcast %cst_25 : f32 to vector<16x128xf32>
      %44 = arith.mulf %43, %42 : vector<16x128xf32>
      %45 = arith.mulf %32, %44 : vector<16x128xf32>
      %46 = arith.truncf %45 : vector<16x128xf32> to vector<16x128xbf16>
      %c0_26 = arith.constant 0 : index
      %c0_27 = arith.constant 0 : index
      %47 = vector.load %arg10[%c0_26, %c0_27] : memref<16x128xbf16, #tpu.memory_space<vmem>>, vector<16x128xbf16>
      tpu.vector_store %arg10[%c0_26, %c0_27], %46 {strides = array<i32>} : memref<16x128xbf16, #tpu.memory_space<vmem>>, vector<16x128xbf16>,
    } else {
    }
    return
  }
  func.func @transform_0(%arg0: i32, %arg1: i32, %arg2: i32) -> (i32, i32) {
    %c0_i32 = arith.constant 0 : i32
    return %arg0, %arg2 : i32, i32
  }
  func.func @transform_1(%arg0: i32, %arg1: i32, %arg2: i32) -> (i32, i32) {
    %c0_i32 = arith.constant 0 : i32
    return %arg2, %arg1 : i32, i32
  }
  func.func @transform_2(%arg0: i32, %arg1: i32, %arg2: i32) -> (i32, i32) {
    %c0_i32 = arith.constant 0 : i32
    %c0_i32_0 = arith.constant 0 : i32
    return %arg0, %c0_i32 : i32, i32
  }
  func.func @transform_3(%arg0: i32, %arg1: i32, %arg2: i32) -> (i32, i32) {
    %c0_i32 = arith.constant 0 : i32
    %c0_i32_0 = arith.constant 0 : i32
    return %arg0, %c0_i32 : i32, i32
  }
  func.func @transform_4(%arg0: i32, %arg1: i32, %arg2: i32) -> (i32, i32) {
    %c0_i32 = arith.constant 0 : i32
    %c0_i32_0 = arith.constant 0 : i32
    return %c0_i32, %arg2 : i32, i32
  }
  func.func @transform_5(%arg0: i32, %arg1: i32, %arg2: i32) -> (i32, i32) {
    %c0_i32 = arith.constant 0 : i32
    %c0_i32_0 = arith.constant 0 : i32
    return %c0_i32, %arg2 : i32, i32
  }
  func.func @transform_6(%arg0: i32, %arg1: i32, %arg2: i32) -> (i32, i32) {
    %c0_i32 = arith.constant 0 : i32
    %c0_i32_0 = arith.constant 0 : i32
    return %c0_i32, %arg1 : i32, i32
  }
  func.func @transform_7(%arg0: i32, %arg1: i32, %arg2: i32) -> (i32, i32) {
    %c0_i32 = arith.constant 0 : i32
    return %arg0, %arg1 : i32, i32
  }
}

module attributes {stable_mosaic.version = 11 : i64} {
  func.func @_matmul_kernel(%arg0: i32, %arg1: i32, %arg2: i32, %arg3: memref<16x128xbf16, #tpu.memory_space<vmem>>, %arg4: memref<128x128xbf16, #tpu.memory_space<vmem>>, %arg5: memref<16x1xf32, #tpu.memory_space<vmem>>, %arg6: memref<16x1xf32, #tpu.memory_space<vmem>>, %arg7: memref<1x128xbf16, #tpu.memory_space<vmem>>, %arg8: memref<1x128xbf16, #tpu.memory_space<vmem>>, %arg9: memref<16x128xf32, #tpu.memory_space<vmem>>, %arg10: memref<16x128xf32, #tpu.memory_space<vmem>>) attributes {dimension_semantics = [#tpu.dimension_semantics<parallel>, #tpu.dimension_semantics<parallel>, #tpu.dimension_semantics<arbitrary>], iteration_bounds = array<i64: 1, 1, 1>, scalar_prefetch = 0 : i64, scratch_operands = 1 : i64, tpu.core_type = #tpu.core_type<tc>, window_params = [{transform_indices = @transform_0, window_bounds = array<i64: 16, 128>}, {transform_indices = @transform_1, window_bounds = array<i64: 128, 128>}, {transform_indices = @transform_2, window_bounds = array<i64: 16, 1>}, {transform_indices = @transform_3, window_bounds = array<i64: 16, 1>}, {transform_indices = @transform_4, window_bounds = array<i64: 1, 128>}, {transform_indices = @transform_5, window_bounds = array<i64: 1, 128>}, {transform_indices = @transform_6, window_bounds = array<i64: 16, 128>}]} {
    %c0_i32 = arith.constant 0 : i32
    %0 = arith.cmpi eq, %arg2, %c0_i32 : i32
    %1 = arith.extui %0 : i1 to i32
    %c0_i32_0 = arith.constant 0 : i32
    %2 = arith.cmpi ne, %1, %c0_i32_0 : i32
    scf.if %2 {
      %cst_18 = arith.constant 0.000000e+00 : f32
      %28 = vector.broadcast %cst_18 : f32 to vector<16x128xf32>
      %c0_19 = arith.constant 0 : index
      %c0_20 = arith.constant 0 : index
      %29 = vector.load %arg10[%c0_19, %c0_20] : memref<16x128xf32, #tpu.memory_space<vmem>>, vector<16x128xf32>
      tpu.vector_store %arg10[%c0_19, %c0_20], %28 {strides = array<i32>} : memref<16x128xf32, #tpu.memory_space<vmem>>, vector<16x128xf32>,
    } else {
    }
    %c0 = arith.constant 0 : index
    %c0_1 = arith.constant 0 : index
    %3 = vector.load %arg3[%c0, %c0_1] : memref<16x128xbf16, #tpu.memory_space<vmem>>, vector<16x128xbf16>
    %4 = arith.extf %3 : vector<16x128xbf16> to vector<16x128xf32>
    %c0_2 = arith.constant 0 : index
    %c0_3 = arith.constant 0 : index
    %5 = vector.load %arg5[%c0_2, %c0_3] : memref<16x1xf32, #tpu.memory_space<vmem>>, vector<16x1xf32>
    %6 = vector.broadcast %5 : vector<16x1xf32> to vector<16x128xf32>
    %7 = arith.subf %4, %6 : vector<16x128xf32>
    %c0_4 = arith.constant 0 : index
    %c0_5 = arith.constant 0 : index
    %8 = vector.load %arg6[%c0_4, %c0_5] : memref<16x1xf32, #tpu.memory_space<vmem>>, vector<16x1xf32>
    %9 = vector.broadcast %8 : vector<16x1xf32> to vector<16x128xf32>
    %10 = arith.mulf %7, %9 : vector<16x128xf32>
    %c0_6 = arith.constant 0 : index
    %c0_7 = arith.constant 0 : index
    %11 = vector.load %arg7[%c0_6, %c0_7] : memref<1x128xbf16, #tpu.memory_space<vmem>>, vector<1x128xbf16>
    %12 = arith.extf %11 : vector<1x128xbf16> to vector<1x128xf32>
    %13 = vector.broadcast %12 : vector<1x128xf32> to vector<16x128xf32>
    %14 = arith.mulf %10, %13 : vector<16x128xf32>
    %c0_8 = arith.constant 0 : index
    %c0_9 = arith.constant 0 : index
    %15 = vector.load %arg8[%c0_8, %c0_9] : memref<1x128xbf16, #tpu.memory_space<vmem>>, vector<1x128xbf16>
    %16 = arith.extf %15 : vector<1x128xbf16> to vector<1x128xf32>
    %17 = vector.broadcast %16 : vector<1x128xf32> to vector<16x128xf32>
    %18 = arith.addf %14, %17 : vector<16x128xf32>
    %19 = arith.truncf %18 : vector<16x128xf32> to vector<16x128xbf16>
    %c0_10 = arith.constant 0 : index
    %c0_11 = arith.constant 0 : index
    %20 = vector.load %arg10[%c0_10, %c0_11] : memref<16x128xf32, #tpu.memory_space<vmem>>, vector<16x128xf32>
    %c0_12 = arith.constant 0 : index
    %c0_13 = arith.constant 0 : index
    %21 = vector.load %arg4[%c0_12, %c0_13] : memref<128x128xbf16, #tpu.memory_space<vmem>>, vector<128x128xbf16>
    %cst = arith.constant dense<0.000000e+00> : vector<16x128xf32>
    %22 = tpu.matmul %19, %21, %cst {dimension_numbers = #tpu.dot_dimension_numbers<[1], [0], [0], [1], [0, 0, 1, 1], [], []>} : vector<16x128xbf16>, vector<128x128xbf16>, vector<16x128xf32> -> vector<16x128xf32>
    %23 = arith.addf %20, %22 : vector<16x128xf32>
    %c0_14 = arith.constant 0 : index
    %c0_15 = arith.constant 0 : index
    %24 = vector.load %arg10[%c0_14, %c0_15] : memref<16x128xf32, #tpu.memory_space<vmem>>, vector<16x128xf32>
    tpu.vector_store %arg10[%c0_14, %c0_15], %23 {strides = array<i32>} : memref<16x128xf32, #tpu.memory_space<vmem>>, vector<16x128xf32>,
    %c0_i32_16 = arith.constant 0 : i32
    %25 = arith.cmpi eq, %arg2, %c0_i32_16 : i32
    %26 = arith.extui %25 : i1 to i32
    %c0_i32_17 = arith.constant 0 : i32
    %27 = arith.cmpi ne, %26, %c0_i32_17 : i32
    scf.if %27 {
      %c0_18 = arith.constant 0 : index
      %c0_19 = arith.constant 0 : index
      %28 = vector.load %arg10[%c0_18, %c0_19] : memref<16x128xf32, #tpu.memory_space<vmem>>, vector<16x128xf32>
      %c0_20 = arith.constant 0 : index
      %c0_21 = arith.constant 0 : index
      %29 = vector.load %arg9[%c0_20, %c0_21] : memref<16x128xf32, #tpu.memory_space<vmem>>, vector<16x128xf32>
      tpu.vector_store %arg9[%c0_20, %c0_21], %28 {strides = array<i32>} : memref<16x128xf32, #tpu.memory_space<vmem>>, vector<16x128xf32>,
    } else {
    }
    return
  }
  func.func @transform_0(%arg0: i32, %arg1: i32, %arg2: i32) -> (i32, i32) {
    %c0_i32 = arith.constant 0 : i32
    return %arg0, %arg2 : i32, i32
  }
  func.func @transform_1(%arg0: i32, %arg1: i32, %arg2: i32) -> (i32, i32) {
    %c0_i32 = arith.constant 0 : i32
    return %arg2, %arg1 : i32, i32
  }
  func.func @transform_2(%arg0: i32, %arg1: i32, %arg2: i32) -> (i32, i32) {
    %c0_i32 = arith.constant 0 : i32
    %c0_i32_0 = arith.constant 0 : i32
    return %arg0, %c0_i32 : i32, i32
  }
  func.func @transform_3(%arg0: i32, %arg1: i32, %arg2: i32) -> (i32, i32) {
    %c0_i32 = arith.constant 0 : i32
    %c0_i32_0 = arith.constant 0 : i32
    return %arg0, %c0_i32 : i32, i32
  }
  func.func @transform_4(%arg0: i32, %arg1: i32, %arg2: i32) -> (i32, i32) {
    %c0_i32 = arith.constant 0 : i32
    %c0_i32_0 = arith.constant 0 : i32
    return %c0_i32, %arg2 : i32, i32
  }
  func.func @transform_5(%arg0: i32, %arg1: i32, %arg2: i32) -> (i32, i32) {
    %c0_i32 = arith.constant 0 : i32
    %c0_i32_0 = arith.constant 0 : i32
    return %c0_i32, %arg2 : i32, i32
  }
  func.func @transform_6(%arg0: i32, %arg1: i32, %arg2: i32) -> (i32, i32) {
    %c0_i32 = arith.constant 0 : i32
    return %arg0, %arg1 : i32, i32
  }
}

</mosaic_0001>

<bundles_post_ra>
// kernel: longnet_forward.18
= control target key start
LH: loop header
LB: loop body
LE: loop exit
PB: predicated region body
PF: predicated region fallthrough
CT: control target
= control target key end

     0   :  { %v22_v3 = vlaneseq  ;;  %vm35_vm0 = vcmask 7168   ;;  %s94_s0 = inlined_call_operand.vmem [shape: bf16[16,128], index: 0, kind: input, shape index: {}]   ;;  %s95_s1 = inlined_call_operand.vmem [shape: f32[16,1], index: 1, kind: output, shape index: {0}]   ;;  %s96_s2 = inlined_call_operand.vmem [shape: f32[16,1], index: 2, kind: output, shape index: {1}]  }
   0x1   :  { %v53_v0 = vld [vmem:[%s94_s0] sm:$0xff]  }
   0x2   :  { %v54_v1 = vunpack.c.l.bf16 %v53_v0  ;;  %v55_v2 = vunpack.c.h.bf16 %v53_v0  ;;  %v23_v4 = vand.u32 127, %v22_v3 }
   0x4   :  { %14 = vadd.xlane.f32.xlu0 %v54_v1  ;;  %vm24_vm1 = vcmp.lt.s32.totalorder %v23_v4, 32 }
   0x8   :  { %16 = vadd.xlane.f32.xlu0 %v55_v2 }
  0x91   :  { %v15_v5 = vpop.xlane.xlu0 %14 }
  0x92   :  { %v18_v6 = vmul.f32 0.03125, %v15_v5 }
  0x94   :  { %36 = vst.msk [vmem:[%s95_s1] sm:$0xff] %vm35_vm0, %v18_v6  ;;  %v20_v7 = vsub.f32 %v54_v1, %v18_v6 }
  0x95   :  { %v17_v8 = vpop.xlane.xlu0 %16 }
  0x96   :  { %v19_v9 = vmul.f32 0.03125, %v17_v8  ;;  %v25_v10 = vsel %vm24_vm1, %v20_v7, 0.0 }
  0x97   :  { %v27_v11 = vmul.f32 %v25_v10, %v25_v10 }
  0x98   :  { %v21_v12 = vsub.f32 %v55_v2, %v19_v9  ;;  %37 = vst.msk [vmem:[%s95_s1 + $0x8] sm:$0xff] %vm35_vm0, %v19_v9 }
  0x99   :  { %29 = vadd.xlane.f32.xlu1 %v27_v11 }
  0x9a   :  { %v26_v13 = vsel %vm24_vm1, %v21_v12, 0.0 }
  0x9b   :  { %v28_v14 = vmul.f32 %v26_v13, %v26_v13 }
  0x9d   :  { %31 = vadd.xlane.f32.xlu1 %v28_v14 }
 0x126   :  { %v30_v15 = vpop.xlane.xlu1 %29 }
 0x127   :  { %v33_v16 = vmul.f32 0.03125, %v30_v15 }
 0x129   :  { %v38_v17 = vadd.f32 1e-05, %v33_v16 }
 0x12a   :  { %v32_v18 = vpop.xlane.xlu1 %31 }
 0x12b   :  { %56 = vrsqrt.f32 %v38_v17  ;;  %v34_v19 = vmul.f32 0.03125, %v32_v18 }
 0x12d   :  { %v39_v20 = vadd.f32 1e-05, %v34_v19 }
 0x12f   :  { %58 = vrsqrt.f32 %v39_v20 }
 0x135   :  { %v57_v21 = vpop.eup %56 }
 0x136   :  { %42 = vst.msk [vmem:[%s96_s2] sm:$0xff] %vm35_vm0, %v57_v21 }
 0x139   :  { %v59_v22 = vpop.eup %58 }
 0x13a   :  { %43 = vst.msk [vmem:[%s96_s2 + $0x8] sm:$0xff] %vm35_vm0, %v59_v22 }

// kernel: longnet_forward.21
= control target key start
LH: loop header
LB: loop body
LE: loop exit
PB: predicated region body
PF: predicated region fallthrough
CT: control target
= control target key end

     0   :  { %v182_v0 = vmov 0.0   ;;  %vm183_vm0 = vmmov 0   ;;  %s229_s1 = inlined_call_operand.vmem [shape: bf16[128,128], index: 1, kind: input, shape index: {}]   ;;  %s230_s0 = inlined_call_operand.vmem [shape: bf16[8,128], index: 0, kind: input, shape index: {}]   ;;  %s231_s2 = inlined_call_operand.vmem [shape: bf16[8,128], index: 2, kind: output, shape index: {}]  }
   0x1   :  { %152 = vmatprep.subr.bf16.mxu0 %v182_v0  ;;  %v174_v1 = vld [vmem:[%s229_s1] sm:$0xff]   ;;  %168 = vmatprep.mubr.msk.bf16.mxu0 %vm183_vm0, %v182_v0  ;;  %v175_v2 = vld [vmem:[%s229_s1 + $0x8] sm:$0xff]   ;;  %v176_v3 = vld [vmem:[%s229_s1 + $0x10] sm:$0xff]  }
   0x2   :  { %153 = vmatpush3.bf16.msra.mxu0 %v174_v1  ;;  %v177_v4 = vld [vmem:[%s229_s1 + $0x18] sm:$0xff]   ;;  %v178_v5 = vld [vmem:[%s229_s1 + $0x20] sm:$0xff]   ;;  %v179_v6 = vld [vmem:[%s229_s1 + $0x28] sm:$0xff]  }
   0x3   :  { %154 = vmatprep.subr.bf16.mxu0 %v182_v0  ;;  %v180_v7 = vld [vmem:[%s229_s1 + $0x30] sm:$0xff]   ;;  %v181_v8 = vld [vmem:[%s229_s1 + $0x38] sm:$0xff]   ;;  %v17_v9 = vld [vmem:[%s230_s0] sm:$0xf] }
   0x6   :  { %155 = vmatpush3.bf16.msra.mxu0 %v175_v2 }
   0x7   :  { %156 = vmatprep.subr.bf16.mxu0 %v182_v0 }
   0xa   :  { %157 = vmatpush3.bf16.msra.mxu0 %v176_v3 }
   0xb   :  { %158 = vmatprep.subr.bf16.mxu0 %v182_v0 }
   0xe   :  { %159 = vmatpush3.bf16.msra.mxu0 %v177_v4 }
   0xf   :  { %160 = vmatprep.subr.bf16.mxu0 %v182_v0 }
  0x12   :  { %161 = vmatpush3.bf16.msra.mxu0 %v178_v5 }
  0x13   :  { %162 = vmatprep.subr.bf16.mxu0 %v182_v0 }
  0x16   :  { %163 = vmatpush3.bf16.msra.mxu0 %v179_v6 }
  0x17   :  { %164 = vmatprep.subr.bf16.mxu0 %v182_v0 }
  0x1a   :  { %165 = vmatpush3.bf16.msra.mxu0 %v180_v7 }
  0x1b   :  { %166 = vmatprep.subr.bf16.mxu0 %v182_v0 }
  0x1e   :  { %167 = vmatpush3.bf16.msra.mxu0 %v181_v8 }
  0x21   :  { %169 = vmatmul.mubr.bf16.vlgmr.msra.gmra.mrb[0].mxu0 %v17_v9 }
  0xf4   :  { %v117_v10 = vpop.f32.mrb[0].mxu0 }
  0xf5   :  { %v129_v11 = vpack.c.bf16 %v117_v10, %v117_v10  ;;  %v170_v12 = vpop.f32.mrb[1].mxu0 }
  0xf6   :  { %v120_v13 = vpop.f32.mrb[2].mxu0 }
  0xf7   :  { %130 = vst [vmem:[%s231_s2] sm:$0xf] %v129_v11  ;;  %v171_v14 = vpop.f32.mrb[3].mxu0 }

// kernel: longnet_forward.19
= control target key start
LH: loop header
LB: loop body
LE: loop exit
PB: predicated region body
PF: predicated region fallthrough
CT: control target
= control target key end

     0   :  { %v283_v0 = vmov 0   ;;  %v284_v5 = vmov 0.0   ;;  %vm285_vm0 = vmmov 0   ;;  %v67_v14 = vlaneseq  ;;  %s377_s3 = inlined_call_operand.vmem [shape: f32[16,1], index: 3, kind: input, shape index: {}]   ;;  %s378_s2 = inlined_call_operand.vmem [shape: f32[16,1], index: 2, kind: input, shape index: {}]   ;;  %s379_s1 = inlined_call_operand.vmem [shape: bf16[128,128], index: 1, kind: input, shape index: {}]   ;;  %s380_s0 = inlined_call_operand.vmem [shape: bf16[16,128], index: 0, kind: input, shape index: {}]   ;;  %s381_s4 = inlined_call_operand.vmem [shape: bf16[1,128], index: 4, kind: input, shape index: {}]   ;;  %s382_s5 = inlined_call_operand.vmem [shape: bf16[1,128], index: 5, kind: input, shape index: {}]   ;;  %s383_s6 = inlined_call_operand.vmem [shape: bf16[1,128], index: 6, kind: input, shape index: {}]   ;;  %s384_s7 = inlined_call_operand.vmem [shape: bf16[16,128], index: 7, kind: output, shape index: {}]  }
   0x1   :  { %274 = vset.pattern.permute.xlu1 %v283_v0  ;;  %273 = vset.pattern.permute.xlu0 %v283_v0  ;;  %v51_v1 = vld [vmem:[%s377_s3] sm:$0xff]  ;;  %v52_v3 = vld [vmem:[%s377_s3 + $0x8] sm:$0xff]  ;;  %v277_v8 = vld [vmem:[%s379_s1 + $0x10] sm:$0xff]  }
   0x2   :  { %v37_v2 = vld [vmem:[%s378_s2] sm:$0xff]  ;;  %55 = vperm.xlu1 %274, %v51_v1   ;;  %v38_v4 = vld [vmem:[%s378_s2 + $0x8] sm:$0xff]  ;;  %250 = vmatprep.subr.bf16.mxu0 %v284_v5  ;;  %v278_v9 = vld [vmem:[%s379_s1 + $0x18] sm:$0xff]   ;;  %v68_v16 = vshrl.u32 %v67_v14, 7 }
   0x3   :  { %41 = vperm.xlu0 %273, %v37_v2   ;;  %v275_v6 = vld [vmem:[%s379_s1] sm:$0xff]   ;;  %v276_v7 = vld [vmem:[%s379_s1 + $0x8] sm:$0xff]   ;;  %266 = vmatprep.mubr.msk.bf16.mxu0 %vm285_vm0, %v284_v5  ;;  %v281_v12 = vld [vmem:[%s379_s1 + $0x30] sm:$0xff]  }
   0x4   :  { %251 = vmatpush3.bf16.msra.mxu0 %v275_v6  ;;  %v279_v10 = vld [vmem:[%s379_s1 + $0x20] sm:$0xff]   ;;  %v280_v11 = vld [vmem:[%s379_s1 + $0x28] sm:$0xff]   ;;  %v282_v13 = vld [vmem:[%s379_s1 + $0x38] sm:$0xff]   ;;  %v69_v20 = vsub.s32 0, %v68_v16 }
   0x5   :  { %252 = vmatprep.subr.bf16.mxu0 %v284_v5  ;;  %v233_v15 = vld [vmem:[%s380_s0] sm:$0xff]  }
   0x6   :  { %60 = vperm.xlu1 %274, %v52_v3   ;;  %v65_v17 = vld [vmem:[%s381_s4] sm:$0x1]  ;;  %v234_v18 = vunpack.c.l.bf16 %v233_v15  ;;  %v235_v25 = vunpack.c.h.bf16 %v233_v15 }
   0x7   :  { %46 = vperm.xlu0 %273, %v38_v4   ;;  %v66_v19 = vunpack.c.l.bf16 %v65_v17  ;;  %v73_v23 = vld [vmem:[%s382_s5] sm:$0x1] }
   0x8   :  { %253 = vmatpush3.bf16.msra.mxu0 %v276_v7  ;;  %v74_v28 = vunpack.c.l.bf16 %v73_v23  ;;  %v198_v39 = vld [vmem:[%s383_s6] sm:$0x1] }
   0x9   :  { %254 = vmatprep.subr.bf16.mxu0 %v284_v5  ;;  %v70_v26 = vrot.slane %v66_v19, %v69_v20  ;;  %v199_v40 = vunpack.c.l.bf16 %v198_v39 }
   0xa   :  { %v78_v34 = vrot.slane %v74_v28, %v69_v20 }
   0xb   :  { %v203_v41 = vrot.slane %v199_v40, %v69_v20 }
   0xc   :  { %255 = vmatpush3.bf16.msra.mxu0 %v277_v8 }
   0xd   :  { %256 = vmatprep.subr.bf16.mxu0 %v284_v5 }
  0x10   :  { %257 = vmatpush3.bf16.msra.mxu0 %v278_v9 }
  0x11   :  { %258 = vmatprep.subr.bf16.mxu0 %v284_v5 }
  0x14   :  { %259 = vmatpush3.bf16.msra.mxu0 %v279_v10 }
  0x15   :  { %260 = vmatprep.subr.bf16.mxu0 %v284_v5 }
  0x18   :  { %261 = vmatpush3.bf16.msra.mxu0 %v280_v11 }
  0x19   :  { %262 = vmatprep.subr.bf16.mxu0 %v284_v5 }
  0x1c   :  { %263 = vmatpush3.bf16.msra.mxu0 %v281_v12 }
  0x1d   :  { %264 = vmatprep.subr.bf16.mxu0 %v284_v5 }
  0x20   :  { %265 = vmatpush3.bf16.msra.mxu0 %v282_v13 }
  0x81   :  { %v56_v21 = vpop.permute.xlu1 %55 }
  0x82   :  { %v42_v22 = vpop.permute.xlu0 %41 }
  0x83   :  { %v49_v24 = vsub.f32 %v234_v18, %v42_v22 }
  0x85   :  { %v63_v27 = vmul.f32 %v56_v21, %v49_v24  ;;  %v61_v31 = vpop.permute.xlu1 %60 }
  0x86   :  { %v47_v29 = vpop.permute.xlu0 %46 }
  0x87   :  { %v50_v30 = vsub.f32 %v235_v25, %v47_v29  ;;  %v71_v32 = vmul.f32 %v70_v26, %v63_v27 }
  0x89   :  { %v64_v33 = vmul.f32 %v61_v31, %v50_v30  ;;  %v79_v36 = vadd.f32 %v78_v34, %v71_v32 }
  0x8b   :  { %v72_v35 = vmul.f32 %v70_v26, %v64_v33 }
  0x8d   :  { %v80_v37 = vadd.f32 %v78_v34, %v72_v35 }
  0x8f   :  { %v81_v38 = vpack.c.bf16 %v80_v37, %v79_v36 }
  0x91   :  { %267 = vmatmul.mubr.bf16.vlgmr.msra.gmra.mrb[0].mxu0 %v81_v38 }
 0x164   :  { %v182_v42 = vpop.f32.mrb[0].mxu0 }
 0x165   :  { %v268_v43 = vpop.f32.mrb[1].mxu0  ;;  %v204_v45 = vadd.f32 %v203_v41, %v182_v42 }
 0x166   :  { %v185_v44 = vpop.f32.mrb[2].mxu0 }
 0x167   :  { %v205_v46 = vadd.f32 %v203_v41, %v185_v44  ;;  %v269_v47 = vpop.f32.mrb[3].mxu0 }
 0x169   :  { %v239_v48 = vpack.c.bf16 %v205_v46, %v204_v45 }
 0x16b   :  { %240 = vst [vmem:[%s384_s7] sm:$0xff] %v239_v48  }

// kernel: longnet_forward.24
= control target key start
LH: loop header
LB: loop body
LE: loop exit
PB: predicated region body
PF: predicated region fallthrough
CT: control target
= control target key end

     0   :  { %v22_v3 = vlaneseq  ;;  %vm35_vm0 = vcmask 7168   ;;  %s94_s0 = inlined_call_operand.vmem [shape: bf16[16,128], index: 0, kind: input, shape index: {}]   ;;  %s95_s1 = inlined_call_operand.vmem [shape: f32[16,1], index: 1, kind: output, shape index: {0}]   ;;  %s96_s2 = inlined_call_operand.vmem [shape: f32[16,1], index: 2, kind: output, shape index: {1}]  }
   0x1   :  { %v53_v0 = vld [vmem:[%s94_s0] sm:$0xff]  }
   0x2   :  { %v54_v1 = vunpack.c.l.bf16 %v53_v0  ;;  %v55_v2 = vunpack.c.h.bf16 %v53_v0  ;;  %v23_v4 = vand.u32 127, %v22_v3 }
   0x4   :  { %14 = vadd.xlane.f32.xlu0 %v54_v1  ;;  %vm24_vm1 = vcmp.lt.s32.totalorder %v23_v4, 64 }
   0x8   :  { %16 = vadd.xlane.f32.xlu0 %v55_v2 }
  0x91   :  { %v15_v5 = vpop.xlane.xlu0 %14 }
  0x92   :  { %v18_v6 = vmul.f32 0.015625, %v15_v5 }
  0x94   :  { %36 = vst.msk [vmem:[%s95_s1] sm:$0xff] %vm35_vm0, %v18_v6  ;;  %v20_v7 = vsub.f32 %v54_v1, %v18_v6 }
  0x95   :  { %v17_v8 = vpop.xlane.xlu0 %16 }
  0x96   :  { %v19_v9 = vmul.f32 0.015625, %v17_v8  ;;  %v25_v10 = vsel %vm24_vm1, %v20_v7, 0.0 }
  0x97   :  { %v27_v11 = vmul.f32 %v25_v10, %v25_v10 }
  0x98   :  { %v21_v12 = vsub.f32 %v55_v2, %v19_v9  ;;  %37 = vst.msk [vmem:[%s95_s1 + $0x8] sm:$0xff] %vm35_vm0, %v19_v9 }
  0x99   :  { %29 = vadd.xlane.f32.xlu1 %v27_v11 }
  0x9a   :  { %v26_v13 = vsel %vm24_vm1, %v21_v12, 0.0 }
  0x9b   :  { %v28_v14 = vmul.f32 %v26_v13, %v26_v13 }
  0x9d   :  { %31 = vadd.xlane.f32.xlu1 %v28_v14 }
 0x126   :  { %v30_v15 = vpop.xlane.xlu1 %29 }
 0x127   :  { %v33_v16 = vmul.f32 0.015625, %v30_v15 }
 0x129   :  { %v38_v17 = vadd.f32 1e-05, %v33_v16 }
 0x12a   :  { %v32_v18 = vpop.xlane.xlu1 %31 }
 0x12b   :  { %56 = vrsqrt.f32 %v38_v17  ;;  %v34_v19 = vmul.f32 0.015625, %v32_v18 }
 0x12d   :  { %v39_v20 = vadd.f32 1e-05, %v34_v19 }
 0x12f   :  { %58 = vrsqrt.f32 %v39_v20 }
 0x135   :  { %v57_v21 = vpop.eup %56 }
 0x136   :  { %42 = vst.msk [vmem:[%s96_s2] sm:$0xff] %vm35_vm0, %v57_v21 }
 0x139   :  { %v59_v22 = vpop.eup %58 }
 0x13a   :  { %43 = vst.msk [vmem:[%s96_s2 + $0x8] sm:$0xff] %vm35_vm0, %v59_v22 }

// kernel: longnet_forward.25
= control target key start
LH: loop header
LB: loop body
LE: loop exit
PB: predicated region body
PF: predicated region fallthrough
CT: control target
= control target key end

     0   :  { %v296_v0 = vmov 0   ;;  %v297_v5 = vmov 0.0   ;;  %vm298_vm0 = vmmov 0   ;;  %v70_v14 = vlaneseq  ;;  %s398_s3 = inlined_call_operand.vmem [shape: f32[16,1], index: 3, kind: input, shape index: {}]   ;;  %s399_s2 = inlined_call_operand.vmem [shape: f32[16,1], index: 2, kind: input, shape index: {}]   ;;  %s400_s1 = inlined_call_operand.vmem [shape: bf16[128,128], index: 1, kind: input, shape index: {}]   ;;  %s401_s0 = inlined_call_operand.vmem [shape: bf16[16,128], index: 0, kind: input, shape index: {}]   ;;  %s402_s4 = inlined_call_operand.vmem [shape: bf16[1,128], index: 4, kind: input, shape index: {}]   ;;  %s403_s5 = inlined_call_operand.vmem [shape: bf16[1,128], index: 5, kind: input, shape index: {}]   ;;  %s404_s6 = inlined_call_operand.vmem [shape: bf16[1,128], index: 6, kind: input, shape index: {}]   ;;  %s405_s7 = inlined_call_operand.vmem [shape: bf16[16,128], index: 7, kind: input, shape index: {}]   ;;  %s406_s8 = inlined_call_operand.vmem [shape: bf16[16,128], index: 8, kind: output, shape index: {}]  }
   0x1   :  { %287 = vset.pattern.permute.xlu1 %v296_v0  ;;  %286 = vset.pattern.permute.xlu0 %v296_v0  ;;  %v54_v1 = vld [vmem:[%s398_s3] sm:$0xff]  ;;  %v55_v3 = vld [vmem:[%s398_s3 + $0x8] sm:$0xff]  ;;  %v290_v8 = vld [vmem:[%s400_s1 + $0x10] sm:$0xff]  }
   0x2   :  { %v40_v2 = vld [vmem:[%s399_s2] sm:$0xff]  ;;  %58 = vperm.xlu1 %287, %v54_v1   ;;  %v41_v4 = vld [vmem:[%s399_s2 + $0x8] sm:$0xff]  ;;  %263 = vmatprep.subr.bf16.mxu0 %v297_v5  ;;  %v291_v9 = vld [vmem:[%s400_s1 + $0x18] sm:$0xff]   ;;  %v71_v16 = vshrl.u32 %v70_v14, 7 }
   0x3   :  { %44 = vperm.xlu0 %286, %v40_v2   ;;  %v288_v6 = vld [vmem:[%s400_s1] sm:$0xff]   ;;  %v289_v7 = vld [vmem:[%s400_s1 + $0x8] sm:$0xff]   ;;  %279 = vmatprep.mubr.msk.bf16.mxu0 %vm298_vm0, %v297_v5  ;;  %v294_v12 = vld [vmem:[%s400_s1 + $0x30] sm:$0xff]  }
   0x4   :  { %264 = vmatpush3.bf16.msra.mxu0 %v288_v6  ;;  %v292_v10 = vld [vmem:[%s400_s1 + $0x20] sm:$0xff]   ;;  %v293_v11 = vld [vmem:[%s400_s1 + $0x28] sm:$0xff]   ;;  %v295_v13 = vld [vmem:[%s400_s1 + $0x38] sm:$0xff]   ;;  %v72_v20 = vsub.s32 0, %v71_v16 }
   0x5   :  { %265 = vmatprep.subr.bf16.mxu0 %v297_v5  ;;  %v242_v15 = vld [vmem:[%s401_s0] sm:$0xff]  }
   0x6   :  { %63 = vperm.xlu1 %287, %v55_v3   ;;  %v68_v17 = vld [vmem:[%s402_s4] sm:$0x1]  ;;  %v243_v18 = vunpack.c.l.bf16 %v242_v15  ;;  %v244_v25 = vunpack.c.h.bf16 %v242_v15 }
   0x7   :  { %49 = vperm.xlu0 %286, %v41_v4   ;;  %v69_v19 = vunpack.c.l.bf16 %v68_v17  ;;  %v76_v23 = vld [vmem:[%s403_s5] sm:$0x1] }
   0x8   :  { %266 = vmatpush3.bf16.msra.mxu0 %v289_v7  ;;  %v77_v28 = vunpack.c.l.bf16 %v76_v23  ;;  %v201_v39 = vld [vmem:[%s404_s6] sm:$0x1] }
   0x9   :  { %267 = vmatprep.subr.bf16.mxu0 %v297_v5  ;;  %v73_v26 = vrot.slane %v69_v19, %v72_v20  ;;  %v202_v40 = vunpack.c.l.bf16 %v201_v39  ;;  %v246_v42 = vld [vmem:[%s405_s7] sm:$0xff]  }
   0xa   :  { %v81_v34 = vrot.slane %v77_v28, %v72_v20  ;;  %v247_v45 = vunpack.c.l.bf16 %v246_v42  ;;  %v248_v47 = vunpack.c.h.bf16 %v246_v42 }
   0xb   :  { %v206_v41 = vrot.slane %v202_v40, %v72_v20 }
   0xc   :  { %268 = vmatpush3.bf16.msra.mxu0 %v290_v8 }
   0xd   :  { %269 = vmatprep.subr.bf16.mxu0 %v297_v5 }
  0x10   :  { %270 = vmatpush3.bf16.msra.mxu0 %v291_v9 }
  0x11   :  { %271 = vmatprep.subr.bf16.mxu0 %v297_v5 }
  0x14   :  { %272 = vmatpush3.bf16.msra.mxu0 %v292_v10 }
  0x15   :  { %273 = vmatprep.subr.bf16.mxu0 %v297_v5 }
  0x18   :  { %274 = vmatpush3.bf16.msra.mxu0 %v293_v11 }
  0x19   :  { %275 = vmatprep.subr.bf16.mxu0 %v297_v5 }
  0x1c   :  { %276 = vmatpush3.bf16.msra.mxu0 %v294_v12 }
  0x1d   :  { %277 = vmatprep.subr.bf16.mxu0 %v297_v5 }
  0x20   :  { %278 = vmatpush3.bf16.msra.mxu0 %v295_v13 }
  0x81   :  { %v59_v21 = vpop.permute.xlu1 %58 }
  0x82   :  { %v45_v22 = vpop.permute.xlu0 %44 }
  0x83   :  { %v52_v24 = vsub.f32 %v243_v18, %v45_v22 }
  0x85   :  { %v66_v27 = vmul.f32 %v59_v21, %v52_v24  ;;  %v64_v31 = vpop.permute.xlu1 %63 }
  0x86   :  { %v50_v29 = vpop.permute.xlu0 %49 }
  0x87   :  { %v53_v30 = vsub.f32 %v244_v25, %v50_v29  ;;  %v74_v32 = vmul.f32 %v73_v26, %v66_v27 }
  0x89   :  { %v67_v33 = vmul.f32 %v64_v31, %v53_v30  ;;  %v82_v36 = vadd.f32 %v81_v34, %v74_v32 }
  0x8b   :  { %v75_v35 = vmul.f32 %v73_v26, %v67_v33 }
  0x8d   :  { %v83_v37 = vadd.f32 %v81_v34, %v75_v35 }
  0x8f   :  { %v84_v38 = vpack.c.bf16 %v83_v37, %v82_v36 }
  0x91   :  { %280 = vmatmul.mubr.bf16.vlgmr.msra.gmra.mrb[0].mxu0 %v84_v38 }
 0x164   :  { %v185_v43 = vpop.f32.mrb[0].mxu0 }
 0x165   :  { %v207_v44 = vadd.f32 %v206_v41, %v185_v43  ;;  %v281_v46 = vpop.f32.mrb[1].mxu0 }
 0x166   :  { %v188_v48 = vpop.f32.mrb[2].mxu0 }
 0x167   :  { %v208_v49 = vadd.f32 %v206_v41, %v188_v48  ;;  %v282_v50 = vpop.f32.mrb[3].mxu0  ;;  %v213_v51 = vadd.f32 %v247_v45, %v207_v44 }
 0x169   :  { %v214_v52 = vadd.f32 %v248_v47, %v208_v49 }
 0x16b   :  { %v252_v53 = vpack.c.bf16 %v214_v52, %v213_v51 }
 0x16d   :  { %253 = vst [vmem:[%s406_s8] sm:$0xff] %v252_v53  }

// kernel: longnet_forward.23
= control target key start
LH: loop header
LB: loop body
LE: loop exit
PB: predicated region body
PF: predicated region fallthrough
CT: control target
= control target key end

     0   :  { %v305_v0 = vmov 0   ;;  %v306_v5 = vmov 0.0   ;;  %vm307_vm0 = vmmov 0   ;;  %v67_v14 = vlaneseq  ;;  %s399_s3 = inlined_call_operand.vmem [shape: f32[16,1], index: 3, kind: input, shape index: {}]   ;;  %s400_s2 = inlined_call_operand.vmem [shape: f32[16,1], index: 2, kind: input, shape index: {}]   ;;  %s401_s1 = inlined_call_operand.vmem [shape: bf16[128,128], index: 1, kind: input, shape index: {}]   ;;  %s402_s0 = inlined_call_operand.vmem [shape: bf16[16,128], index: 0, kind: input, shape index: {}]   ;;  %s403_s4 = inlined_call_operand.vmem [shape: bf16[1,128], index: 4, kind: input, shape index: {}]   ;;  %s404_s5 = inlined_call_operand.vmem [shape: bf16[1,128], index: 5, kind: input, shape index: {}]   ;;  %s405_s6 = inlined_call_operand.vmem [shape: bf16[1,128], index: 6, kind: input, shape index: {}]   ;;  %s406_s7 = inlined_call_operand.vmem [shape: bf16[16,128], index: 7, kind: output, shape index: {}]  }
   0x1   :  { %292 = vset.pattern.permute.xlu1 %v305_v0  ;;  %291 = vset.pattern.permute.xlu0 %v305_v0  ;;  %v51_v1 = vld [vmem:[%s399_s3] sm:$0xff]  ;;  %v52_v3 = vld [vmem:[%s399_s3 + $0x8] sm:$0xff]  ;;  %v295_v8 = vld [vmem:[%s401_s1 + $0x10] sm:$0xff]  }
   0x2   :  { %v37_v2 = vld [vmem:[%s400_s2] sm:$0xff]  ;;  %55 = vperm.xlu1 %292, %v51_v1   ;;  %v38_v4 = vld [vmem:[%s400_s2 + $0x8] sm:$0xff]  ;;  %268 = vmatprep.subr.bf16.mxu0 %v306_v5  ;;  %v296_v9 = vld [vmem:[%s401_s1 + $0x18] sm:$0xff]   ;;  %v68_v16 = vshrl.u32 %v67_v14, 7 }
   0x3   :  { %41 = vperm.xlu0 %291, %v37_v2   ;;  %v293_v6 = vld [vmem:[%s401_s1] sm:$0xff]   ;;  %v294_v7 = vld [vmem:[%s401_s1 + $0x8] sm:$0xff]   ;;  %284 = vmatprep.mubr.msk.bf16.mxu0 %vm307_vm0, %v306_v5  ;;  %v299_v12 = vld [vmem:[%s401_s1 + $0x30] sm:$0xff]  }
   0x4   :  { %269 = vmatpush3.bf16.msra.mxu0 %v293_v6  ;;  %v297_v10 = vld [vmem:[%s401_s1 + $0x20] sm:$0xff]   ;;  %v298_v11 = vld [vmem:[%s401_s1 + $0x28] sm:$0xff]   ;;  %v300_v13 = vld [vmem:[%s401_s1 + $0x38] sm:$0xff]   ;;  %v69_v20 = vsub.s32 0, %v68_v16 }
   0x5   :  { %270 = vmatprep.subr.bf16.mxu0 %v306_v5  ;;  %v251_v15 = vld [vmem:[%s402_s0] sm:$0xff]  }
   0x6   :  { %60 = vperm.xlu1 %292, %v52_v3   ;;  %v65_v17 = vld [vmem:[%s403_s4] sm:$0x1]  ;;  %v252_v18 = vunpack.c.l.bf16 %v251_v15  ;;  %v253_v25 = vunpack.c.h.bf16 %v251_v15 }
   0x7   :  { %46 = vperm.xlu0 %291, %v38_v4   ;;  %v66_v19 = vunpack.c.l.bf16 %v65_v17  ;;  %v73_v23 = vld [vmem:[%s404_s5] sm:$0x1] }
   0x8   :  { %271 = vmatpush3.bf16.msra.mxu0 %v294_v7  ;;  %v74_v28 = vunpack.c.l.bf16 %v73_v23  ;;  %v198_v39 = vld [vmem:[%s405_s6] sm:$0x1] }
   0x9   :  { %272 = vmatprep.subr.bf16.mxu0 %v306_v5  ;;  %v70_v26 = vrot.slane %v66_v19, %v69_v20  ;;  %v199_v40 = vunpack.c.l.bf16 %v198_v39 }
   0xa   :  { %v78_v34 = vrot.slane %v74_v28, %v69_v20 }
   0xb   :  { %v203_v41 = vrot.slane %v199_v40, %v69_v20 }
   0xc   :  { %273 = vmatpush3.bf16.msra.mxu0 %v295_v8 }
   0xd   :  { %274 = vmatprep.subr.bf16.mxu0 %v306_v5 }
  0x10   :  { %275 = vmatpush3.bf16.msra.mxu0 %v296_v9 }
  0x11   :  { %276 = vmatprep.subr.bf16.mxu0 %v306_v5 }
  0x14   :  { %277 = vmatpush3.bf16.msra.mxu0 %v297_v10 }
  0x15   :  { %278 = vmatprep.subr.bf16.mxu0 %v306_v5 }
  0x18   :  { %279 = vmatpush3.bf16.msra.mxu0 %v298_v11 }
  0x19   :  { %280 = vmatprep.subr.bf16.mxu0 %v306_v5 }
  0x1c   :  { %281 = vmatpush3.bf16.msra.mxu0 %v299_v12 }
  0x1d   :  { %282 = vmatprep.subr.bf16.mxu0 %v306_v5 }
  0x20   :  { %283 = vmatpush3.bf16.msra.mxu0 %v300_v13 }
  0x81   :  { %v56_v21 = vpop.permute.xlu1 %55 }
  0x82   :  { %v42_v22 = vpop.permute.xlu0 %41 }
  0x83   :  { %v49_v24 = vsub.f32 %v252_v18, %v42_v22 }
  0x85   :  { %v63_v27 = vmul.f32 %v56_v21, %v49_v24  ;;  %v61_v31 = vpop.permute.xlu1 %60 }
  0x86   :  { %v47_v29 = vpop.permute.xlu0 %46 }
  0x87   :  { %v50_v30 = vsub.f32 %v253_v25, %v47_v29  ;;  %v71_v32 = vmul.f32 %v70_v26, %v63_v27 }
  0x89   :  { %v64_v33 = vmul.f32 %v61_v31, %v50_v30  ;;  %v79_v36 = vadd.f32 %v78_v34, %v71_v32 }
  0x8b   :  { %v72_v35 = vmul.f32 %v70_v26, %v64_v33 }
  0x8d   :  { %v80_v37 = vadd.f32 %v78_v34, %v72_v35 }
  0x8f   :  { %v81_v38 = vpack.c.bf16 %v80_v37, %v79_v36 }
  0x91   :  { %285 = vmatmul.mubr.bf16.vlgmr.msra.gmra.mrb[0].mxu0 %v81_v38 }
 0x164   :  { %v182_v42 = vpop.f32.mrb[0].mxu0 }
 0x165   :  { %v204_v43 = vadd.f32 %v203_v41, %v182_v42  ;;  %v286_v44 = vpop.f32.mrb[1].mxu0 }
 0x166   :  { %v185_v45 = vpop.f32.mrb[2].mxu0 }
 0x167   :  { %v206_v46 = vmul.f32 %v204_v43, %v204_v43  ;;  %v205_v47 = vadd.f32 %v203_v41, %v185_v45  ;;  %v287_v48 = vpop.f32.mrb[3].mxu0 }
 0x169   :  { %v208_v49 = vmul.f32 %v206_v46, %v204_v43  ;;  %v207_v50 = vmul.f32 %v205_v47, %v205_v47 }
 0x16b   :  { %v210_v51 = vmul.f32 0.044715, %v208_v49  ;;  %v209_v52 = vmul.f32 %v207_v50, %v205_v47 }
 0x16d   :  { %v212_v53 = vadd.f32 %v210_v51, %v204_v43  ;;  %v211_v54 = vmul.f32 0.044715, %v209_v52 }
 0x16f   :  { %v214_v55 = vmul.f32 0.7978846, %v212_v53  ;;  %v213_v56 = vadd.f32 %v211_v54, %v205_v47 }
 0x171   :  { %301 = vtanh.f32 %v214_v55  ;;  %v215_v57 = vmul.f32 0.7978846, %v213_v56 }
 0x173   :  { %303 = vtanh.f32 %v215_v57 }
 0x17b   :  { %v302_v58 = vpop.eup %301 }
 0x17c   :  { %v218_v59 = vadd.f32 1.0, %v302_v58 }
 0x17d   :  { %v304_v60 = vpop.eup %303 }
 0x17e   :  { %v220_v61 = vmul.f32 0.5, %v218_v59  ;;  %v219_v62 = vadd.f32 1.0, %v304_v60 }
 0x180   :  { %v221_v63 = vmul.f32 0.5, %v219_v62  ;;  %v222_v0 = vmul.f32 %v220_v61, %v204_v43 }
 0x182   :  { %v223_v1 = vmul.f32 %v221_v63, %v205_v47 }
 0x184   :  { %v257_v2 = vpack.c.bf16 %v223_v1, %v222_v0 }
 0x186   :  { %258 = vst [vmem:[%s406_s7] sm:$0xff] %v257_v2  }

// kernel: longnet_forward.20
= control target key start
LH: loop header
LB: loop body
LE: loop exit
PB: predicated region body
PF: predicated region fallthrough
CT: control target
= control target key end

     0   :  { %v58_v1 = vlaneseq  ;;  %v2395_v2 = vmov 1966171168   ;;  %v2396_v7 = vmov 0.0   ;;  %vm2397_vm0 = vmmov 0   ;;  %s2399_s14 = smov 64   ;;  %s2400_s15 = smov 88   ;;  %s2794_s0 = inlined_call_operand.vmem [shape: bf16[4,2,256], index: 0, kind: input, shape index: {}]   ;;  %s2795_s1 = inlined_call_operand.vmem [shape: bf16[4,2,128], index: 1, kind: output, shape index: {}]  }
   0x1   :  { %v23_v0 = vld [vmem:[%s2794_s0] sm:$0x1]  ;;  %v65_v3 = vunpack.c.l.s4 %v2395_v2  ;;  %v25_v4 = vld [vmem:[%s2794_s0 + $0x2] sm:$0x1]  ;;  %v27_v5 = vld [vmem:[%s2794_s0 + $0x4] sm:$0x1]  ;;  %2092 = vmatprep.subr.bf16.mxu0 %v2396_v7  ;;  %2098 = vmatprep.subr.bf16.mxu1 %v2396_v7 }
   0x2   :  { %24 = vst [vmem:[#allocation2] sm:$0x1] %v23_v0  ;;  %v29_v6 = vld [vmem:[%s2794_s0 + $0x6] sm:$0x1]  ;;  %v59_v8 = vshrl.u32 %v58_v1, 7  ;;  %2094 = vmatprep.mubr.msk.bf16.mxu0 %vm2397_vm0, %v2396_v7  ;;  %2100 = vmatprep.mubr.msk.bf16.mxu1 %vm2397_vm0, %v2396_v7  ;;  %s2398_s0 = smov 96  }
   0x3   :  { %26 = vst [vmem:[#allocation2 + $0x1] sm:$0x1] %v25_v4  ;;  %28 = vst [vmem:[#allocation2 + $0x2] sm:$0x1] %v27_v5  ;;  %v66_v9 = vunpack.c.0.s8 %v65_v3  ;;  %vm80_vm1 = vcmask 64512   ;;  %v61_v31 = vand.u32 127, %v58_v1 }
   0x4   :  { %30 = vst [vmem:[#allocation2 + $0x3] sm:$0x1] %v29_v6  ;;  %vm326_vm3 = vcmask 9216   ;;  %vm381_vm4 = vcmask 1040384   ;;  %s2401_s16 = smov 120   ;;  %vm377_vm5 = vcmask 15360  }
   0x5   :  { %v69_v10 = vsub.s32 %v66_v9, %v59_v8  ;;  %vm2472_vm2 = vcmp.le.s32.totalorder %v61_v31, %v59_v8  ;;  %s2402_s17 = smov 56   ;;  %s2403_s18 = smov 80   ;;  %vm1965_vm6 = vcmask 130048   ;;  %vm1970_vm7 = vcmask 195584  }
   0x6   :  { %s2404_s19 = smov 112   ;;  %s2405_s20 = smov 48   ;;  %vm1975_vm8 = vcmask 261120  }
   0x7   :  { %s2406_s21 = smov 72   ;;  %s2407_s22 = smov 104  }
   0x8   :  { %s2408_s23 = smov 40   ;;  %s2409_s24 = smov 8  }
   0x9   :  { %v54_v11 = vld [vmem:[#allocation2] sm:$0x1]  ;;  %s2410_s25 = smov 16   ;;  %s2411_s26 = smov 24  }
   0xa   :  { %v70_v12 = vrot.slane %v54_v11, %v69_v10  ;;  %v55_v13 = vld [vmem:[#allocation2 + $0x1] sm:$0x1]  ;;  %v56_v14 = vld [vmem:[#allocation2 + $0x2] sm:$0x1] }
   0xb   :  { %v57_v15 = vld [vmem:[#allocation2 + $0x3] sm:$0x1]  ;;  %v134_v16 = vrot.slane %v55_v13, %v69_v10  ;;  %v197_v17 = vrot.slane %v56_v14, %v69_v10 }
   0xc   :  { %v260_v18 = vrot.slane %v57_v15, %v69_v10  ;;  %v2440_v19 = vrot.slane %v70_v12, %v69_v10 }
   0xd   :  { %v2442_v20 = vrot.slane %v197_v17, %v69_v10  ;;  %v2445_v21 = vrot.slane %v134_v16, %v69_v10 }
   0xe   :  { %78 = vrot.lane.b32.xlu0 %v2440_v19, %s2398_s0  ;;  %v2448_v22 = vrot.slane %v260_v18, %v69_v10 }
   0xf   :  { %205 = vrot.lane.b32.xlu1 %v2442_v20, %s2398_s0 }
  0x12   :  { %142 = vrot.lane.b32.xlu0 %v2445_v21, %s2398_s0 }
  0x13   :  { %268 = vrot.lane.b32.xlu1 %v2448_v22, %s2398_s0 }
  0x80   :  { %v79_v23 = vpop.permute.xlu0 %78 }
  0x81   :  { %v85_v24 = vsel %vm80_vm1, %v79_v23, 0  ;;  %v206_v25 = vpop.permute.xlu1 %205 }
  0x82   :  { %2093 = vmatpush3.bf16.xpose.msra.mxu0 %v85_v24  ;;  %v211_v28 = vsel %vm80_vm1, %v206_v25, 0 }
  0x83   :  { %2104 = vmatprep.subr.bf16.mxu0 %v2396_v7 }
  0x84   :  { %v143_v26 = vpop.permute.xlu0 %142 }
  0x85   :  { %v148_v27 = vsel %vm80_vm1, %v143_v26, 0  ;;  %v269_v29 = vpop.permute.xlu1 %268 }
  0x86   :  { %2099 = vmatpush3.bf16.xpose.msra.mxu1 %v148_v27  ;;  %v274_v30 = vsel %vm80_vm1, %v269_v29, 0 }
  0x87   :  { %2110 = vmatprep.subr.bf16.mxu1 %v2396_v7 }
  0x89   :  { %2095 = vmatmul.mubr.msk.bf16.vlgmr.msra.gmra.mrb[0].mxu0 %vm80_vm1, %v54_v11 }
  0x8a   :  { %2105 = vmatpush3.bf16.xpose.msra.mxu0 %v211_v28  ;;  %2106 = vmatprep.mubr.msk.bf16.mxu0 %vm2397_vm0, %v2396_v7 }
  0x8b   :  { %2116 = vmatprep.subr.bf16.mxu0 %v2396_v7 }
  0x8d   :  { %2101 = vmatmul.mubr.msk.bf16.vlgmr.msra.gmra.mrb[0].mxu1 %vm80_vm1, %v55_v13 }
  0x8e   :  { %2111 = vmatpush3.bf16.xpose.msra.mxu1 %v274_v30  ;;  %2112 = vmatprep.mubr.msk.bf16.mxu1 %vm2397_vm0, %v2396_v7 }
  0x8f   :  { %2122 = vmatprep.subr.bf16.mxu1 %v2396_v7 }
  0x91   :  { %2107 = vmatmul.mubr.msk.bf16.vlgmr.msra.gmra.mrb[4].mxu0 %vm80_vm1, %v56_v14 }
  0x92   :  { %2118 = vmatprep.mubr.msk.bf16.mxu0 %vm2397_vm0, %v2396_v7 }
  0x95   :  { %2113 = vmatmul.mubr.msk.bf16.vlgmr.msra.gmra.mrb[4].mxu1 %vm80_vm1, %v57_v15 }
  0x96   :  { %2124 = vmatprep.mubr.msk.bf16.mxu1 %vm2397_vm0, %v2396_v7 }
 0x15c   :  { %v121_v32 = vpop.f32.mrb[0].mxu0 }
 0x15d   :  { %v316_v34 = vmul.f32 0.35355338, %v121_v32  ;;  %v2096_v35 = vpop.f32.mrb[1].mxu0 }
 0x15e   :  { %v124_v36 = vpop.f32.mrb[2].mxu0 }
 0x15f   :  { %v2097_v37 = vpop.f32.mrb[3].mxu0  ;;  %v322_v38 = vsel %vm2472_vm2, %v316_v34, -1e+30 }
 0x160   :  { %v184_v39 = vpop.f32.mrb[0].mxu1  ;;  %v327_v40 = vsel %vm326_vm3, %v322_v38, -inf }
 0x161   :  { %v317_v41 = vmul.f32 0.35355338, %v184_v39  ;;  %328 = vmax.xlane.f32.xlu0 %v327_v40  ;;  %v2102_v42 = vpop.f32.mrb[1].mxu1 }
 0x162   :  { %v187_v43 = vpop.f32.mrb[2].mxu1 }
 0x163   :  { %v323_v44 = vsel %vm2472_vm2, %v317_v41, -1e+30  ;;  %v2103_v45 = vpop.f32.mrb[3].mxu1 }
 0x164   :  { %v247_v46 = vpop.f32.mrb[4].mxu0  ;;  %v330_v47 = vsel %vm326_vm3, %v323_v44, -inf }
 0x165   :  { %v318_v48 = vmul.f32 0.35355338, %v247_v46  ;;  %331 = vmax.xlane.f32.xlu1 %v330_v47  ;;  %v2108_v49 = vpop.f32.mrb[5].mxu0 }
 0x166   :  { %v250_v50 = vpop.f32.mrb[6].mxu0 }
 0x167   :  { %v324_v51 = vsel %vm2472_vm2, %v318_v48, -1e+30  ;;  %v2109_v52 = vpop.f32.mrb[7].mxu0 }
 0x168   :  { %v310_v53 = vpop.f32.mrb[4].mxu1  ;;  %v333_v54 = vsel %vm326_vm3, %v324_v51, -inf }
 0x169   :  { %v319_v55 = vmul.f32 0.35355338, %v310_v53  ;;  %334 = vmax.xlane.f32.xlu0 %v333_v54  ;;  %v2114_v56 = vpop.f32.mrb[5].mxu1 }
 0x16a   :  { %v313_v57 = vpop.f32.mrb[6].mxu1 }
 0x16b   :  { %v325_v58 = vsel %vm2472_vm2, %v319_v55, -1e+30  ;;  %v2115_v59 = vpop.f32.mrb[7].mxu1 }
 0x16c   :  { %v336_v60 = vsel %vm326_vm3, %v325_v58, -inf }
 0x16d   :  { %337 = vmax.xlane.f32.xlu0 %v336_v60 }
 0x176   :  { %375 = vrot.lane.b32.xlu1 %v2440_v19, %s2399_s14 }
 0x1ee   :  { %v329_v61 = vpop.xlane.xlu0 %328 }
 0x1ef   :  { %v339_v62 = vsub.f32 %v322_v38, %v329_v61 }
 0x1f1   :  { %v343_v63 = vmul.f32 1.442695, %v339_v62 }
 0x1f2   :  { %v332_v0 = vpop.xlane.xlu1 %331 }
 0x1f3   :  { %2331 = vpow2.f32 %v343_v63  ;;  %v340_v1 = vsub.f32 %v323_v44, %v332_v0 }
 0x1f5   :  { %v345_v2 = vmul.f32 1.442695, %v340_v1 }
 0x1f6   :  { %v376_v3 = vpop.permute.xlu1 %375  ;;  %v335_v10 = vpop.xlane.xlu0 %334 }
 0x1f7   :  { %2333 = vpow2.f32 %v345_v2  ;;  %v383_v4 = vsel %vm381_vm4, %v376_v3, 0  ;;  %v341_v12 = vsub.f32 %v324_v51, %v335_v10 }
 0x1f8   :  { %2117 = vmatpush3.bf16.msra.mxu0 %v383_v4 }
 0x1f9   :  { %2128 = vmatprep.subr.bf16.mxu0 %v2396_v7  ;;  %v347_v14 = vmul.f32 1.442695, %v341_v12 }
 0x1fa   :  { %v338_v11 = vpop.xlane.xlu0 %337 }
 0x1fb   :  { %v342_v13 = vsub.f32 %v325_v58, %v338_v11  ;;  %2335 = vpow2.f32 %v347_v14 }
 0x1fd   :  { %v2332_v5 = vpop.eup %2331  ;;  %v349_v15 = vmul.f32 1.442695, %v342_v13 }
 0x1fe   :  { %v351_v6 = vsel %vm326_vm3, %v2332_v5, 0.0 }
 0x1ff   :  { %352 = vadd.xlane.f32.xlu1 %v351_v6  ;;  %2337 = vpow2.f32 %v349_v15 }
 0x201   :  { %v2334_v8 = vpop.eup %2333 }
 0x202   :  { %v354_v9 = vsel %vm326_vm3, %v2334_v8, 0.0 }
 0x203   :  { %355 = vadd.xlane.f32.xlu0 %v354_v9 }
 0x205   :  { %v2336_v16 = vpop.eup %2335 }
 0x206   :  { %v357_v18 = vsel %vm326_vm3, %v2336_v16, 0.0 }
 0x209   :  { %v2338_v17 = vpop.eup %2337 }
 0x20a   :  { %v360_v23 = vsel %vm326_vm3, %v2338_v17, 0.0 }
 0x210   :  { %473 = vrot.lane.b32.xlu1 %v2442_v20, %s2399_s14 }
 0x214   :  { %521 = vrot.lane.b32.xlu1 %v2448_v22, %s2399_s14 }
 0x219   :  { %425 = vrot.lane.b32.xlu0 %v2445_v21, %s2399_s14 }
 0x238   :  { %358 = vadd.xlane.f32.xlu1 %v357_v18  ;;  %361 = vadd.xlane.f32.xlu0 %v360_v23 }
 0x249   :  { %621 = vrot.lane.b32.xlu1 %v2445_v21, %s2400_s15 }
 0x24d   :  { %619 = vrot.lane.b32.xlu1 %v2445_v21, %s2401_s16 }
 0x24e   :  { %571 = vrot.lane.b32.xlu0 %v2440_v19, %s2400_s15 }
 0x251   :  { %721 = vrot.lane.b32.xlu1 %v2448_v22, %s2400_s15 }
 0x252   :  { %569 = vrot.lane.b32.xlu0 %v2440_v19, %s2401_s16 }
 0x255   :  { %719 = vrot.lane.b32.xlu1 %v2448_v22, %s2401_s16 }
 0x256   :  { %671 = vrot.lane.b32.xlu0 %v2442_v20, %s2400_s15 }
 0x25a   :  { %669 = vrot.lane.b32.xlu0 %v2442_v20, %s2401_s16 }
 0x28c   :  { %v353_v24 = vpop.xlane.xlu1 %352 }
 0x28d   :  { %2339 = vrcp.f32 %v353_v24 }
 0x290   :  { %v356_v25 = vpop.xlane.xlu0 %355  ;;  %v474_v29 = vpop.permute.xlu1 %473 }
 0x291   :  { %2341 = vrcp.f32 %v356_v25  ;;  %v479_v34 = vsel %vm381_vm4, %v474_v29, 0 }
 0x294   :  { %v426_v26 = vpop.permute.xlu0 %425  ;;  %v522_v36 = vpop.permute.xlu1 %521 }
 0x295   :  { %v431_v27 = vsel %vm381_vm4, %v426_v26, 0  ;;  %v527_v38 = vsel %vm381_vm4, %v522_v36, 0 }
 0x296   :  { %2123 = vmatpush3.bf16.msra.mxu1 %v431_v27 }
 0x297   :  { %v2340_v28 = vpop.eup %2339  ;;  %2134 = vmatprep.subr.bf16.mxu1 %v2396_v7 }
 0x298   :  { %v367_v30 = vmul.f32 %v2340_v28, %v2332_v5 }
 0x29a   :  { %v371_v31 = vpack.c.bf16 %v367_v30, %v367_v30 }
 0x29b   :  { %v2342_v32 = vpop.eup %2341 }
 0x29c   :  { %v368_v35 = vmul.f32 %v2342_v32, %v2334_v8  ;;  %2119 = vmatmul.mubr.msk.bf16.vlgmr.msra.gmra.mrb[8].mxu0 %vm377_vm5, %v371_v31 }
 0x29d   :  { %2129 = vmatpush3.bf16.msra.mxu0 %v479_v34  ;;  %2130 = vmatprep.mubr.msk.bf16.mxu0 %vm2397_vm0, %v2396_v7 }
 0x29e   :  { %v372_v37 = vpack.c.bf16 %v368_v35, %v368_v35  ;;  %2140 = vmatprep.subr.bf16.mxu0 %v2396_v7 }
 0x2a0   :  { %2125 = vmatmul.mubr.msk.bf16.vlgmr.msra.gmra.mrb[8].mxu1 %vm377_vm5, %v372_v37 }
 0x2a1   :  { %2135 = vmatpush3.bf16.msra.mxu1 %v527_v38  ;;  %2136 = vmatprep.mubr.msk.bf16.mxu1 %vm2397_vm0, %v2396_v7 }
 0x2a2   :  { %2146 = vmatprep.subr.bf16.mxu1 %v2396_v7 }
 0x2c5   :  { %v359_v39 = vpop.xlane.xlu1 %358  ;;  %v362_v40 = vpop.xlane.xlu0 %361 }
 0x2c6   :  { %2343 = vrcp.f32 %v359_v39 }
 0x2c7   :  { %2345 = vrcp.f32 %v362_v40 }
 0x2c9   :  { %v572_v41 = vpop.permute.xlu0 %571  ;;  %v622_v42 = vpop.permute.xlu1 %621 }
 0x2ca   :  { %v577_v48 = vsel %vm80_vm1, %v572_v41, 0  ;;  %v627_v51 = vsel %vm80_vm1, %v622_v42, 0 }
 0x2cd   :  { %v570_v47 = vpop.permute.xlu0 %569  ;;  %v620_v50 = vpop.permute.xlu1 %619 }
 0x2d0   :  { %v2344_v43 = vpop.eup %2343 }
 0x2d1   :  { %v2346_v44 = vpop.eup %2345  ;;  %v369_v45 = vmul.f32 %v2344_v43, %v2336_v16  ;;  %v672_v53 = vpop.permute.xlu0 %671 }
 0x2d2   :  { %v370_v46 = vmul.f32 %v2346_v44, %v2338_v17  ;;  %v722_v54 = vpop.permute.xlu1 %721  ;;  %v677_v55 = vsel %vm80_vm1, %v672_v53, 0 }
 0x2d3   :  { %v373_v49 = vpack.c.bf16 %v369_v45, %v369_v45  ;;  %v727_v56 = vsel %vm80_vm1, %v722_v54, 0 }
 0x2d4   :  { %v374_v52 = vpack.c.bf16 %v370_v46, %v370_v46 }
 0x2d5   :  { %2131 = vmatmul.mubr.msk.bf16.vlgmr.msra.gmra.mrb[12].mxu0 %vm377_vm5, %v373_v49  ;;  %v670_v57 = vpop.permute.xlu0 %669 }
 0x2d6   :  { %2137 = vmatmul.mubr.msk.bf16.vlgmr.msra.gmra.mrb[12].mxu1 %vm377_vm5, %v374_v52  ;;  %2141 = vmatpush3.bf16.xpose.msra.mxu0 %v577_v48  ;;  %v720_v58 = vpop.permute.xlu1 %719 }
 0x2d7   :  { %2147 = vmatpush3.bf16.xpose.msra.mxu1 %v627_v51  ;;  %2142 = vmatprep.mubr.msk.bf16.mxu0 %vm2397_vm0, %v2396_v7 }
 0x2d8   :  { %2148 = vmatprep.mubr.msk.bf16.mxu1 %vm2397_vm0, %v2396_v7  ;;  %2152 = vmatprep.subr.bf16.mxu0 %v2396_v7 }
 0x2d9   :  { %2158 = vmatprep.subr.bf16.mxu1 %v2396_v7 }
 0x2dd   :  { %2143 = vmatmul.mubr.msk.bf16.vlgmr.msra.gmra.mrb[16].mxu0 %vm80_vm1, %v570_v47 }
 0x2de   :  { %2149 = vmatmul.mubr.msk.bf16.vlgmr.msra.gmra.mrb[16].mxu1 %vm80_vm1, %v620_v50  ;;  %2153 = vmatpush3.bf16.xpose.msra.mxu0 %v677_v55 }
 0x2df   :  { %2159 = vmatpush3.bf16.xpose.msra.mxu1 %v727_v56  ;;  %2154 = vmatprep.mubr.msk.bf16.mxu0 %vm2397_vm0, %v2396_v7 }
 0x2e0   :  { %2160 = vmatprep.mubr.msk.bf16.mxu1 %vm2397_vm0, %v2396_v7  ;;  %2164 = vmatprep.subr.bf16.mxu0 %v2396_v7 }
 0x2e1   :  { %2170 = vmatprep.subr.bf16.mxu1 %v2396_v7 }
 0x2e5   :  { %2155 = vmatmul.mubr.msk.bf16.vlgmr.msra.gmra.mrb[20].mxu0 %vm80_vm1, %v670_v57 }
 0x2e6   :  { %2161 = vmatmul.mubr.msk.bf16.vlgmr.msra.gmra.mrb[20].mxu1 %vm80_vm1, %v720_v58  ;;  %2166 = vmatprep.mubr.msk.bf16.mxu0 %vm2397_vm0, %v2396_v7 }
 0x2e7   :  { %2172 = vmatprep.mubr.msk.bf16.mxu1 %vm2397_vm0, %v2396_v7 }
 0x36f   :  { %v2544_v59 = vpop.f32.mrb[8].mxu0 }
 0x370   :  { %v2120_v60 = vpop.f32.mrb[9].mxu0 }
 0x371   :  { %v422_v61 = vpop.f32.mrb[10].mxu0 }
 0x372   :  { %v2121_v62 = vpop.f32.mrb[11].mxu0 }
 0x373   :  { %v2546_v63 = vpop.f32.mrb[8].mxu1 }
 0x374   :  { %v2126_v0 = vpop.f32.mrb[9].mxu1 }
 0x375   :  { %v470_v1 = vpop.f32.mrb[10].mxu1 }
 0x376   :  { %v2127_v2 = vpop.f32.mrb[11].mxu1 }
 0x3a8   :  { %v2548_v3 = vpop.f32.mrb[12].mxu0 }
 0x3a9   :  { %v2550_v4 = vpop.f32.mrb[12].mxu1  ;;  %v2132_v5 = vpop.f32.mrb[13].mxu0 }
 0x3aa   :  { %v2138_v6 = vpop.f32.mrb[13].mxu1  ;;  %v518_v8 = vpop.f32.mrb[14].mxu0 }
 0x3ab   :  { %v566_v9 = vpop.f32.mrb[14].mxu1  ;;  %v2133_v10 = vpop.f32.mrb[15].mxu0 }
 0x3ac   :  { %v2139_v11 = vpop.f32.mrb[15].mxu1 }
 0x3b0   :  { %v613_v12 = vpop.f32.mrb[16].mxu0 }
 0x3b1   :  { %v769_v13 = vmul.f32 0.35355338, %v613_v12  ;;  %v663_v14 = vpop.f32.mrb[16].mxu1  ;;  %v2144_v15 = vpop.f32.mrb[17].mxu0 }
 0x3b2   :  { %v770_v16 = vmul.f32 0.35355338, %v663_v14  ;;  %v616_v17 = vpop.f32.mrb[18].mxu0  ;;  %v2150_v18 = vpop.f32.mrb[17].mxu1 }
 0x3b3   :  { %v2145_v23 = vpop.f32.mrb[19].mxu0  ;;  %v773_v24 = vsel %vm2472_vm2, %v769_v13, -1e+30  ;;  %v666_v25 = vpop.f32.mrb[18].mxu1 }
 0x3b4   :  { %v774_v26 = vsel %vm2472_vm2, %v770_v16, -1e+30  ;;  %v777_v27 = vsel %vm326_vm3, %v773_v24, -inf  ;;  %v2151_v28 = vpop.f32.mrb[19].mxu1 }
 0x3b5   :  { %v780_v29 = vsel %vm326_vm3, %v774_v26, -inf  ;;  %778 = vmax.xlane.f32.xlu0 %v777_v27 }
 0x3b6   :  { %781 = vmax.xlane.f32.xlu1 %v780_v29 }
 0x3b8   :  { %v713_v30 = vpop.f32.mrb[20].mxu0 }
 0x3b9   :  { %v771_v31 = vmul.f32 0.35355338, %v713_v30  ;;  %v763_v32 = vpop.f32.mrb[20].mxu1  ;;  %v2156_v34 = vpop.f32.mrb[21].mxu0 }
 0x3ba   :  { %v772_v35 = vmul.f32 0.35355338, %v763_v32  ;;  %v716_v36 = vpop.f32.mrb[22].mxu0  ;;  %v2162_v37 = vpop.f32.mrb[21].mxu1 }
 0x3bb   :  { %v775_v38 = vsel %vm2472_vm2, %v771_v31, -1e+30  ;;  %v2157_v39 = vpop.f32.mrb[23].mxu0  ;;  %v766_v40 = vpop.f32.mrb[22].mxu1 }
 0x3bc   :  { %v783_v41 = vsel %vm326_vm3, %v775_v38, -inf  ;;  %v776_v42 = vsel %vm2472_vm2, %v772_v35, -1e+30  ;;  %v2163_v43 = vpop.f32.mrb[23].mxu1 }
 0x3bd   :  { %784 = vmax.xlane.f32.xlu0 %v783_v41  ;;  %v786_v44 = vsel %vm326_vm3, %v776_v42, -inf }
 0x3c1   :  { %787 = vmax.xlane.f32.xlu0 %v786_v44 }
 0x3c7   :  { %825 = vrot.lane.b32.xlu1 %v2440_v19, %s2402_s17 }
 0x442   :  { %v779_v45 = vpop.xlane.xlu0 %778 }
 0x443   :  { %v782_v46 = vpop.xlane.xlu1 %781  ;;  %v789_v47 = vsub.f32 %v773_v24, %v779_v45 }
 0x444   :  { %v790_v48 = vsub.f32 %v774_v26, %v782_v46 }
 0x445   :  { %v793_v49 = vmul.f32 1.442695, %v789_v47 }
 0x446   :  { %v795_v50 = vmul.f32 1.442695, %v790_v48 }
 0x447   :  { %2347 = vpow2.f32 %v793_v49  ;;  %v826_v51 = vpop.permute.xlu1 %825 }
 0x448   :  { %2349 = vpow2.f32 %v795_v50  ;;  %v831_v52 = vsel %vm381_vm4, %v826_v51, 0 }
 0x449   :  { %2165 = vmatpush3.bf16.msra.mxu0 %v831_v52 }
 0x44a   :  { %2176 = vmatprep.subr.bf16.mxu0 %v2396_v7  ;;  %v785_v57 = vpop.xlane.xlu0 %784 }
 0x44b   :  { %v791_v61 = vsub.f32 %v775_v38, %v785_v57 }
 0x44d   :  { %v797_v0 = vmul.f32 1.442695, %v791_v61 }
 0x44e   :  { %v788_v58 = vpop.xlane.xlu0 %787 }
 0x44f   :  { %v792_v60 = vsub.f32 %v776_v42, %v788_v58 }
 0x451   :  { %v2348_v53 = vpop.eup %2347  ;;  %v799_v62 = vmul.f32 1.442695, %v792_v60 }
 0x452   :  { %v2350_v54 = vpop.eup %2349  ;;  %v801_v55 = vsel %vm326_vm3, %v2348_v53, 0.0 }
 0x453   :  { %v804_v56 = vsel %vm326_vm3, %v2350_v54, 0.0  ;;  %802 = vadd.xlane.f32.xlu1 %v801_v55  ;;  %2351 = vpow2.f32 %v799_v62 }
 0x454   :  { %805 = vadd.xlane.f32.xlu0 %v804_v56  ;;  %2353 = vpow2.f32 %v797_v0 }
 0x45d   :  { %v2352_v1 = vpop.eup %2351 }
 0x45e   :  { %v2354_v2 = vpop.eup %2353  ;;  %v810_v5 = vsel %vm326_vm3, %v2352_v1, 0.0 }
 0x45f   :  { %v807_v6 = vsel %vm326_vm3, %v2354_v2, 0.0 }
 0x464   :  { %921 = vrot.lane.b32.xlu1 %v2442_v20, %s2402_s17 }
 0x468   :  { %969 = vrot.lane.b32.xlu1 %v2448_v22, %s2402_s17 }
 0x46a   :  { %873 = vrot.lane.b32.xlu0 %v2445_v21, %s2402_s17 }
 0x489   :  { %811 = vadd.xlane.f32.xlu0 %v810_v5 }
 0x48c   :  { %808 = vadd.xlane.f32.xlu1 %v807_v6 }
 0x49d   :  { %1069 = vrot.lane.b32.xlu1 %v2445_v21, %s2403_s18 }
 0x49f   :  { %1019 = vrot.lane.b32.xlu0 %v2440_v19, %s2403_s18 }
 0x4a1   :  { %1067 = vrot.lane.b32.xlu1 %v2445_v21, %s2404_s19 }
 0x4a3   :  { %1017 = vrot.lane.b32.xlu0 %v2440_v19, %s2404_s19 }
 0x4a5   :  { %1169 = vrot.lane.b32.xlu1 %v2448_v22, %s2403_s18 }
 0x4a7   :  { %1119 = vrot.lane.b32.xlu0 %v2442_v20, %s2403_s18 }
 0x4a9   :  { %1167 = vrot.lane.b32.xlu1 %v2448_v22, %s2404_s19 }
 0x4ab   :  { %1117 = vrot.lane.b32.xlu0 %v2442_v20, %s2404_s19 }
 0x4e0   :  { %v803_v8 = vpop.xlane.xlu1 %802 }
 0x4e1   :  { %2355 = vrcp.f32 %v803_v8  ;;  %v806_v9 = vpop.xlane.xlu0 %805 }
 0x4e2   :  { %2357 = vrcp.f32 %v806_v9 }
 0x4e4   :  { %v922_v12 = vpop.permute.xlu1 %921 }
 0x4e5   :  { %v874_v10 = vpop.permute.xlu0 %873  ;;  %v927_v24 = vsel %vm381_vm4, %v922_v12, 0 }
 0x4e6   :  { %v879_v11 = vsel %vm381_vm4, %v874_v10, 0 }
 0x4e7   :  { %2171 = vmatpush3.bf16.msra.mxu1 %v879_v11 }
 0x4e8   :  { %2182 = vmatprep.subr.bf16.mxu1 %v2396_v7  ;;  %v970_v17 = vpop.permute.xlu1 %969 }
 0x4e9   :  { %v975_v25 = vsel %vm381_vm4, %v970_v17, 0 }
 0x4eb   :  { %v2356_v13 = vpop.eup %2355 }
 0x4ec   :  { %v2358_v14 = vpop.eup %2357  ;;  %v817_v15 = vmul.f32 %v2356_v13, %v2348_v53 }
 0x4ed   :  { %v818_v16 = vmul.f32 %v2358_v14, %v2350_v54 }
 0x4ee   :  { %v821_v18 = vpack.c.bf16 %v817_v15, %v817_v15 }
 0x4ef   :  { %v822_v23 = vpack.c.bf16 %v818_v16, %v818_v16 }
 0x4f0   :  { %2167 = vmatmul.mubr.msk.bf16.vlgmr.msra.gmra.mrb[24].mxu0 %vm377_vm5, %v821_v18 }
 0x4f1   :  { %2173 = vmatmul.mubr.msk.bf16.vlgmr.msra.gmra.mrb[24].mxu1 %vm377_vm5, %v822_v23  ;;  %2177 = vmatpush3.bf16.msra.mxu0 %v927_v24 }
 0x4f2   :  { %2183 = vmatpush3.bf16.msra.mxu1 %v975_v25  ;;  %2184 = vmatprep.mubr.msk.bf16.mxu1 %vm2397_vm0, %v2396_v7 }
 0x4f3   :  { %2194 = vmatprep.subr.bf16.mxu1 %v2396_v7  ;;  %2178 = vmatprep.mubr.msk.bf16.mxu0 %vm2397_vm0, %v2396_v7 }
 0x4f4   :  { %2188 = vmatprep.subr.bf16.mxu0 %v2396_v7 }
 0x516   :  { %v812_v26 = vpop.xlane.xlu0 %811 }
 0x517   :  { %2359 = vrcp.f32 %v812_v26 }
 0x519   :  { %v809_v27 = vpop.xlane.xlu1 %808 }
 0x51a   :  { %2361 = vrcp.f32 %v809_v27  ;;  %v1020_v28 = vpop.permute.xlu0 %1019 }
 0x51b   :  { %v1025_v39 = vsel %vm80_vm1, %v1020_v28, 0 }
 0x51d   :  { %v1070_v30 = vpop.permute.xlu1 %1069 }
 0x51e   :  { %v1075_v34 = vsel %vm80_vm1, %v1070_v30, 0  ;;  %v1018_v38 = vpop.permute.xlu0 %1017 }
 0x521   :  { %v2360_v29 = vpop.eup %2359  ;;  %v1068_v37 = vpop.permute.xlu1 %1067 }
 0x522   :  { %v820_v31 = vmul.f32 %v2360_v29, %v2352_v1  ;;  %v1120_v42 = vpop.permute.xlu0 %1119 }
 0x523   :  { %v1125_v44 = vsel %vm80_vm1, %v1120_v42, 0 }
 0x524   :  { %v2362_v32 = vpop.eup %2361  ;;  %v824_v35 = vpack.c.bf16 %v820_v31, %v820_v31 }
 0x525   :  { %v819_v36 = vmul.f32 %v2362_v32, %v2354_v2  ;;  %v1170_v41 = vpop.permute.xlu1 %1169 }
 0x526   :  { %2185 = vmatmul.mubr.msk.bf16.vlgmr.msra.gmra.mrb[28].mxu1 %vm377_vm5, %v824_v35  ;;  %v1175_v43 = vsel %vm80_vm1, %v1170_v41, 0  ;;  %v1118_v46 = vpop.permute.xlu0 %1117 }
 0x527   :  { %2195 = vmatpush3.bf16.xpose.msra.mxu1 %v1075_v34  ;;  %v823_v40 = vpack.c.bf16 %v819_v36, %v819_v36  ;;  %2196 = vmatprep.mubr.msk.bf16.mxu1 %vm2397_vm0, %v2396_v7 }
 0x528   :  { %2206 = vmatprep.subr.bf16.mxu1 %v2396_v7 }
 0x529   :  { %2179 = vmatmul.mubr.msk.bf16.vlgmr.msra.gmra.mrb[28].mxu0 %vm377_vm5, %v823_v40  ;;  %v1168_v45 = vpop.permute.xlu1 %1167 }
 0x52a   :  { %2189 = vmatpush3.bf16.xpose.msra.mxu0 %v1025_v39  ;;  %2190 = vmatprep.mubr.msk.bf16.mxu0 %vm2397_vm0, %v2396_v7 }
 0x52b   :  { %2200 = vmatprep.subr.bf16.mxu0 %v2396_v7 }
 0x52e   :  { %2197 = vmatmul.mubr.msk.bf16.vlgmr.msra.gmra.mrb[32].mxu1 %vm80_vm1, %v1068_v37 }
 0x52f   :  { %2207 = vmatpush3.bf16.xpose.msra.mxu1 %v1175_v43  ;;  %2208 = vmatprep.mubr.msk.bf16.mxu1 %vm2397_vm0, %v2396_v7 }
 0x530   :  { %2218 = vmatprep.subr.bf16.mxu1 %v2396_v7 }
 0x531   :  { %2191 = vmatmul.mubr.msk.bf16.vlgmr.msra.gmra.mrb[32].mxu0 %vm80_vm1, %v1018_v38 }
 0x532   :  { %2201 = vmatpush3.bf16.xpose.msra.mxu0 %v1125_v44  ;;  %2202 = vmatprep.mubr.msk.bf16.mxu0 %vm2397_vm0, %v2396_v7 }
 0x533   :  { %2212 = vmatprep.subr.bf16.mxu0 %v2396_v7 }
 0x536   :  { %2209 = vmatmul.mubr.msk.bf16.vlgmr.msra.gmra.mrb[36].mxu1 %vm80_vm1, %v1168_v45 }
 0x537   :  { %2220 = vmatprep.mubr.msk.bf16.mxu1 %vm2397_vm0, %v2396_v7 }
 0x539   :  { %2203 = vmatmul.mubr.msk.bf16.vlgmr.msra.gmra.mrb[36].mxu0 %vm80_vm1, %v1118_v46 }
 0x53a   :  { %2214 = vmatprep.mubr.msk.bf16.mxu0 %vm2397_vm0, %v2396_v7 }
 0x5c3   :  { %v2620_v47 = vpop.f32.mrb[24].mxu0 }
 0x5c4   :  { %v2622_v48 = vpop.f32.mrb[24].mxu1  ;;  %v2168_v49 = vpop.f32.mrb[25].mxu0 }
 0x5c5   :  { %v2301_v50 = vpack.i.bf16 %v2622_v48, %v2620_v47  ;;  %v2174_v51 = vpop.f32.mrb[25].mxu1  ;;  %v870_v52 = vpop.f32.mrb[26].mxu0 }
 0x5c6   :  { %v918_v53 = vpop.f32.mrb[26].mxu1  ;;  %v2169_v54 = vpop.f32.mrb[27].mxu0 }
 0x5c7   :  { %v2175_v55 = vpop.f32.mrb[27].mxu1 }
 0x5f9   :  { %v2626_v56 = vpop.f32.mrb[28].mxu1 }
 0x5fa   :  { %v2186_v57 = vpop.f32.mrb[29].mxu1 }
 0x5fb   :  { %v1014_v58 = vpop.f32.mrb[30].mxu1 }
 0x5fc   :  { %v2187_v60 = vpop.f32.mrb[31].mxu1  ;;  %v2628_v61 = vpop.f32.mrb[28].mxu0 }
 0x5fd   :  { %v2306_v62 = vpack.i.bf16 %v2626_v56, %v2628_v61  ;;  %v2180_v0 = vpop.f32.mrb[29].mxu0 }
 0x5fe   :  { %v966_v1 = vpop.f32.mrb[30].mxu0 }
 0x5ff   :  { %v2181_v2 = vpop.f32.mrb[31].mxu0 }
 0x601   :  { %v1111_v5 = vpop.f32.mrb[32].mxu1 }
 0x602   :  { %v1218_v6 = vmul.f32 0.35355338, %v1111_v5  ;;  %v2198_v8 = vpop.f32.mrb[33].mxu1 }
 0x603   :  { %v1114_v9 = vpop.f32.mrb[34].mxu1 }
 0x604   :  { %v1061_v10 = vpop.f32.mrb[32].mxu0  ;;  %v1222_v11 = vsel %vm2472_vm2, %v1218_v6, -1e+30  ;;  %v2199_v12 = vpop.f32.mrb[35].mxu1 }
 0x605   :  { %v1217_v13 = vmul.f32 0.35355338, %v1061_v10  ;;  %v1228_v14 = vsel %vm326_vm3, %v1222_v11, -inf  ;;  %v2192_v15 = vpop.f32.mrb[33].mxu0 }
 0x606   :  { %1229 = vmax.xlane.f32.xlu1 %v1228_v14  ;;  %v1064_v16 = vpop.f32.mrb[34].mxu0 }
 0x607   :  { %v2193_v17 = vpop.f32.mrb[35].mxu0  ;;  %v1221_v18 = vsel %vm2472_vm2, %v1217_v13, -1e+30 }
 0x608   :  { %v1225_v23 = vsel %vm326_vm3, %v1221_v18, -inf }
 0x609   :  { %1226 = vmax.xlane.f32.xlu0 %v1225_v23  ;;  %v1211_v24 = vpop.f32.mrb[36].mxu1 }
 0x60a   :  { %v2210_v25 = vpop.f32.mrb[37].mxu1  ;;  %v1220_v26 = vmul.f32 0.35355338, %v1211_v24 }
 0x60b   :  { %v1214_v27 = vpop.f32.mrb[38].mxu1 }
 0x60c   :  { %v1161_v28 = vpop.f32.mrb[36].mxu0  ;;  %v2211_v29 = vpop.f32.mrb[39].mxu1  ;;  %v1224_v35 = vsel %vm2472_vm2, %v1220_v26, -1e+30 }
 0x60d   :  { %v1219_v30 = vmul.f32 0.35355338, %v1161_v28  ;;  %v2204_v31 = vpop.f32.mrb[37].mxu0  ;;  %v1234_v38 = vsel %vm326_vm3, %v1224_v35, -inf }
 0x60e   :  { %v1164_v32 = vpop.f32.mrb[38].mxu0 }
 0x60f   :  { %v1223_v34 = vsel %vm2472_vm2, %v1219_v30, -1e+30  ;;  %v2205_v36 = vpop.f32.mrb[39].mxu0 }
 0x610   :  { %v1231_v37 = vsel %vm326_vm3, %v1223_v34, -inf }
 0x611   :  { %1232 = vmax.xlane.f32.xlu0 %v1231_v37 }
 0x615   :  { %1235 = vmax.xlane.f32.xlu0 %v1234_v38 }
 0x617   :  { %1273 = vrot.lane.b32.xlu1 %v2440_v19, %s2405_s20 }
 0x693   :  { %v1230_v39 = vpop.xlane.xlu1 %1229 }
 0x694   :  { %v1238_v40 = vsub.f32 %v1222_v11, %v1230_v39 }
 0x696   :  { %v1243_v41 = vmul.f32 1.442695, %v1238_v40  ;;  %v1227_v42 = vpop.xlane.xlu0 %1226 }
 0x697   :  { %v1237_v43 = vsub.f32 %v1221_v18, %v1227_v42  ;;  %v1274_v44 = vpop.permute.xlu1 %1273 }
 0x698   :  { %2363 = vpow2.f32 %v1243_v41  ;;  %v1279_v45 = vsel %vm381_vm4, %v1274_v44, 0 }
 0x699   :  { %v1241_v46 = vmul.f32 1.442695, %v1237_v43  ;;  %2213 = vmatpush3.bf16.msra.mxu0 %v1279_v45 }
 0x69a   :  { %2224 = vmatprep.subr.bf16.mxu0 %v2396_v7 }
 0x69b   :  { %2365 = vpow2.f32 %v1241_v46 }
 0x69e   :  { %v1233_v54 = vpop.xlane.xlu0 %1232 }
 0x69f   :  { %v1239_v60 = vsub.f32 %v1223_v34, %v1233_v54 }
 0x6a1   :  { %v1245_v0 = vmul.f32 1.442695, %v1239_v60 }
 0x6a2   :  { %v2364_v49 = vpop.eup %2363  ;;  %v1236_v55 = vpop.xlane.xlu0 %1235 }
 0x6a3   :  { %v1252_v51 = vsel %vm326_vm3, %v2364_v49, 0.0  ;;  %v1240_v57 = vsub.f32 %v1224_v35, %v1236_v55 }
 0x6a4   :  { %1253 = vadd.xlane.f32.xlu0 %v1252_v51 }
 0x6a5   :  { %v2366_v52 = vpop.eup %2365  ;;  %v1247_v58 = vmul.f32 1.442695, %v1240_v57 }
 0x6a6   :  { %v1249_v53 = vsel %vm326_vm3, %v2366_v52, 0.0 }
 0x6a7   :  { %1250 = vadd.xlane.f32.xlu1 %v1249_v53  ;;  %2367 = vpow2.f32 %v1247_v58 }
 0x6a8   :  { %2369 = vpow2.f32 %v1245_v0 }
 0x6b1   :  { %v2368_v1 = vpop.eup %2367 }
 0x6b2   :  { %v1258_v2 = vsel %vm326_vm3, %v2368_v1, 0.0  ;;  %v2370_v5 = vpop.eup %2369 }
 0x6b3   :  { %v1255_v6 = vsel %vm326_vm3, %v2370_v5, 0.0 }
 0x6b8   :  { %1369 = vrot.lane.b32.xlu1 %v2442_v20, %s2405_s20 }
 0x6ba   :  { %1321 = vrot.lane.b32.xlu0 %v2445_v21, %s2405_s20 }
 0x6bc   :  { %1417 = vrot.lane.b32.xlu1 %v2448_v22, %s2405_s20 }
 0x6d9   :  { %1259 = vadd.xlane.f32.xlu0 %v1258_v2 }
 0x6e0   :  { %1256 = vadd.xlane.f32.xlu1 %v1255_v6 }
 0x6ef   :  { %1467 = vrot.lane.b32.xlu0 %v2440_v19, %s2406_s21 }
 0x6f1   :  { %1517 = vrot.lane.b32.xlu1 %v2445_v21, %s2406_s21 }
 0x6f3   :  { %1465 = vrot.lane.b32.xlu0 %v2440_v19, %s2407_s22 }
 0x6f5   :  { %1515 = vrot.lane.b32.xlu1 %v2445_v21, %s2407_s22 }
 0x6f7   :  { %1567 = vrot.lane.b32.xlu0 %v2442_v20, %s2406_s21 }
 0x6f9   :  { %1617 = vrot.lane.b32.xlu1 %v2448_v22, %s2406_s21 }
 0x6fb   :  { %1565 = vrot.lane.b32.xlu0 %v2442_v20, %s2407_s22 }
 0x6fd   :  { %1615 = vrot.lane.b32.xlu1 %v2448_v22, %s2407_s22 }
 0x731   :  { %v1254_v8 = vpop.xlane.xlu0 %1253 }
 0x732   :  { %2371 = vrcp.f32 %v1254_v8 }
 0x734   :  { %v1251_v9 = vpop.xlane.xlu1 %1250 }
 0x735   :  { %2373 = vrcp.f32 %v1251_v9  ;;  %v1322_v10 = vpop.permute.xlu0 %1321 }
 0x736   :  { %v1327_v11 = vsel %vm381_vm4, %v1322_v10, 0 }
 0x737   :  { %2219 = vmatpush3.bf16.msra.mxu1 %v1327_v11 }
 0x738   :  { %v1370_v12 = vpop.permute.xlu1 %1369  ;;  %2230 = vmatprep.subr.bf16.mxu1 %v2396_v7 }
 0x739   :  { %v1375_v25 = vsel %vm381_vm4, %v1370_v12, 0 }
 0x73c   :  { %v2372_v13 = vpop.eup %2371  ;;  %v1418_v15 = vpop.permute.xlu1 %1417 }
 0x73d   :  { %v1266_v14 = vmul.f32 %v2372_v13, %v2364_v49  ;;  %v1423_v23 = vsel %vm381_vm4, %v1418_v15, 0 }
 0x73f   :  { %v2374_v16 = vpop.eup %2373  ;;  %v1270_v17 = vpack.c.bf16 %v1266_v14, %v1266_v14 }
 0x740   :  { %v1265_v18 = vmul.f32 %v2374_v16, %v2366_v52 }
 0x741   :  { %2221 = vmatmul.mubr.msk.bf16.vlgmr.msra.gmra.mrb[40].mxu1 %vm377_vm5, %v1270_v17 }
 0x742   :  { %2231 = vmatpush3.bf16.msra.mxu1 %v1423_v23  ;;  %v1269_v24 = vpack.c.bf16 %v1265_v18, %v1265_v18  ;;  %2232 = vmatprep.mubr.msk.bf16.mxu1 %vm2397_vm0, %v2396_v7 }
 0x743   :  { %2242 = vmatprep.subr.bf16.mxu1 %v2396_v7 }
 0x744   :  { %2215 = vmatmul.mubr.msk.bf16.vlgmr.msra.gmra.mrb[40].mxu0 %vm377_vm5, %v1269_v24 }
 0x745   :  { %2225 = vmatpush3.bf16.msra.mxu0 %v1375_v25  ;;  %2226 = vmatprep.mubr.msk.bf16.mxu0 %vm2397_vm0, %v2396_v7 }
 0x746   :  { %2236 = vmatprep.subr.bf16.mxu0 %v2396_v7 }
 0x766   :  { %v1260_v26 = vpop.xlane.xlu0 %1259 }
 0x767   :  { %2375 = vrcp.f32 %v1260_v26 }
 0x76a   :  { %v1468_v34 = vpop.permute.xlu0 %1467 }
 0x76b   :  { %v1473_v40 = vsel %vm80_vm1, %v1468_v34, 0 }
 0x76d   :  { %v1257_v27 = vpop.xlane.xlu1 %1256 }
 0x76e   :  { %2377 = vrcp.f32 %v1257_v27  ;;  %v1466_v38 = vpop.permute.xlu0 %1465 }
 0x771   :  { %v2376_v28 = vpop.eup %2375  ;;  %v1518_v29 = vpop.permute.xlu1 %1517 }
 0x772   :  { %v1268_v30 = vmul.f32 %v2376_v28, %v2368_v1  ;;  %v1523_v31 = vsel %vm80_vm1, %v1518_v29, 0  ;;  %v1568_v43 = vpop.permute.xlu0 %1567 }
 0x773   :  { %v1573_v44 = vsel %vm80_vm1, %v1568_v43, 0 }
 0x774   :  { %v1272_v32 = vpack.c.bf16 %v1268_v30, %v1268_v30 }
 0x775   :  { %v1516_v35 = vpop.permute.xlu1 %1515 }
 0x776   :  { %2233 = vmatmul.mubr.msk.bf16.vlgmr.msra.gmra.mrb[44].mxu1 %vm377_vm5, %v1272_v32  ;;  %v1566_v46 = vpop.permute.xlu0 %1565 }
 0x777   :  { %2243 = vmatpush3.bf16.xpose.msra.mxu1 %v1523_v31  ;;  %2244 = vmatprep.mubr.msk.bf16.mxu1 %vm2397_vm0, %v2396_v7 }
 0x778   :  { %v2378_v36 = vpop.eup %2377  ;;  %2254 = vmatprep.subr.bf16.mxu1 %v2396_v7 }
 0x779   :  { %v1267_v37 = vmul.f32 %v2378_v36, %v2370_v5  ;;  %v1618_v39 = vpop.permute.xlu1 %1617 }
 0x77a   :  { %v1623_v42 = vsel %vm80_vm1, %v1618_v39, 0 }
 0x77b   :  { %v1271_v41 = vpack.c.bf16 %v1267_v37, %v1267_v37 }
 0x77d   :  { %2227 = vmatmul.mubr.msk.bf16.vlgmr.msra.gmra.mrb[44].mxu0 %vm377_vm5, %v1271_v41  ;;  %v1616_v45 = vpop.permute.xlu1 %1615 }
 0x77e   :  { %2245 = vmatmul.mubr.msk.bf16.vlgmr.msra.gmra.mrb[48].mxu1 %vm80_vm1, %v1516_v35  ;;  %2237 = vmatpush3.bf16.xpose.msra.mxu0 %v1473_v40 }
 0x77f   :  { %2238 = vmatprep.mubr.msk.bf16.mxu0 %vm2397_vm0, %v2396_v7  ;;  %2248 = vmatprep.subr.bf16.mxu0 %v2396_v7 }
 0x780   :  { %2255 = vmatpush3.bf16.xpose.msra.mxu1 %v1623_v42  ;;  %2256 = vmatprep.mubr.msk.bf16.mxu1 %vm2397_vm0, %v2396_v7 }
 0x781   :  { %2266 = vmatprep.subr.bf16.mxu1 %v2396_v7 }
 0x785   :  { %2239 = vmatmul.mubr.msk.bf16.vlgmr.msra.gmra.mrb[48].mxu0 %vm80_vm1, %v1466_v38 }
 0x786   :  { %2249 = vmatpush3.bf16.xpose.msra.mxu0 %v1573_v44  ;;  %2250 = vmatprep.mubr.msk.bf16.mxu0 %vm2397_vm0, %v2396_v7 }
 0x787   :  { %2257 = vmatmul.mubr.msk.bf16.vlgmr.msra.gmra.mrb[52].mxu1 %vm80_vm1, %v1616_v45  ;;  %2260 = vmatprep.subr.bf16.mxu0 %v2396_v7 }
 0x788   :  { %2268 = vmatprep.mubr.msk.bf16.mxu1 %vm2397_vm0, %v2396_v7 }
 0x78d   :  { %2251 = vmatmul.mubr.msk.bf16.vlgmr.msra.gmra.mrb[52].mxu0 %vm80_vm1, %v1566_v46 }
 0x78e   :  { %2262 = vmatprep.mubr.msk.bf16.mxu0 %vm2397_vm0, %v2396_v7 }
 0x814   :  { %v2700_v49 = vpop.f32.mrb[40].mxu1 }
 0x815   :  { %v2222_v51 = vpop.f32.mrb[41].mxu1 }
 0x816   :  { %v1366_v52 = vpop.f32.mrb[42].mxu1 }
 0x817   :  { %v2223_v53 = vpop.f32.mrb[43].mxu1  ;;  %v2702_v54 = vpop.f32.mrb[40].mxu0 }
 0x818   :  { %v2311_v55 = vpack.i.bf16 %v2700_v49, %v2702_v54  ;;  %v2216_v57 = vpop.f32.mrb[41].mxu0 }
 0x819   :  { %v1318_v58 = vpop.f32.mrb[42].mxu0 }
 0x81a   :  { %v2217_v60 = vpop.f32.mrb[43].mxu0 }
 0x849   :  { %v2706_v0 = vpop.f32.mrb[44].mxu1 }
 0x84a   :  { %v2234_v1 = vpop.f32.mrb[45].mxu1 }
 0x84b   :  { %v1462_v2 = vpop.f32.mrb[46].mxu1 }
 0x84c   :  { %v2235_v5 = vpop.f32.mrb[47].mxu1 }
 0x850   :  { %v2708_v6 = vpop.f32.mrb[44].mxu0 }
 0x851   :  { %v2316_v8 = vpack.i.bf16 %v2706_v0, %v2708_v6  ;;  %v1559_v9 = vpop.f32.mrb[48].mxu1  ;;  %v2228_v10 = vpop.f32.mrb[45].mxu0 }
 0x852   :  { %v1666_v11 = vmul.f32 0.35355338, %v1559_v9  ;;  %v1414_v12 = vpop.f32.mrb[46].mxu0  ;;  %v2246_v13 = vpop.f32.mrb[49].mxu1 }
 0x853   :  { %v2229_v14 = vpop.f32.mrb[47].mxu0  ;;  %v1562_v15 = vpop.f32.mrb[50].mxu1 }
 0x854   :  { %v1670_v16 = vsel %vm2472_vm2, %v1666_v11, -1e+30  ;;  %v2247_v17 = vpop.f32.mrb[51].mxu1 }
 0x855   :  { %v1676_v18 = vsel %vm326_vm3, %v1670_v16, -inf }
 0x856   :  { %1677 = vmax.xlane.f32.xlu1 %v1676_v18 }
 0x858   :  { %v1509_v23 = vpop.f32.mrb[48].mxu0 }
 0x859   :  { %v1665_v24 = vmul.f32 0.35355338, %v1509_v23  ;;  %v2240_v25 = vpop.f32.mrb[49].mxu0 }
 0x85a   :  { %v1512_v26 = vpop.f32.mrb[50].mxu0  ;;  %v1659_v27 = vpop.f32.mrb[52].mxu1 }
 0x85b   :  { %v2241_v28 = vpop.f32.mrb[51].mxu0  ;;  %v1669_v29 = vsel %vm2472_vm2, %v1665_v24, -1e+30  ;;  %v2258_v30 = vpop.f32.mrb[53].mxu1  ;;  %v1668_v35 = vmul.f32 0.35355338, %v1659_v27 }
 0x85c   :  { %v1673_v31 = vsel %vm326_vm3, %v1669_v29, -inf  ;;  %v1662_v32 = vpop.f32.mrb[54].mxu1 }
 0x85d   :  { %1674 = vmax.xlane.f32.xlu0 %v1673_v31  ;;  %v2259_v34 = vpop.f32.mrb[55].mxu1  ;;  %v1672_v42 = vsel %vm2472_vm2, %v1668_v35, -1e+30 }
 0x85e   :  { %v1682_v44 = vsel %vm326_vm3, %v1672_v42, -inf }
 0x860   :  { %v1609_v36 = vpop.f32.mrb[52].mxu0 }
 0x861   :  { %v1667_v37 = vmul.f32 0.35355338, %v1609_v36  ;;  %v2252_v38 = vpop.f32.mrb[53].mxu0 }
 0x862   :  { %v1612_v39 = vpop.f32.mrb[54].mxu0 }
 0x863   :  { %v2253_v40 = vpop.f32.mrb[55].mxu0  ;;  %v1671_v41 = vsel %vm2472_vm2, %v1667_v37, -1e+30 }
 0x864   :  { %v1679_v43 = vsel %vm326_vm3, %v1671_v41, -inf }
 0x865   :  { %1680 = vmax.xlane.f32.xlu0 %v1679_v43 }
 0x867   :  { %1721 = vrot.lane.b32.xlu1 %v2440_v19, %s2408_s23 }
 0x869   :  { %1683 = vmax.xlane.f32.xlu0 %v1682_v44 }
 0x8e3   :  { %v1678_v45 = vpop.xlane.xlu1 %1677 }
 0x8e4   :  { %v1686_v46 = vsub.f32 %v1670_v16, %v1678_v45 }
 0x8e6   :  { %v1691_v51 = vmul.f32 1.442695, %v1686_v46 }
 0x8e7   :  { %v1722_v52 = vpop.permute.xlu1 %1721 }
 0x8e8   :  { %2379 = vpow2.f32 %v1691_v51  ;;  %v1727_v53 = vsel %vm381_vm4, %v1722_v52, 0 }
 0x8e9   :  { %2261 = vmatpush3.bf16.msra.mxu0 %v1727_v53 }
 0x8ea   :  { %v1675_v33 = vpop.xlane.xlu0 %1674  ;;  %2272 = vmatprep.subr.bf16.mxu0 %v2396_v7 }
 0x8eb   :  { %v1685_v57 = vsub.f32 %v1669_v29, %v1675_v33 }
 0x8ed   :  { %v1689_v58 = vmul.f32 1.442695, %v1685_v57 }
 0x8ef   :  { %2381 = vpow2.f32 %v1689_v58 }
 0x8f2   :  { %v2380_v60 = vpop.eup %2379  ;;  %v1681_v1 = vpop.xlane.xlu0 %1680 }
 0x8f3   :  { %v1687_v2 = vsub.f32 %v1671_v41, %v1681_v1  ;;  %v1700_v19 = vsel %vm326_vm3, %v2380_v60, 0.0 }
 0x8f4   :  { %1701 = vadd.xlane.f32.xlu0 %v1700_v19 }
 0x8f5   :  { %v1693_v5 = vmul.f32 1.442695, %v1687_v2 }
 0x8f6   :  { %v1684_v9 = vpop.xlane.xlu0 %1683 }
 0x8f7   :  { %2383 = vpow2.f32 %v1693_v5  ;;  %v1688_v10 = vsub.f32 %v1672_v42, %v1684_v9 }
 0x8f9   :  { %v2382_v11 = vpop.eup %2381  ;;  %v1695_v12 = vmul.f32 1.442695, %v1688_v10 }
 0x8fa   :  { %v1697_v13 = vsel %vm326_vm3, %v2382_v11, 0.0 }
 0x8fb   :  { %2385 = vpow2.f32 %v1695_v12  ;;  %1698 = vadd.xlane.f32.xlu1 %v1697_v13 }
 0x901   :  { %v2384_v14 = vpop.eup %2383 }
 0x902   :  { %v1703_v15 = vsel %vm326_vm3, %v2384_v14, 0.0 }
 0x903   :  { %1704 = vadd.xlane.f32.xlu1 %v1703_v15 }
 0x905   :  { %v2386_v16 = vpop.eup %2385 }
 0x906   :  { %v1706_v17 = vsel %vm326_vm3, %v2386_v16, 0.0 }
 0x907   :  { %1707 = vadd.xlane.f32.xlu0 %v1706_v17 }
 0x914   :  { %1817 = vrot.lane.b32.xlu1 %v2442_v20, %s2408_s23 }
 0x918   :  { %1865 = vrot.lane.b32.xlu1 %v2448_v22, %s2408_s23 }
 0x91c   :  { %2307 = vrot.lane.b32.xlu1 %v2306_v62, %s2409_s24 }
 0x91d   :  { %1769 = vrot.lane.b32.xlu0 %v2445_v21, %s2408_s23 }
 0x920   :  { %2317 = vrot.lane.b32.xlu1 %v2316_v8, %s2410_s25 }
 0x921   :  { %2302 = vrot.lane.b32.xlu0 %v2301_v50, %s2409_s24 }
 0x925   :  { %2312 = vrot.lane.b32.xlu0 %v2311_v55, %s2410_s25 }
 0x981   :  { %v1702_v20 = vpop.xlane.xlu0 %1701 }
 0x988   :  { %v1699_v22 = vpop.xlane.xlu1 %1698 }
 0x989   :  { %2387 = vrcp.f32 %v1699_v22 }
 0x98a   :  { %2389 = vrcp.f32 %v1702_v20 }
 0x990   :  { %v1705_v56 = vpop.xlane.xlu1 %1704 }
 0x991   :  { %2391 = vrcp.f32 %v1705_v56 }
 0x993   :  { %v2388_v21 = vpop.eup %2387 }
 0x994   :  { %v2390_v61 = vpop.eup %2389  ;;  %v1713_v62 = vmul.f32 %v2388_v21, %v2382_v11  ;;  %v1818_v18 = vpop.permute.xlu1 %1817 }
 0x995   :  { %v1708_v0 = vpop.xlane.xlu0 %1707  ;;  %v1823_v6 = vsel %vm381_vm4, %v1818_v18, 0  ;;  %v1714_v48 = vmul.f32 %v2390_v61, %v2380_v60 }
 0x996   :  { %2393 = vrcp.f32 %v1708_v0  ;;  %v1717_v47 = vpack.c.bf16 %v1713_v62, %v1713_v62 }
 0x997   :  { %v1718_v23 = vpack.c.bf16 %v1714_v48, %v1714_v48 }
 0x998   :  { %2263 = vmatmul.mubr.msk.bf16.vlgmr.msra.gmra.mrb[56].mxu0 %vm377_vm5, %v1717_v47  ;;  %v1866_v54 = vpop.permute.xlu1 %1865 }
 0x999   :  { %v1770_v50 = vpop.permute.xlu0 %1769  ;;  %2273 = vmatpush3.bf16.msra.mxu0 %v1823_v6  ;;  %2274 = vmatprep.mubr.msk.bf16.mxu0 %vm2397_vm0, %v2396_v7  ;;  %v1871_v8 = vsel %vm381_vm4, %v1866_v54, 0 }
 0x99a   :  { %v1775_v49 = vsel %vm381_vm4, %v1770_v50, 0 }
 0x99b   :  { %2267 = vmatpush3.bf16.msra.mxu1 %v1775_v49  ;;  %v2392_v55 = vpop.eup %2391 }
 0x99c   :  { %2278 = vmatprep.subr.bf16.mxu1 %v2396_v7  ;;  %v1715_v24 = vmul.f32 %v2392_v55, %v2384_v14  ;;  %v2308_v33 = vpop.permute.xlu1 %2307 }
 0x99d   :  { %v2303_v51 = vpop.permute.xlu0 %2302  ;;  %v2309_v17 = vunpack.i.l.bf16 %v2308_v33 }
 0x99e   :  { %2269 = vmatmul.mubr.msk.bf16.vlgmr.msra.gmra.mrb[56].mxu1 %vm377_vm5, %v1718_v23  ;;  %v1719_v25 = vpack.c.bf16 %v1715_v24, %v1715_v24  ;;  %v2305_v53 = vunpack.i.h.bf16 %v2303_v51  ;;  %v2304_v57 = vunpack.i.l.bf16 %v2303_v51 }
 0x99f   :  { %2279 = vmatpush3.bf16.msra.mxu1 %v1871_v8  ;;  %2280 = vmatprep.mubr.msk.bf16.mxu1 %vm2397_vm0, %v2396_v7  ;;  %v1963_v62 = vsel %vm80_vm1, %v2548_v3, %v2309_v17 }
 0x9a0   :  { %v2394_v26 = vpop.eup %2393  ;;  %2275 = vmatmul.mubr.msk.bf16.vlgmr.msra.gmra.mrb[60].mxu0 %vm377_vm5, %v1719_v25  ;;  %v1962_v1 = vsel %vm80_vm1, %v2546_v63, %v2305_v53  ;;  %v1961_v19 = vsel %vm80_vm1, %v2544_v59, %v2304_v57  ;;  %v2318_v12 = vpop.permute.xlu1 %2317 }
 0x9a1   :  { %v1716_v27 = vmul.f32 %v2394_v26, %v2386_v16  ;;  %v2313_v52 = vpop.permute.xlu0 %2312  ;;  %v2310_v16 = vunpack.i.h.bf16 %v2308_v33  ;;  %v2320_v22 = vunpack.i.h.bf16 %v2318_v12  ;;  %v2319_v56 = vunpack.i.l.bf16 %v2318_v12 }
 0x9a2   :  { %v2315_v58 = vunpack.i.h.bf16 %v2313_v52  ;;  %v2314_v60 = vunpack.i.l.bf16 %v2313_v52 }
 0x9a3   :  { %v1720_v28 = vpack.c.bf16 %v1716_v27, %v1716_v27  ;;  %v1964_v61 = vsel %vm80_vm1, %v2550_v4, %v2310_v16  ;;  %v1968_v6 = vsel %vm1965_vm6, %v1963_v62, %v2319_v56 }
 0x9a4   :  { %v1966_v10 = vsel %vm1965_vm6, %v1961_v19, %v2314_v60  ;;  %v1967_v11 = vsel %vm1965_vm6, %v1962_v1, %v2315_v58  ;;  %v1969_v47 = vsel %vm1965_vm6, %v1964_v61, %v2320_v22 }
 0x9a6   :  { %2281 = vmatmul.mubr.msk.bf16.vlgmr.msra.gmra.mrb[60].mxu1 %vm377_vm5, %v1720_v28 }
 0xa6b   :  { %v1763_v29 = vpop.f32.mrb[56].mxu0 }
 0xa6c   :  { %v2264_v30 = vpop.f32.mrb[57].mxu0 }
 0xa6d   :  { %v1766_v31 = vpop.f32.mrb[58].mxu0 }
 0xa6e   :  { %v2265_v32 = vpop.f32.mrb[59].mxu0 }
 0xa71   :  { %v1811_v34 = vpop.f32.mrb[56].mxu1 }
 0xa72   :  { %v2321_v35 = vpack.i.bf16 %v1811_v34, %v1763_v29  ;;  %v2270_v36 = vpop.f32.mrb[57].mxu1 }
 0xa73   :  { %v1814_v37 = vpop.f32.mrb[58].mxu1  ;;  %v1859_v38 = vpop.f32.mrb[60].mxu0 }
 0xa74   :  { %2322 = vrot.lane.b32.xlu0 %v2321_v35, %s2411_s26  ;;  %v2271_v39 = vpop.f32.mrb[59].mxu1  ;;  %v2276_v7 = vpop.f32.mrb[61].mxu0 }
 0xa75   :  { %v1862_v40 = vpop.f32.mrb[62].mxu0 }
 0xa76   :  { %v2277_v41 = vpop.f32.mrb[63].mxu0 }
 0xa79   :  { %v1907_v42 = vpop.f32.mrb[60].mxu1 }
 0xa7a   :  { %v2326_v43 = vpack.i.bf16 %v1907_v42, %v1859_v38  ;;  %v2282_v44 = vpop.f32.mrb[61].mxu1 }
 0xa7b   :  { %v1910_v45 = vpop.f32.mrb[62].mxu1 }
 0xa7c   :  { %2327 = vrot.lane.b32.xlu1 %v2326_v43, %s2411_s26  ;;  %v2283_v46 = vpop.f32.mrb[63].mxu1 }
 0xae6   :  { %v2323_v2 = vpop.permute.xlu0 %2322 }
 0xae7   :  { %v2325_v5 = vunpack.i.h.bf16 %v2323_v2  ;;  %v2324_v9 = vunpack.i.l.bf16 %v2323_v2 }
 0xae9   :  { %v1971_v13 = vsel %vm1970_vm7, %v1966_v10, %v2324_v9  ;;  %v1972_v14 = vsel %vm1970_vm7, %v1967_v11, %v2325_v5 }
 0xaea   :  { %v1976_v15 = vsel %vm1975_vm8, %v1971_v13, 0.0  ;;  %v1977_v63 = vsel %vm1975_vm8, %v1972_v14, 0.0 }
 0xaeb   :  { %v1980_v20 = vpack.c.bf16 %v1976_v15, %v1976_v15  ;;  %v1981_v59 = vpack.c.bf16 %v1977_v63, %v1977_v63 }
 0xaed   :  { %1984 = vst [vmem:[%s2795_s1] sm:$0x1] %v1980_v20  ;;  %1985 = vst [vmem:[%s2795_s1 + $0x1] sm:$0x1] %v1981_v59 }
 0xaee   :  { %v2328_v21 = vpop.permute.xlu1 %2327 }
 0xaef   :  { %v2330_v18 = vunpack.i.h.bf16 %v2328_v21  ;;  %v2329_v0 = vunpack.i.l.bf16 %v2328_v21 }
 0xaf1   :  { %v1974_v48 = vsel %vm1970_vm7, %v1969_v47, %v2330_v18  ;;  %v1973_v50 = vsel %vm1970_vm7, %v1968_v6, %v2329_v0 }
 0xaf2   :  { %v1979_v49 = vsel %vm1975_vm8, %v1974_v48, 0.0  ;;  %v1978_v54 = vsel %vm1975_vm8, %v1973_v50, 0.0 }
 0xaf3   :  { %v1983_v55 = vpack.c.bf16 %v1979_v49, %v1979_v49  ;;  %v1982_v8 = vpack.c.bf16 %v1978_v54, %v1978_v54 }
 0xaf5   :  { %1987 = vst [vmem:[%s2795_s1 + $0x3] sm:$0x1] %v1983_v55  ;;  %1986 = vst [vmem:[%s2795_s1 + $0x2] sm:$0x1] %v1982_v8 }

// kernel: longnet_forward.35
= control target key start
LH: loop header
LB: loop body
LE: loop exit
PB: predicated region body
PF: predicated region fallthrough
CT: control target
= control target key end

     0   :  { %v295_v2 = vmov 0   ;;  %v296_v6 = vmov 0.0   ;;  %s393_s0 = inlined_call_operand.vmem [shape: bf16[16,128], index: 0, kind: input, shape index: {}]   ;;  %s394_s1 = inlined_call_operand.vmem [shape: bf16[128,128], index: 1, kind: input, shape index: {}]   ;;  %s395_s2 = inlined_call_operand.vmem [shape: f32[16,1], index: 2, kind: input, shape index: {}]   ;;  %s396_s3 = inlined_call_operand.vmem [shape: f32[16,1], index: 3, kind: input, shape index: {}]   ;;  %s397_s4 = inlined_call_operand.vmem [shape: bf16[1,128], index: 4, kind: input, shape index: {}]   ;;  %s398_s5 = inlined_call_operand.vmem [shape: bf16[1,128], index: 5, kind: input, shape index: {}]   ;;  %s399_s6 = inlined_call_operand.hbm [shape: f32[16,128], index: 6, kind: output, shape index: {}]  }
   0x1   :  { %v49_v0 = vld [vmem:[%s396_s3] sm:$0xff]  ;;  %262 = vset.pattern.permute.xlu1 %v295_v2  ;;  %261 = vset.pattern.permute.xlu0 %v295_v2  ;;  %v50_v3 = vld [vmem:[%s396_s3 + $0x8] sm:$0xff]  ;;  %v265_v8 = vld [vmem:[%s394_s1 + $0x10] sm:$0xff]  }
   0x2   :  { %v35_v1 = vld [vmem:[%s395_s2] sm:$0xff]  ;;  %53 = vperm.xlu1 %262, %v49_v0   ;;  %v36_v5 = vld [vmem:[%s395_s2 + $0x8] sm:$0xff]  ;;  %235 = vmatprep.subr.bf16.mxu0 %v296_v6 }
   0x3   :  { %39 = vperm.xlu0 %261, %v35_v1   ;;  %v263_v4 = vld [vmem:[%s394_s1] sm:$0xff]   ;;  %v264_v7 = vld [vmem:[%s394_s1 + $0x8] sm:$0xff]  }
   0x4   :  { %236 = vmatpush3.bf16.msra.mxu0 %v263_v4 }
   0x5   :  { %237 = vmatprep.subr.bf16.mxu0 %v296_v6 }
   0x6   :  { %58 = vperm.xlu1 %262, %v50_v3  }
   0x7   :  { %44 = vperm.xlu0 %261, %v36_v5  }
   0x8   :  { %238 = vmatpush3.bf16.msra.mxu0 %v264_v7 }
   0x9   :  { %239 = vmatprep.subr.bf16.mxu0 %v296_v6 }
   0xa   :  { %11 = vsyncpa [#allocation4], 0  ;;  %vm297_vm0 = vmmov 0   ;;  %v266_v9 = vld [vmem:[%s394_s1 + $0x18] sm:$0xff]   ;;  %v267_v10 = vld [vmem:[%s394_s1 + $0x20] sm:$0xff]   ;;  %v65_v14 = vlaneseq }
   0xb   :  { %251 = vmatprep.mubr.msk.bf16.mxu0 %vm297_vm0, %v296_v6  ;;  %v268_v11 = vld [vmem:[%s394_s1 + $0x28] sm:$0xff]   ;;  %v269_v12 = vld [vmem:[%s394_s1 + $0x30] sm:$0xff]   ;;  %v270_v13 = vld [vmem:[%s394_s1 + $0x38] sm:$0xff]  }
   0xc   :  { %240 = vmatpush3.bf16.msra.mxu0 %v265_v8  ;;  %v223_v15 = vld [vmem:[%s393_s0] sm:$0xff]   ;;  %v66_v16 = vshrl.u32 %v65_v14, 7  ;;  %s298_s0 = smov [#allocation3]  }
   0xd   :  { %241 = vmatprep.subr.bf16.mxu0 %v296_v6  ;;  %v63_v17 = vld [vmem:[%s397_s4] sm:$0x1]  ;;  %v224_v18 = vunpack.c.l.bf16 %v223_v15  ;;  %v225_v25 = vunpack.c.h.bf16 %v223_v15  ;;  %s203_s1 = sshll.u32 %s298_s0, 4  ;;  %s204_s1 = int_to_ptr.vmem [resolvable:$true] %s203_s1 }
   0xe   :  { %v64_v19 = vunpack.c.l.bf16 %v63_v17  ;;  %v67_v20 = vsub.s32 0, %v66_v16  ;;  %v71_v23 = vld [vmem:[%s398_s5] sm:$0x1]  ;;  %s271_s4 = scalar_lea.vmem %s204_s1, 256  ;;  %p276_p1 = scmp.lt.s32.totalorder %s204_s1, %s204_s1 }
   0xf   :  { %v72_v28 = vunpack.c.l.bf16 %v71_v23  ;;  %p272_p0 = scmp.ne.s32.totalorder %s204_s1, %s271_s4  ;;  %p277_p2 = scmp.lt.s32.totalorder %s271_s4, %s271_s4 }
  0x10   :  { %242 = vmatpush3.bf16.msra.mxu0 %v266_v9  ;;  %v68_v26 = vrot.slane %v64_v19, %v67_v20 }
  0x11   :  { %243 = vmatprep.subr.bf16.mxu0 %v296_v6  ;;  %v76_v34 = vrot.slane %v72_v28, %v67_v20  ;;  %p278_p3 = por %p277_p2, %p276_p1 }
  0x13   :  { %p279_p4 = pnand %p278_p3, %p272_p0 }
  0x14   :  { %244 = vmatpush3.bf16.msra.mxu0 %v267_v10 }
  0x15   :  { %245 = vmatprep.subr.bf16.mxu0 %v296_v6 }
  0x18   :  { %246 = vmatpush3.bf16.msra.mxu0 %v268_v11 }
  0x19   :  { %247 = vmatprep.subr.bf16.mxu0 %v296_v6 }
  0x1c   :  { %248 = vmatpush3.bf16.msra.mxu0 %v269_v12 }
  0x1d   :  { %249 = vmatprep.subr.bf16.mxu0 %v296_v6 }
  0x20   :  { %250 = vmatpush3.bf16.msra.mxu0 %v270_v13 }
  0x81   :  { %v54_v21 = vpop.permute.xlu1 %53 }
  0x82   :  { %v40_v22 = vpop.permute.xlu0 %39 }
  0x83   :  { %v47_v24 = vsub.f32 %v224_v18, %v40_v22 }
  0x85   :  { %v61_v27 = vmul.f32 %v54_v21, %v47_v24  ;;  %v59_v31 = vpop.permute.xlu1 %58 }
  0x86   :  { %v45_v29 = vpop.permute.xlu0 %44 }
  0x87   :  { %v48_v30 = vsub.f32 %v225_v25, %v45_v29  ;;  %v69_v32 = vmul.f32 %v68_v26, %v61_v27 }
  0x89   :  { %v62_v33 = vmul.f32 %v59_v31, %v48_v30  ;;  %v77_v36 = vadd.f32 %v76_v34, %v69_v32 }
  0x8b   :  { %v70_v35 = vmul.f32 %v68_v26, %v62_v33 }
  0x8d   :  { %v78_v37 = vadd.f32 %v76_v34, %v70_v35 }
  0x8f   :  { %v79_v38 = vpack.c.bf16 %v78_v37, %v77_v36 }
  0x91   :  { %252 = vmatmul.mubr.bf16.vlgmr.msra.gmra.mrb[0].mxu0 %v79_v38 }
 0x164   :  { %v180_v39 = vpop.f32.mrb[0].mxu0 }
 0x165   :  { %196 = vst [vmem:[#allocation3] sm:$0xff] %v180_v39  ;;  %v253_v40 = vpop.f32.mrb[1].mxu0 }
 0x166   :  { %v183_v41 = vpop.f32.mrb[2].mxu0 }
 0x167   :  { %197 = vst [vmem:[#allocation3 + $0x8] sm:$0xff] %v183_v41  ;;  %v254_v42 = vpop.f32.mrb[3].mxu0 }
 0x168   :  { %282 = shalt.err (!%p279_p4)
}
 0x169   :  { %s283_s26 = scalar_lea.hbm %s399_s6, 256 }
 0x16a   :  { %p284_p5 = scmp.ne.s32.totalorder %s399_s6, %s283_s26  ;;  %p287_p6 = scmp.lt.u32.totalorder %s283_s26, %s399_s6 }
 0x16c   :  { %p289_p7 = pnand %p287_p6, %p284_p5 }
 0x16e   :  { %292 = shalt.err (!%p289_p7)
}
 0x16f   :  { %s299_s7 = smov 128   ;;  %s300_s8 = smov 8  }
 0x170   :  { %209 = dma.vmem_to_hbm [thread:$0]  %s204_s1, 256, %s399_s6, [#allocation4], %s299_s7, %s299_s7, %s300_s8  }
 0x171   :  { %293 = dma.done.wait [#allocation4], 256  }
 0x172   :  { %294 = vsyncadd [#allocation4], 4294967040 }
 0x173   :  { %213 = vsyncpa [#allocation4], 1 }

</bundles_post_ra>
